<compile_context>
chip_gen: v7x
topology: tpu7x:2x2x1
jax: 0.10.0
libtpu: 0.0.40
codegen_flags: <defaults>
</compile_context>

<pallas_src>
import functools

import jax
import jax.numpy as jnp
from jax.experimental import pallas as pl
from jax.experimental.pallas import tpu as pltpu


# ------------------------------ VMEM budgeting -------------------------------

def _vmem_limit_bytes():
    """Generation-aware scoped-VMEM limit (~85% of physical capacity)."""
    cap = 128 * 1024 * 1024
    try:
        info = pltpu.get_tpu_info()
        cap = int(getattr(info, "vmem_capacity_bytes", cap) or cap)
    except Exception:
        pass
    return int(cap * 0.85)


# ----------------------------- in-kernel helpers -----------------------------

def _layer_norm(x, w, b, eps=1e-5):
    # torch.nn.LayerNorm (biased variance), computed in f32.
    mu = jnp.mean(x, axis=-1, keepdims=True)
    var = jnp.mean(jnp.square(x - mu), axis=-1, keepdims=True)
    return (x - mu) * jax.lax.rsqrt(var + eps) * w + b


def _gelu(x):
    # TODO(synk): torch nn.GELU defaults to erf-exact GELU; tanh approximation
    # is used here (Mosaic-safe transcendentals), diff ~1e-3.
    return jax.nn.gelu(x, approximate=True)


def _mha(xq_b, xkv_b, wq, bq, wk, wv, bv, wo, bo, *, n_head, causal):
    """Multi-head attention for one batch element.

    xq_b : (Tq, D) bf16 (pre-LayerNorm'ed query source)
    xkv_b: (Tk, D) bf16 (query source for self-attn, audio features for cross)
    wq/wk/wv/wo: (D, D) bf16; bq/bv/bo: (1, D) f32 (key Linear has no bias).
    Scale folded into q only; q/k/v cast to bf16 once; single wo matmul.
    """
    d = wq.shape[-1]
    hd = d // n_head
    scale = float(hd) ** -0.5          # == (hd**-0.25 on q) * (hd**-0.25 on k)

    q = ((jnp.dot(xq_b, wq, preferred_element_type=jnp.float32) + bq) * scale
         ).astype(jnp.bfloat16)
    k = jnp.dot(xkv_b, wk, preferred_element_type=jnp.float32
                ).astype(jnp.bfloat16)                       # key Linear: no bias
    v = (jnp.dot(xkv_b, wv, preferred_element_type=jnp.float32) + bv
         ).astype(jnp.bfloat16)

    tq, tk = xq_b.shape[0], xkv_b.shape[0]
    if causal:
        row = jax.lax.broadcasted_iota(jnp.int32, (tq, tk), 0)
        col = jax.lax.broadcasted_iota(jnp.int32, (tq, tk), 1)
        keep = col <= row

    # TODO(synk): head-batched dot_general / 128-lane head pairs would remove
    # the per-head mid-vreg slicing for hd=64 models.
    ctx = []
    for h in range(n_head):                                  # static unroll
        sl = slice(h * hd, (h + 1) * hd)
        s = jax.lax.dot_general(q[:, sl], k[:, sl], (((1,), (1,)), ((), ())),
                                preferred_element_type=jnp.float32)   # (Tq, Tk)
        if causal:
            s = jnp.where(keep, s, -jnp.inf)
        s = s - jnp.max(s, axis=-1, keepdims=True)
        e = jnp.exp(s)                                       # f32 softmax
        p = (e / jnp.sum(e, axis=-1, keepdims=True)).astype(jnp.bfloat16)
        ctx.append(jnp.dot(p, v[:, sl], preferred_element_type=jnp.float32))
    ctx = jnp.concatenate(ctx, axis=-1).astype(jnp.bfloat16)           # (Tq, D)
    # Single full-width output projection (K = D).
    return jnp.dot(ctx, wo, preferred_element_type=jnp.float32) + bo


# ------------------------------- Pallas kernels -------------------------------

def _decoder_stack_kernel(x_ref, xa_ref, vec_ref,
                          a_wq, a_wk, a_wv, a_wo,
                          c_wq, c_wk, c_wv, c_wo,
                          m_w1, m_w2, m_b1,
                          lnw_ref, lnb_ref,
                          o_ref, x_carry, *, n_head):
    # grid = (batch_split, layer, batch_inner).  The residual stream lives in
    # x_carry (per-core scratch, indexed by the inner batch id) across the
    # layer axis; per-layer weights are selected by the layer grid index and
    # stay resident across the inner batch axis (no re-DMA).
    layer = pl.program_id(1)
    bi = pl.program_id(2)

    @pl.when(layer == 0)
    def _():
        x_carry[bi] = x_ref[0].astype(jnp.float32)

    x = x_carry[bi]                        # (T, D) f32 residual stream
    xa = xa_ref[0]                         # (Ta, D) bf16 audio features
    vec = vec_ref[0]                       # (13, D) f32 packed LN/bias vectors

    a_lnw, a_lnb, a_bq, a_bv, a_bo = [vec[i:i + 1] for i in range(0, 5)]
    c_lnw, c_lnb, c_bq, c_bv, c_bo = [vec[i:i + 1] for i in range(5, 10)]
    m_lnw, m_lnb, m_b2 = [vec[i:i + 1] for i in range(10, 13)]

    # --- self-attention (causal) ---
    xn = _layer_norm(x, a_lnw, a_lnb).astype(jnp.bfloat16)
    x = x + _mha(xn, xn, a_wq[0], a_bq, a_wk[0], a_wv[0], a_bv, a_wo[0], a_bo,
                 n_head=n_head, causal=True)

    # --- cross-attention over audio features (no mask) ---
    xn = _layer_norm(x, c_lnw, c_lnb).astype(jnp.bfloat16)
    x = x + _mha(xn, xa, c_wq[0], c_bq, c_wk[0], c_wv[0], c_bv, c_wo[0], c_bo,
                 n_head=n_head, causal=False)

    # --- MLP ---
    # TODO(synk): for v7x + whisper-medium/large, tile m_w1/m_w2 along the 4D
    # hidden dim (or split the layer into sub-module grid steps) to keep the
    # per-step weight set double-bufferable within 64 MiB VMEM.
    xn = _layer_norm(x, m_lnw, m_lnb).astype(jnp.bfloat16)
    h = _gelu(jnp.dot(xn, m_w1[0], preferred_element_type=jnp.float32) + m_b1[0])
    x = x + jnp.dot(h.astype(jnp.bfloat16), m_w2[0],
                    preferred_element_type=jnp.float32) + m_b2

    x_carry[bi] = x

    @pl.when(layer == pl.num_programs(1) - 1)
    def _():
        # Final LayerNorm fused here -> emit bf16 (half the inter-kernel HBM).
        o_ref[0] = _layer_norm(x, lnw_ref[...], lnb_ref[...]).astype(o_ref.dtype)


def _logits_kernel(x_ref, emb_ref, o_ref):
    # x is already final-LayerNorm'ed bf16; tied-embedding logits tile is
    # lane-dense (T, v_tile).  Both grid axes are fully parallel.
    o_ref[0] = jax.lax.dot_general(x_ref[0], emb_ref[...],
                                   (((1,), (1,)), ((), ())),
                                   preferred_element_type=jnp.float32)


# ------------------------------- host wrappers -------------------------------

_MAT_NAMES = ('a_wq', 'a_wk', 'a_wv', 'a_wo',
              'c_wq', 'c_wk', 'c_wv', 'c_wo',
              'm_w1', 'm_w2')
_VEC_NAMES = ('a_lnw', 'a_lnb', 'a_bq', 'a_bv', 'a_bo',
              'c_lnw', 'c_lnb', 'c_bq', 'c_bv', 'c_bo',
              'm_lnw', 'm_lnb', 'm_b2')


def decoder_stack(x, xa, params, n_head):
    """All residual attention blocks + final LayerNorm in one pallas_call."""
    B, T, D = x.shape
    _, Ta, _ = xa.shape
    L = params['a_wq'].shape[0]

    # Pack the 13 small per-layer LN/bias vectors into one (L, 13, D) array.
    vec_pack = jnp.concatenate([params[n].astype(jnp.float32)
                                for n in _VEC_NAMES], axis=1)
    mats = [params[n] for n in _MAT_NAMES]
    m_b1 = params['m_b1']
    ln_w, ln_b = params['ln_w'], params['ln_b']

    # Leading size-2 batch split so v7x's two TensorCores both get work while
    # weights are still streamed only once per core.
    b_split = 2 if (B >= 2 and B % 2 == 0) else 1
    nbi = B // b_split

    def act_map(bo, l, bi):
        return (bo * nbi + bi, 0, 0)

    def wt_map(bo, l, bi):
        return (l, 0, 0)

    def fin_map(bo, l, bi):
        return (0, 0)

    in_specs = [
        pl.BlockSpec((1, T, D), act_map),                     # x (embeddings)
        pl.BlockSpec((1, Ta, D), act_map),                    # xa
        pl.BlockSpec((1, len(_VEC_NAMES), D), wt_map),        # packed LN/bias
    ]
    in_specs += [pl.BlockSpec((1,) + m.shape[1:], wt_map) for m in mats]
    in_specs += [pl.BlockSpec((1, 1, 4 * D), wt_map),         # m_b1
                 pl.BlockSpec((1, D), fin_map),               # final ln_w
                 pl.BlockSpec((1, D), fin_map)]               # final ln_b

    # TODO(synk): for small T, fold several batch rows into the matmul M dim
    # to improve MXU row utilization (v6e/v7x 256-row MXU).
    return pl.pallas_call(
        functools.partial(_decoder_stack_kernel, n_head=n_head),
        out_shape=jax.ShapeDtypeStruct((B, T, D), jnp.bfloat16),
        grid=(b_split, L, nbi),
        in_specs=in_specs,
        out_specs=pl.BlockSpec((1, T, D), act_map),
        scratch_shapes=[pltpu.VMEM((nbi, T, D), jnp.float32)],
        compiler_params=pltpu.CompilerParams(
            # Layer axis carries the residual (arbitrary); keeping the inner
            # batch axis "arbitrary" as well avoids parallel-after-arbitrary
            # ordering constraints — the leading split provides core parallelism.
            dimension_semantics=("parallel", "arbitrary", "arbitrary"),
            vmem_limit_bytes=_vmem_limit_bytes()),
    )(x, xa, vec_pack, *mats, m_b1, ln_w, ln_b)


def ln_logits(x, emb, *, v_tile=512):
    """Tied-embedding logits matmul (input x is already LayerNorm'ed, bf16)."""
    B, T, D = x.shape
    V = emb.shape[0]
    if V >= 128:
        v_tile = max(128, (min(v_tile, V) // 128) * 128)      # lane-dense tiles
    else:
        v_tile = V
    V_pad = pl.cdiv(V, v_tile) * v_tile
    if V_pad != V:
        emb = jnp.pad(emb, ((0, V_pad - V), (0, 0)))          # ragged-vocab pad

    logits = pl.pallas_call(
        _logits_kernel,
        out_shape=jax.ShapeDtypeStruct((B, T, V_pad), jnp.float32),
        # Vocab axis OUTER, batch inner: the (v_tile, D) embedding tile stays
        # resident across batch elements (streamed from HBM once per tile).
        grid=(V_pad // v_tile, B),
        in_specs=[
            pl.BlockSpec((1, T, D), lambda v, b: (b, 0, 0)),
            pl.BlockSpec((v_tile, D), lambda v, b: (v, 0)),
        ],
        out_specs=pl.BlockSpec((1, T, v_tile), lambda v, b: (b, 0, v)),
        compiler_params=pltpu.CompilerParams(
            dimension_semantics=("parallel", "parallel"),
            vmem_limit_bytes=_vmem_limit_bytes()),
    )(x, emb)
    return logits if V_pad == V else logits[..., :V]


def text_decoder_forward(tokens, xa, params, n_head):
    """tokens: (B, T) int32 text tokens, T <= n_ctx; xa: (B, Ta, n_state)."""
    T = tokens.shape[-1]
    # TODO(synk): data-dependent token-embedding row gather is left to XLA
    # (jnp.take); a Pallas scalar-prefetch gather is possible but not the
    # bottleneck of this forward pass.
    x = (jnp.take(params['tok_emb'], tokens, axis=0).astype(jnp.float32)
         + params['pos_emb'][:T])                       # offset = 0 (no kv_cache)
    x = decoder_stack(x, xa, params, n_head)            # all blocks + final LN
    return ln_logits(x, params['tok_emb'])


# ------------------------------ parameter setup ------------------------------

def init_params(key, n_vocab, n_ctx, n_state, n_layer):
    D = n_state
    keys = iter(jax.random.split(key, 4 + 16 * n_layer))

    def nrm(shape, dtype=jnp.bfloat16, scale=0.02):
        return (scale * jax.random.normal(next(keys), shape, jnp.float32)
                ).astype(dtype)

    L = n_layer
    params = {
        'tok_emb': nrm((n_vocab, D)),                      # tied: embed + logits
        'pos_emb': nrm((n_ctx, D), jnp.float32),
        'ln_w': jnp.ones((1, D), jnp.float32),
        'ln_b': jnp.zeros((1, D), jnp.float32),
        # ----- per-layer weights, stacked along a leading layer axis -----
        # self-attention
        'a_lnw': jnp.ones((L, 1, D), jnp.float32),
        'a_lnb': jnp.zeros((L, 1, D), jnp.float32),
        'a_wq': nrm((L, D, D)), 'a_bq': nrm((L, 1, D), jnp.float32),
        'a_wk': nrm((L, D, D)),                            # key Linear: no bias
        'a_wv': nrm((L, D, D)), 'a_bv': nrm((L, 1, D), jnp.float32),
        'a_wo': nrm((L, D, D)), 'a_bo': nrm((L, 1, D), jnp.float32),
        # cross-attention
        'c_lnw': jnp.ones((L, 1, D), jnp.float32),
        'c_lnb': jnp.zeros((L, 1, D), jnp.float32),
        'c_wq': nrm((L, D, D)), 'c_bq': nrm((L, 1, D), jnp.float32),
        'c_wk': nrm((L, D, D)),
        'c_wv': nrm((L, D, D)), 'c_bv': nrm((L, 1, D), jnp.float32),
        'c_wo': nrm((L, D, D)), 'c_bo': nrm((L, 1, D), jnp.float32),
        # MLP
        'm_lnw': jnp.ones((L, 1, D), jnp.float32),
        'm_lnb': jnp.zeros((L, 1, D), jnp.float32),
        'm_w1': nrm((L, D, 4 * D)), 'm_b1': nrm((L, 1, 4 * D), jnp.float32),
        'm_w2': nrm((L, 4 * D, D)), 'm_b2': nrm((L, 1, D), jnp.float32),
    }
    return params


# ------------------------------------ main ------------------------------------

if __name__ == "__main__":
    n_vocab, n_ctx, n_state, n_head, n_layer = 512, 16, 128, 4, 2
    n_audio_ctx = 32
    B, T = 2, 16                     # T <= n_ctx

    key = jax.random.PRNGKey(0)
    k_tok, k_xa, k_p = jax.random.split(key, 3)
    tokens = jax.random.randint(k_tok, (B, T), 0, n_vocab, dtype=jnp.int32)
    xa = jax.random.normal(k_xa, (B, n_audio_ctx, n_state),
                           jnp.float32).astype(jnp.bfloat16)
    params = init_params(k_p, n_vocab, n_ctx, n_state, n_layer)

    logits = text_decoder_forward(tokens, xa, params, n_head)
    logits = jax.block_until_ready(logits)
    assert logits.shape == (B, T, n_vocab), logits.shape
    assert bool(jnp.all(jnp.isfinite(logits)))
    print("KERNEL_OK")
</pallas_src>

<mosaic_0001>
module attributes {stable_mosaic.version = 11 : i64} {
  func.func @_decoder_stack_kernel(%arg0: i32, %arg1: i32, %arg2: i32, %arg3: memref<1x16x128xf32, #tpu.memory_space<vmem>>, %arg4: memref<1x32x128xbf16, #tpu.memory_space<vmem>>, %arg5: memref<1x13x128xf32, #tpu.memory_space<vmem>>, %arg6: memref<1x128x128xbf16, #tpu.memory_space<vmem>>, %arg7: memref<1x128x128xbf16, #tpu.memory_space<vmem>>, %arg8: memref<1x128x128xbf16, #tpu.memory_space<vmem>>, %arg9: memref<1x128x128xbf16, #tpu.memory_space<vmem>>, %arg10: memref<1x128x128xbf16, #tpu.memory_space<vmem>>, %arg11: memref<1x128x128xbf16, #tpu.memory_space<vmem>>, %arg12: memref<1x128x128xbf16, #tpu.memory_space<vmem>>, %arg13: memref<1x128x128xbf16, #tpu.memory_space<vmem>>, %arg14: memref<1x128x512xbf16, #tpu.memory_space<vmem>>, %arg15: memref<1x512x128xbf16, #tpu.memory_space<vmem>>, %arg16: memref<1x1x512xf32, #tpu.memory_space<vmem>>, %arg17: memref<1x128xf32, #tpu.memory_space<vmem>>, %arg18: memref<1x128xf32, #tpu.memory_space<vmem>>, %arg19: memref<1x16x128xbf16, #tpu.memory_space<vmem>>, %arg20: memref<1x16x128xf32, #tpu.memory_space<vmem>>) attributes {dimension_semantics = [#tpu.dimension_semantics<parallel>, #tpu.dimension_semantics<arbitrary>, #tpu.dimension_semantics<arbitrary>], iteration_bounds = array<i64: 2, 2, 1>, scalar_prefetch = 0 : i64, scratch_operands = 1 : i64, tpu.core_type = #tpu.core_type<tc>, window_params = [{transform_indices = @transform_0, window_bounds = array<i64: 1, 16, 128>}, {transform_indices = @transform_1, window_bounds = array<i64: 1, 32, 128>}, {transform_indices = @transform_2, window_bounds = array<i64: 1, 13, 128>}, {transform_indices = @transform_3, window_bounds = array<i64: 1, 128, 128>}, {transform_indices = @transform_4, window_bounds = array<i64: 1, 128, 128>}, {transform_indices = @transform_5, window_bounds = array<i64: 1, 128, 128>}, {transform_indices = @transform_6, window_bounds = array<i64: 1, 128, 128>}, {transform_indices = @transform_7, window_bounds = array<i64: 1, 128, 128>}, {transform_indices = @transform_8, window_bounds = array<i64: 1, 128, 128>}, {transform_indices = @transform_9, window_bounds = array<i64: 1, 128, 128>}, {transform_indices = @transform_10, window_bounds = array<i64: 1, 128, 128>}, {transform_indices = @transform_11, window_bounds = array<i64: 1, 128, 512>}, {transform_indices = @transform_12, window_bounds = array<i64: 1, 512, 128>}, {transform_indices = @transform_13, window_bounds = array<i64: 1, 1, 512>}, {pipeline_mode = #tpu.pipeline_mode<synchronous>, transform_indices = @transform_14, window_bounds = array<i64: 1, 128>}, {pipeline_mode = #tpu.pipeline_mode<synchronous>, transform_indices = @transform_15, window_bounds = array<i64: 1, 128>}, {transform_indices = @transform_16, window_bounds = array<i64: 1, 16, 128>}]} {
    %c0_i32 = arith.constant 0 : i32
    %0 = arith.cmpi eq, %arg1, %c0_i32 : i32
    %1 = arith.extui %0 : i1 to i32
    %c0_i32_0 = arith.constant 0 : i32
    %2 = arith.cmpi ne, %1, %c0_i32_0 : i32
    scf.if %2 {
      %c0_110 = arith.constant 0 : index
      %c0_111 = arith.constant 0 : index
      %c0_112 = arith.constant 0 : index
      %309 = vector.load %arg3[%c0_110, %c0_111, %c0_112] : memref<1x16x128xf32, #tpu.memory_space<vmem>>, vector<1x16x128xf32>
      %310 = vector.shape_cast %309 : vector<1x16x128xf32> to vector<16x128xf32>
      %311 = arith.index_cast %arg2 : i32 to index
      %c0_113 = arith.constant 0 : index
      %c0_114 = arith.constant 0 : index
      %312 = vector.load %arg20[%311, %c0_113, %c0_114] : memref<1x16x128xf32, #tpu.memory_space<vmem>>, vector<1x16x128xf32>
      %313 = vector.shape_cast %312 : vector<1x16x128xf32> to vector<16x128xf32>
      %314 = vector.shape_cast %310 : vector<16x128xf32> to vector<1x16x128xf32>
      tpu.vector_store %arg20[%311, %c0_113, %c0_114], %314 {strides = array<i32>} : memref<1x16x128xf32, #tpu.memory_space<vmem>>, vector<1x16x128xf32>,
    } else {
    }
    %3 = arith.index_cast %arg2 : i32 to index
    %c0 = arith.constant 0 : index
    %c0_1 = arith.constant 0 : index
    %4 = vector.load %arg20[%3, %c0, %c0_1] : memref<1x16x128xf32, #tpu.memory_space<vmem>>, vector<1x16x128xf32>
    %5 = vector.shape_cast %4 : vector<1x16x128xf32> to vector<16x128xf32>
    %c0_2 = arith.constant 0 : index
    %c0_3 = arith.constant 0 : index
    %c0_4 = arith.constant 0 : index
    %6 = vector.load %arg4[%c0_2, %c0_3, %c0_4] : memref<1x32x128xbf16, #tpu.memory_space<vmem>>, vector<1x32x128xbf16>
    %7 = vector.shape_cast %6 : vector<1x32x128xbf16> to vector<32x128xbf16>
    %c0_5 = arith.constant 0 : index
    %c0_6 = arith.constant 0 : index
    %c0_7 = arith.constant 0 : index
    %8 = vector.load %arg5[%c0_5, %c0_6, %c0_7] : memref<1x13x128xf32, #tpu.memory_space<vmem>>, vector<1x13x128xf32>
    %9 = vector.shape_cast %8 : vector<1x13x128xf32> to vector<13x128xf32>
    %10 = vector.extract_strided_slice %9 {offsets = [0, 0], sizes = [1, 128], strides = [1, 1]} : vector<13x128xf32> to vector<1x128xf32>
    %11 = vector.extract_strided_slice %9 {offsets = [1, 0], sizes = [1, 128], strides = [1, 1]} : vector<13x128xf32> to vector<1x128xf32>
    %12 = vector.extract_strided_slice %9 {offsets = [2, 0], sizes = [1, 128], strides = [1, 1]} : vector<13x128xf32> to vector<1x128xf32>
    %13 = vector.extract_strided_slice %9 {offsets = [3, 0], sizes = [1, 128], strides = [1, 1]} : vector<13x128xf32> to vector<1x128xf32>
    %14 = vector.extract_strided_slice %9 {offsets = [4, 0], sizes = [1, 128], strides = [1, 1]} : vector<13x128xf32> to vector<1x128xf32>
    %15 = vector.extract_strided_slice %9 {offsets = [5, 0], sizes = [1, 128], strides = [1, 1]} : vector<13x128xf32> to vector<1x128xf32>
    %16 = vector.extract_strided_slice %9 {offsets = [6, 0], sizes = [1, 128], strides = [1, 1]} : vector<13x128xf32> to vector<1x128xf32>
    %17 = vector.extract_strided_slice %9 {offsets = [7, 0], sizes = [1, 128], strides = [1, 1]} : vector<13x128xf32> to vector<1x128xf32>
    %18 = vector.extract_strided_slice %9 {offsets = [8, 0], sizes = [1, 128], strides = [1, 1]} : vector<13x128xf32> to vector<1x128xf32>
    %19 = vector.extract_strided_slice %9 {offsets = [9, 0], sizes = [1, 128], strides = [1, 1]} : vector<13x128xf32> to vector<1x128xf32>
    %20 = vector.extract_strided_slice %9 {offsets = [10, 0], sizes = [1, 128], strides = [1, 1]} : vector<13x128xf32> to vector<1x128xf32>
    %21 = vector.extract_strided_slice %9 {offsets = [11, 0], sizes = [1, 128], strides = [1, 1]} : vector<13x128xf32> to vector<1x128xf32>
    %22 = vector.extract_strided_slice %9 {offsets = [12, 0], sizes = [1, 128], strides = [1, 1]} : vector<13x128xf32> to vector<1x128xf32>
    %cst = arith.constant dense<0.000000e+00> : vector<16xf32>
    %23 = vector.multi_reduction <add>, %5, %cst [1] : vector<16x128xf32> to vector<16xf32>
    %24 = vector.shape_cast %23 : vector<16xf32> to vector<16x1xf32>
    %cst_8 = arith.constant 1.280000e+02 : f32
    %25 = vector.broadcast %cst_8 : f32 to vector<16x1xf32>
    %26 = arith.divf %24, %25 : vector<16x1xf32>
    %27 = vector.broadcast %26 : vector<16x1xf32> to vector<16x128xf32>
    %28 = arith.subf %5, %27 : vector<16x128xf32>
    %29 = arith.mulf %28, %28 : vector<16x128xf32>
    %cst_9 = arith.constant dense<0.000000e+00> : vector<16xf32>
    %30 = vector.multi_reduction <add>, %29, %cst_9 [1] : vector<16x128xf32> to vector<16xf32>
    %31 = vector.shape_cast %30 : vector<16xf32> to vector<16x1xf32>
    %cst_10 = arith.constant 1.280000e+02 : f32
    %32 = vector.broadcast %cst_10 : f32 to vector<16x1xf32>
    %33 = arith.divf %31, %32 : vector<16x1xf32>
    %34 = vector.broadcast %26 : vector<16x1xf32> to vector<16x128xf32>
    %35 = arith.subf %5, %34 : vector<16x128xf32>
    %cst_11 = arith.constant 9.99999974E-6 : f32
    %36 = vector.broadcast %cst_11 : f32 to vector<16x1xf32>
    %37 = arith.addf %33, %36 : vector<16x1xf32>
    %38 = math.rsqrt %37 : vector<16x1xf32>
    %39 = vector.broadcast %38 : vector<16x1xf32> to vector<16x128xf32>
    %40 = arith.mulf %35, %39 : vector<16x128xf32>
    %41 = vector.broadcast %10 : vector<1x128xf32> to vector<16x128xf32>
    %42 = arith.mulf %40, %41 : vector<16x128xf32>
    %43 = vector.broadcast %11 : vector<1x128xf32> to vector<16x128xf32>
    %44 = arith.addf %42, %43 : vector<16x128xf32>
    %45 = arith.truncf %44 : vector<16x128xf32> to vector<16x128xbf16>
    %c0_12 = arith.constant 0 : index
    %c0_13 = arith.constant 0 : index
    %c0_14 = arith.constant 0 : index
    %46 = vector.load %arg6[%c0_12, %c0_13, %c0_14] : memref<1x128x128xbf16, #tpu.memory_space<vmem>>, vector<1x128x128xbf16>
    %47 = vector.shape_cast %46 : vector<1x128x128xbf16> to vector<128x128xbf16>
    %c0_15 = arith.constant 0 : index
    %c0_16 = arith.constant 0 : index
    %c0_17 = arith.constant 0 : index
    %48 = vector.load %arg7[%c0_15, %c0_16, %c0_17] : memref<1x128x128xbf16, #tpu.memory_space<vmem>>, vector<1x128x128xbf16>
    %49 = vector.shape_cast %48 : vector<1x128x128xbf16> to vector<128x128xbf16>
    %c0_18 = arith.constant 0 : index
    %c0_19 = arith.constant 0 : index
    %c0_20 = arith.constant 0 : index
    %50 = vector.load %arg8[%c0_18, %c0_19, %c0_20] : memref<1x128x128xbf16, #tpu.memory_space<vmem>>, vector<1x128x128xbf16>
    %51 = vector.shape_cast %50 : vector<1x128x128xbf16> to vector<128x128xbf16>
    %c0_21 = arith.constant 0 : index
    %c0_22 = arith.constant 0 : index
    %c0_23 = arith.constant 0 : index
    %52 = vector.load %arg9[%c0_21, %c0_22, %c0_23] : memref<1x128x128xbf16, #tpu.memory_space<vmem>>, vector<1x128x128xbf16>
    %53 = vector.shape_cast %52 : vector<1x128x128xbf16> to vector<128x128xbf16>
    %cst_24 = arith.constant dense<0.000000e+00> : vector<16x128xf32>
    %54 = tpu.matmul %45, %47, %cst_24 {dimension_numbers = #tpu.dot_dimension_numbers<[1], [0], [0], [1], [0, 0, 1, 1], [], []>} : vector<16x128xbf16>, vector<128x128xbf16>, vector<16x128xf32> -> vector<16x128xf32>
    %55 = vector.broadcast %12 : vector<1x128xf32> to vector<16x128xf32>
    %56 = arith.addf %54, %55 : vector<16x128xf32>
    %cst_25 = arith.constant 0.176776692 : f32
    %57 = vector.broadcast %cst_25 : f32 to vector<16x128xf32>
    %58 = arith.mulf %56, %57 : vector<16x128xf32>
    %59 = arith.truncf %58 : vector<16x128xf32> to vector<16x128xbf16>
    %cst_26 = arith.constant dense<0.000000e+00> : vector<16x128xf32>
    %60 = tpu.matmul %45, %49, %cst_26 {dimension_numbers = #tpu.dot_dimension_numbers<[1], [0], [0], [1], [0, 0, 1, 1], [], []>} : vector<16x128xbf16>, vector<128x128xbf16>, vector<16x128xf32> -> vector<16x128xf32>
    %61 = arith.truncf %60 : vector<16x128xf32> to vector<16x128xbf16>
    %cst_27 = arith.constant dense<0.000000e+00> : vector<16x128xf32>
    %62 = tpu.matmul %45, %51, %cst_27 {dimension_numbers = #tpu.dot_dimension_numbers<[1], [0], [0], [1], [0, 0, 1, 1], [], []>} : vector<16x128xbf16>, vector<128x128xbf16>, vector<16x128xf32> -> vector<16x128xf32>
    %63 = vector.broadcast %13 : vector<1x128xf32> to vector<16x128xf32>
    %64 = arith.addf %62, %63 : vector<16x128xf32>
    %65 = arith.truncf %64 : vector<16x128xf32> to vector<16x128xbf16>
    %66 = tpu.iota {dimensions = array<i32: 0>} : vector<16x16xi32>
    %67 = tpu.iota {dimensions = array<i32: 1>} : vector<16x16xi32>
    %68 = arith.cmpi sle, %67, %66 : vector<16x16xi32>
    %69 = vector.extract_strided_slice %59 {offsets = [0, 0], sizes = [16, 32], strides = [1, 1]} : vector<16x128xbf16> to vector<16x32xbf16>
    %70 = vector.extract_strided_slice %61 {offsets = [0, 0], sizes = [16, 32], strides = [1, 1]} : vector<16x128xbf16> to vector<16x32xbf16>
    %cst_28 = arith.constant dense<0.000000e+00> : vector<16x16xf32>
    %71 = tpu.matmul %69, %70, %cst_28 {dimension_numbers = #tpu.dot_dimension_numbers<[1], [1], [0], [0], [0, 0, 1, 0], [], []>} : vector<16x32xbf16>, vector<16x32xbf16>, vector<16x16xf32> -> vector<16x16xf32>
    %cst_29 = arith.constant 0xFF800000 : f32
    %72 = vector.broadcast %cst_29 : f32 to vector<16x16xf32>
    %73 = arith.select %68, %71, %72 : vector<16x16xi1>, vector<16x16xf32>
    %cst_30 = arith.constant dense<0xFF800000> : vector<16xf32>
    %74 = vector.multi_reduction <maximumf>, %73, %cst_30 [1] : vector<16x16xf32> to vector<16xf32>
    %75 = vector.shape_cast %74 : vector<16xf32> to vector<16x1xf32>
    %76 = vector.broadcast %75 : vector<16x1xf32> to vector<16x16xf32>
    %77 = arith.subf %73, %76 : vector<16x16xf32>
    %78 = math.exp %77 : vector<16x16xf32>
    %cst_31 = arith.constant dense<0.000000e+00> : vector<16xf32>
    %79 = vector.multi_reduction <add>, %78, %cst_31 [1] : vector<16x16xf32> to vector<16xf32>
    %80 = vector.shape_cast %79 : vector<16xf32> to vector<16x1xf32>
    %81 = vector.broadcast %80 : vector<16x1xf32> to vector<16x16xf32>
    %82 = arith.divf %78, %81 : vector<16x16xf32>
    %83 = arith.truncf %82 : vector<16x16xf32> to vector<16x16xbf16>
    %84 = vector.extract_strided_slice %65 {offsets = [0, 0], sizes = [16, 32], strides = [1, 1]} : vector<16x128xbf16> to vector<16x32xbf16>
    %cst_32 = arith.constant dense<0.000000e+00> : vector<16x32xf32>
    %85 = tpu.matmul %83, %84, %cst_32 {dimension_numbers = #tpu.dot_dimension_numbers<[1], [0], [0], [1], [0, 0, 1, 1], [], []>} : vector<16x16xbf16>, vector<16x32xbf16>, vector<16x32xf32> -> vector<16x32xf32>
    %86 = vector.extract_strided_slice %59 {offsets = [0, 32], sizes = [16, 32], strides = [1, 1]} : vector<16x128xbf16> to vector<16x32xbf16>
    %87 = vector.extract_strided_slice %61 {offsets = [0, 32], sizes = [16, 32], strides = [1, 1]} : vector<16x128xbf16> to vector<16x32xbf16>
    %cst_33 = arith.constant dense<0.000000e+00> : vector<16x16xf32>
    %88 = tpu.matmul %86, %87, %cst_33 {dimension_numbers = #tpu.dot_dimension_numbers<[1], [1], [0], [0], [0, 0, 1, 0], [], []>} : vector<16x32xbf16>, vector<16x32xbf16>, vector<16x16xf32> -> vector<16x16xf32>
    %cst_34 = arith.constant 0xFF800000 : f32
    %89 = vector.broadcast %cst_34 : f32 to vector<16x16xf32>
    %90 = arith.select %68, %88, %89 : vector<16x16xi1>, vector<16x16xf32>
    %cst_35 = arith.constant dense<0xFF800000> : vector<16xf32>
    %91 = vector.multi_reduction <maximumf>, %90, %cst_35 [1] : vector<16x16xf32> to vector<16xf32>
    %92 = vector.shape_cast %91 : vector<16xf32> to vector<16x1xf32>
    %93 = vector.broadcast %92 : vector<16x1xf32> to vector<16x16xf32>
    %94 = arith.subf %90, %93 : vector<16x16xf32>
    %95 = math.exp %94 : vector<16x16xf32>
    %cst_36 = arith.constant dense<0.000000e+00> : vector<16xf32>
    %96 = vector.multi_reduction <add>, %95, %cst_36 [1] : vector<16x16xf32> to vector<16xf32>
    %97 = vector.shape_cast %96 : vector<16xf32> to vector<16x1xf32>
    %98 = vector.broadcast %97 : vector<16x1xf32> to vector<16x16xf32>
    %99 = arith.divf %95, %98 : vector<16x16xf32>
    %100 = arith.truncf %99 : vector<16x16xf32> to vector<16x16xbf16>
    %101 = vector.extract_strided_slice %65 {offsets = [0, 32], sizes = [16, 32], strides = [1, 1]} : vector<16x128xbf16> to vector<16x32xbf16>
    %cst_37 = arith.constant dense<0.000000e+00> : vector<16x32xf32>
    %102 = tpu.matmul %100, %101, %cst_37 {dimension_numbers = #tpu.dot_dimension_numbers<[1], [0], [0], [1], [0, 0, 1, 1], [], []>} : vector<16x16xbf16>, vector<16x32xbf16>, vector<16x32xf32> -> vector<16x32xf32>
    %103 = vector.extract_strided_slice %59 {offsets = [0, 64], sizes = [16, 32], strides = [1, 1]} : vector<16x128xbf16> to vector<16x32xbf16>
    %104 = vector.extract_strided_slice %61 {offsets = [0, 64], sizes = [16, 32], strides = [1, 1]} : vector<16x128xbf16> to vector<16x32xbf16>
    %cst_38 = arith.constant dense<0.000000e+00> : vector<16x16xf32>
    %105 = tpu.matmul %103, %104, %cst_38 {dimension_numbers = #tpu.dot_dimension_numbers<[1], [1], [0], [0], [0, 0, 1, 0], [], []>} : vector<16x32xbf16>, vector<16x32xbf16>, vector<16x16xf32> -> vector<16x16xf32>
    %cst_39 = arith.constant 0xFF800000 : f32
    %106 = vector.broadcast %cst_39 : f32 to vector<16x16xf32>
    %107 = arith.select %68, %105, %106 : vector<16x16xi1>, vector<16x16xf32>
    %cst_40 = arith.constant dense<0xFF800000> : vector<16xf32>
    %108 = vector.multi_reduction <maximumf>, %107, %cst_40 [1] : vector<16x16xf32> to vector<16xf32>
    %109 = vector.shape_cast %108 : vector<16xf32> to vector<16x1xf32>
    %110 = vector.broadcast %109 : vector<16x1xf32> to vector<16x16xf32>
    %111 = arith.subf %107, %110 : vector<16x16xf32>
    %112 = math.exp %111 : vector<16x16xf32>
    %cst_41 = arith.constant dense<0.000000e+00> : vector<16xf32>
    %113 = vector.multi_reduction <add>, %112, %cst_41 [1] : vector<16x16xf32> to vector<16xf32>
    %114 = vector.shape_cast %113 : vector<16xf32> to vector<16x1xf32>
    %115 = vector.broadcast %114 : vector<16x1xf32> to vector<16x16xf32>
    %116 = arith.divf %112, %115 : vector<16x16xf32>
    %117 = arith.truncf %116 : vector<16x16xf32> to vector<16x16xbf16>
    %118 = vector.extract_strided_slice %65 {offsets = [0, 64], sizes = [16, 32], strides = [1, 1]} : vector<16x128xbf16> to vector<16x32xbf16>
    %cst_42 = arith.constant dense<0.000000e+00> : vector<16x32xf32>
    %119 = tpu.matmul %117, %118, %cst_42 {dimension_numbers = #tpu.dot_dimension_numbers<[1], [0], [0], [1], [0, 0, 1, 1], [], []>} : vector<16x16xbf16>, vector<16x32xbf16>, vector<16x32xf32> -> vector<16x32xf32>
    %120 = vector.extract_strided_slice %59 {offsets = [0, 96], sizes = [16, 32], strides = [1, 1]} : vector<16x128xbf16> to vector<16x32xbf16>
    %121 = vector.extract_strided_slice %61 {offsets = [0, 96], sizes = [16, 32], strides = [1, 1]} : vector<16x128xbf16> to vector<16x32xbf16>
    %cst_43 = arith.constant dense<0.000000e+00> : vector<16x16xf32>
    %122 = tpu.matmul %120, %121, %cst_43 {dimension_numbers = #tpu.dot_dimension_numbers<[1], [1], [0], [0], [0, 0, 1, 0], [], []>} : vector<16x32xbf16>, vector<16x32xbf16>, vector<16x16xf32> -> vector<16x16xf32>
    %cst_44 = arith.constant 0xFF800000 : f32
    %123 = vector.broadcast %cst_44 : f32 to vector<16x16xf32>
    %124 = arith.select %68, %122, %123 : vector<16x16xi1>, vector<16x16xf32>
    %cst_45 = arith.constant dense<0xFF800000> : vector<16xf32>
    %125 = vector.multi_reduction <maximumf>, %124, %cst_45 [1] : vector<16x16xf32> to vector<16xf32>
    %126 = vector.shape_cast %125 : vector<16xf32> to vector<16x1xf32>
    %127 = vector.broadcast %126 : vector<16x1xf32> to vector<16x16xf32>
    %128 = arith.subf %124, %127 : vector<16x16xf32>
    %129 = math.exp %128 : vector<16x16xf32>
    %cst_46 = arith.constant dense<0.000000e+00> : vector<16xf32>
    %130 = vector.multi_reduction <add>, %129, %cst_46 [1] : vector<16x16xf32> to vector<16xf32>
    %131 = vector.shape_cast %130 : vector<16xf32> to vector<16x1xf32>
    %132 = vector.broadcast %131 : vector<16x1xf32> to vector<16x16xf32>
    %133 = arith.divf %129, %132 : vector<16x16xf32>
    %134 = arith.truncf %133 : vector<16x16xf32> to vector<16x16xbf16>
    %135 = vector.extract_strided_slice %65 {offsets = [0, 96], sizes = [16, 32], strides = [1, 1]} : vector<16x128xbf16> to vector<16x32xbf16>
    %cst_47 = arith.constant dense<0.000000e+00> : vector<16x32xf32>
    %136 = tpu.matmul %134, %135, %cst_47 {dimension_numbers = #tpu.dot_dimension_numbers<[1], [0], [0], [1], [0, 0, 1, 1], [], []>} : vector<16x16xbf16>, vector<16x32xbf16>, vector<16x32xf32> -> vector<16x32xf32>
    %137 = tpu.concatenate %85, %102, %119, %136 in 1 : vector<16x32xf32>, vector<16x32xf32>, vector<16x32xf32>, vector<16x32xf32> -> vector<16x128xf32>
    %138 = arith.truncf %137 : vector<16x128xf32> to vector<16x128xbf16>
    %cst_48 = arith.constant dense<0.000000e+00> : vector<16x128xf32>
    %139 = tpu.matmul %138, %53, %cst_48 {dimension_numbers = #tpu.dot_dimension_numbers<[1], [0], [0], [1], [0, 0, 1, 1], [], []>} : vector<16x128xbf16>, vector<128x128xbf16>, vector<16x128xf32> -> vector<16x128xf32>
    %140 = vector.broadcast %14 : vector<1x128xf32> to vector<16x128xf32>
    %141 = arith.addf %139, %140 : vector<16x128xf32>
    %142 = arith.addf %5, %141 : vector<16x128xf32>
    %cst_49 = arith.constant dense<0.000000e+00> : vector<16xf32>
    %143 = vector.multi_reduction <add>, %142, %cst_49 [1] : vector<16x128xf32> to vector<16xf32>
    %144 = vector.shape_cast %143 : vector<16xf32> to vector<16x1xf32>
    %cst_50 = arith.constant 1.280000e+02 : f32
    %145 = vector.broadcast %cst_50 : f32 to vector<16x1xf32>
    %146 = arith.divf %144, %145 : vector<16x1xf32>
    %147 = vector.broadcast %146 : vector<16x1xf32> to vector<16x128xf32>
    %148 = arith.subf %142, %147 : vector<16x128xf32>
    %149 = arith.mulf %148, %148 : vector<16x128xf32>
    %cst_51 = arith.constant dense<0.000000e+00> : vector<16xf32>
    %150 = vector.multi_reduction <add>, %149, %cst_51 [1] : vector<16x128xf32> to vector<16xf32>
    %151 = vector.shape_cast %150 : vector<16xf32> to vector<16x1xf32>
    %cst_52 = arith.constant 1.280000e+02 : f32
    %152 = vector.broadcast %cst_52 : f32 to vector<16x1xf32>
    %153 = arith.divf %151, %152 : vector<16x1xf32>
    %154 = vector.broadcast %146 : vector<16x1xf32> to vector<16x128xf32>
    %155 = arith.subf %142, %154 : vector<16x128xf32>
    %cst_53 = arith.constant 9.99999974E-6 : f32
    %156 = vector.broadcast %cst_53 : f32 to vector<16x1xf32>
    %157 = arith.addf %153, %156 : vector<16x1xf32>
    %158 = math.rsqrt %157 : vector<16x1xf32>
    %159 = vector.broadcast %158 : vector<16x1xf32> to vector<16x128xf32>
    %160 = arith.mulf %155, %159 : vector<16x128xf32>
    %161 = vector.broadcast %15 : vector<1x128xf32> to vector<16x128xf32>
    %162 = arith.mulf %160, %161 : vector<16x128xf32>
    %163 = vector.broadcast %16 : vector<1x128xf32> to vector<16x128xf32>
    %164 = arith.addf %162, %163 : vector<16x128xf32>
    %165 = arith.truncf %164 : vector<16x128xf32> to vector<16x128xbf16>
    %c0_54 = arith.constant 0 : index
    %c0_55 = arith.constant 0 : index
    %c0_56 = arith.constant 0 : index
    %166 = vector.load %arg10[%c0_54, %c0_55, %c0_56] : memref<1x128x128xbf16, #tpu.memory_space<vmem>>, vector<1x128x128xbf16>
    %167 = vector.shape_cast %166 : vector<1x128x128xbf16> to vector<128x128xbf16>
    %c0_57 = arith.constant 0 : index
    %c0_58 = arith.constant 0 : index
    %c0_59 = arith.constant 0 : index
    %168 = vector.load %arg11[%c0_57, %c0_58, %c0_59] : memref<1x128x128xbf16, #tpu.memory_space<vmem>>, vector<1x128x128xbf16>
    %169 = vector.shape_cast %168 : vector<1x128x128xbf16> to vector<128x128xbf16>
    %c0_60 = arith.constant 0 : index
    %c0_61 = arith.constant 0 : index
    %c0_62 = arith.constant 0 : index
    %170 = vector.load %arg12[%c0_60, %c0_61, %c0_62] : memref<1x128x128xbf16, #tpu.memory_space<vmem>>, vector<1x128x128xbf16>
    %171 = vector.shape_cast %170 : vector<1x128x128xbf16> to vector<128x128xbf16>
    %c0_63 = arith.constant 0 : index
    %c0_64 = arith.constant 0 : index
    %c0_65 = arith.constant 0 : index
    %172 = vector.load %arg13[%c0_63, %c0_64, %c0_65] : memref<1x128x128xbf16, #tpu.memory_space<vmem>>, vector<1x128x128xbf16>
    %173 = vector.shape_cast %172 : vector<1x128x128xbf16> to vector<128x128xbf16>
    %cst_66 = arith.constant dense<0.000000e+00> : vector<16x128xf32>
    %174 = tpu.matmul %165, %167, %cst_66 {dimension_numbers = #tpu.dot_dimension_numbers<[1], [0], [0], [1], [0, 0, 1, 1], [], []>} : vector<16x128xbf16>, vector<128x128xbf16>, vector<16x128xf32> -> vector<16x128xf32>
    %175 = vector.broadcast %17 : vector<1x128xf32> to vector<16x128xf32>
    %176 = arith.addf %174, %175 : vector<16x128xf32>
    %cst_67 = arith.constant 0.176776692 : f32
    %177 = vector.broadcast %cst_67 : f32 to vector<16x128xf32>
    %178 = arith.mulf %176, %177 : vector<16x128xf32>
    %179 = arith.truncf %178 : vector<16x128xf32> to vector<16x128xbf16>
    %cst_68 = arith.constant dense<0.000000e+00> : vector<32x128xf32>
    %180 = tpu.matmul %7, %169, %cst_68 {dimension_numbers = #tpu.dot_dimension_numbers<[1], [0], [0], [1], [0, 0, 1, 1], [], []>} : vector<32x128xbf16>, vector<128x128xbf16>, vector<32x128xf32> -> vector<32x128xf32>
    %181 = arith.truncf %180 : vector<32x128xf32> to vector<32x128xbf16>
    %cst_69 = arith.constant dense<0.000000e+00> : vector<32x128xf32>
    %182 = tpu.matmul %7, %171, %cst_69 {dimension_numbers = #tpu.dot_dimension_numbers<[1], [0], [0], [1], [0, 0, 1, 1], [], []>} : vector<32x128xbf16>, vector<128x128xbf16>, vector<32x128xf32> -> vector<32x128xf32>
    %183 = vector.broadcast %18 : vector<1x128xf32> to vector<32x128xf32>
    %184 = arith.addf %182, %183 : vector<32x128xf32>
    %185 = arith.truncf %184 : vector<32x128xf32> to vector<32x128xbf16>
    %186 = vector.extract_strided_slice %179 {offsets = [0, 0], sizes = [16, 32], strides = [1, 1]} : vector<16x128xbf16> to vector<16x32xbf16>
    %187 = vector.extract_strided_slice %181 {offsets = [0, 0], sizes = [32, 32], strides = [1, 1]} : vector<32x128xbf16> to vector<32x32xbf16>
    %cst_70 = arith.constant dense<0.000000e+00> : vector<16x32xf32>
    %188 = tpu.matmul %186, %187, %cst_70 {dimension_numbers = #tpu.dot_dimension_numbers<[1], [1], [0], [0], [0, 0, 1, 0], [], []>} : vector<16x32xbf16>, vector<32x32xbf16>, vector<16x32xf32> -> vector<16x32xf32>
    %cst_71 = arith.constant dense<0xFF800000> : vector<16xf32>
    %189 = vector.multi_reduction <maximumf>, %188, %cst_71 [1] : vector<16x32xf32> to vector<16xf32>
    %190 = vector.shape_cast %189 : vector<16xf32> to vector<16x1xf32>
    %191 = vector.broadcast %190 : vector<16x1xf32> to vector<16x32xf32>
    %192 = arith.subf %188, %191 : vector<16x32xf32>
    %193 = math.exp %192 : vector<16x32xf32>
    %cst_72 = arith.constant dense<0.000000e+00> : vector<16xf32>
    %194 = vector.multi_reduction <add>, %193, %cst_72 [1] : vector<16x32xf32> to vector<16xf32>
    %195 = vector.shape_cast %194 : vector<16xf32> to vector<16x1xf32>
    %196 = vector.broadcast %195 : vector<16x1xf32> to vector<16x32xf32>
    %197 = arith.divf %193, %196 : vector<16x32xf32>
    %198 = arith.truncf %197 : vector<16x32xf32> to vector<16x32xbf16>
    %199 = vector.extract_strided_slice %185 {offsets = [0, 0], sizes = [32, 32], strides = [1, 1]} : vector<32x128xbf16> to vector<32x32xbf16>
    %cst_73 = arith.constant dense<0.000000e+00> : vector<16x32xf32>
    %200 = tpu.matmul %198, %199, %cst_73 {dimension_numbers = #tpu.dot_dimension_numbers<[1], [0], [0], [1], [0, 0, 1, 1], [], []>} : vector<16x32xbf16>, vector<32x32xbf16>, vector<16x32xf32> -> vector<16x32xf32>
    %201 = vector.extract_strided_slice %179 {offsets = [0, 32], sizes = [16, 32], strides = [1, 1]} : vector<16x128xbf16> to vector<16x32xbf16>
    %202 = vector.extract_strided_slice %181 {offsets = [0, 32], sizes = [32, 32], strides = [1, 1]} : vector<32x128xbf16> to vector<32x32xbf16>
    %cst_74 = arith.constant dense<0.000000e+00> : vector<16x32xf32>
    %203 = tpu.matmul %201, %202, %cst_74 {dimension_numbers = #tpu.dot_dimension_numbers<[1], [1], [0], [0], [0, 0, 1, 0], [], []>} : vector<16x32xbf16>, vector<32x32xbf16>, vector<16x32xf32> -> vector<16x32xf32>
    %cst_75 = arith.constant dense<0xFF800000> : vector<16xf32>
    %204 = vector.multi_reduction <maximumf>, %203, %cst_75 [1] : vector<16x32xf32> to vector<16xf32>
    %205 = vector.shape_cast %204 : vector<16xf32> to vector<16x1xf32>
    %206 = vector.broadcast %205 : vector<16x1xf32> to vector<16x32xf32>
    %207 = arith.subf %203, %206 : vector<16x32xf32>
    %208 = math.exp %207 : vector<16x32xf32>
    %cst_76 = arith.constant dense<0.000000e+00> : vector<16xf32>
    %209 = vector.multi_reduction <add>, %208, %cst_76 [1] : vector<16x32xf32> to vector<16xf32>
    %210 = vector.shape_cast %209 : vector<16xf32> to vector<16x1xf32>
    %211 = vector.broadcast %210 : vector<16x1xf32> to vector<16x32xf32>
    %212 = arith.divf %208, %211 : vector<16x32xf32>
    %213 = arith.truncf %212 : vector<16x32xf32> to vector<16x32xbf16>
    %214 = vector.extract_strided_slice %185 {offsets = [0, 32], sizes = [32, 32], strides = [1, 1]} : vector<32x128xbf16> to vector<32x32xbf16>
    %cst_77 = arith.constant dense<0.000000e+00> : vector<16x32xf32>
    %215 = tpu.matmul %213, %214, %cst_77 {dimension_numbers = #tpu.dot_dimension_numbers<[1], [0], [0], [1], [0, 0, 1, 1], [], []>} : vector<16x32xbf16>, vector<32x32xbf16>, vector<16x32xf32> -> vector<16x32xf32>
    %216 = vector.extract_strided_slice %179 {offsets = [0, 64], sizes = [16, 32], strides = [1, 1]} : vector<16x128xbf16> to vector<16x32xbf16>
    %217 = vector.extract_strided_slice %181 {offsets = [0, 64], sizes = [32, 32], strides = [1, 1]} : vector<32x128xbf16> to vector<32x32xbf16>
    %cst_78 = arith.constant dense<0.000000e+00> : vector<16x32xf32>
    %218 = tpu.matmul %216, %217, %cst_78 {dimension_numbers = #tpu.dot_dimension_numbers<[1], [1], [0], [0], [0, 0, 1, 0], [], []>} : vector<16x32xbf16>, vector<32x32xbf16>, vector<16x32xf32> -> vector<16x32xf32>
    %cst_79 = arith.constant dense<0xFF800000> : vector<16xf32>
    %219 = vector.multi_reduction <maximumf>, %218, %cst_79 [1] : vector<16x32xf32> to vector<16xf32>
    %220 = vector.shape_cast %219 : vector<16xf32> to vector<16x1xf32>
    %221 = vector.broadcast %220 : vector<16x1xf32> to vector<16x32xf32>
    %222 = arith.subf %218, %221 : vector<16x32xf32>
    %223 = math.exp %222 : vector<16x32xf32>
    %cst_80 = arith.constant dense<0.000000e+00> : vector<16xf32>
    %224 = vector.multi_reduction <add>, %223, %cst_80 [1] : vector<16x32xf32> to vector<16xf32>
    %225 = vector.shape_cast %224 : vector<16xf32> to vector<16x1xf32>
    %226 = vector.broadcast %225 : vector<16x1xf32> to vector<16x32xf32>
    %227 = arith.divf %223, %226 : vector<16x32xf32>
    %228 = arith.truncf %227 : vector<16x32xf32> to vector<16x32xbf16>
    %229 = vector.extract_strided_slice %185 {offsets = [0, 64], sizes = [32, 32], strides = [1, 1]} : vector<32x128xbf16> to vector<32x32xbf16>
    %cst_81 = arith.constant dense<0.000000e+00> : vector<16x32xf32>
    %230 = tpu.matmul %228, %229, %cst_81 {dimension_numbers = #tpu.dot_dimension_numbers<[1], [0], [0], [1], [0, 0, 1, 1], [], []>} : vector<16x32xbf16>, vector<32x32xbf16>, vector<16x32xf32> -> vector<16x32xf32>
    %231 = vector.extract_strided_slice %179 {offsets = [0, 96], sizes = [16, 32], strides = [1, 1]} : vector<16x128xbf16> to vector<16x32xbf16>
    %232 = vector.extract_strided_slice %181 {offsets = [0, 96], sizes = [32, 32], strides = [1, 1]} : vector<32x128xbf16> to vector<32x32xbf16>
    %cst_82 = arith.constant dense<0.000000e+00> : vector<16x32xf32>
    %233 = tpu.matmul %231, %232, %cst_82 {dimension_numbers = #tpu.dot_dimension_numbers<[1], [1], [0], [0], [0, 0, 1, 0], [], []>} : vector<16x32xbf16>, vector<32x32xbf16>, vector<16x32xf32> -> vector<16x32xf32>
    %cst_83 = arith.constant dense<0xFF800000> : vector<16xf32>
    %234 = vector.multi_reduction <maximumf>, %233, %cst_83 [1] : vector<16x32xf32> to vector<16xf32>
    %235 = vector.shape_cast %234 : vector<16xf32> to vector<16x1xf32>
    %236 = vector.broadcast %235 : vector<16x1xf32> to vector<16x32xf32>
    %237 = arith.subf %233, %236 : vector<16x32xf32>
    %238 = math.exp %237 : vector<16x32xf32>
    %cst_84 = arith.constant dense<0.000000e+00> : vector<16xf32>
    %239 = vector.multi_reduction <add>, %238, %cst_84 [1] : vector<16x32xf32> to vector<16xf32>
    %240 = vector.shape_cast %239 : vector<16xf32> to vector<16x1xf32>
    %241 = vector.broadcast %240 : vector<16x1xf32> to vector<16x32xf32>
    %242 = arith.divf %238, %241 : vector<16x32xf32>
    %243 = arith.truncf %242 : vector<16x32xf32> to vector<16x32xbf16>
    %244 = vector.extract_strided_slice %185 {offsets = [0, 96], sizes = [32, 32], strides = [1, 1]} : vector<32x128xbf16> to vector<32x32xbf16>
    %cst_85 = arith.constant dense<0.000000e+00> : vector<16x32xf32>
    %245 = tpu.matmul %243, %244, %cst_85 {dimension_numbers = #tpu.dot_dimension_numbers<[1], [0], [0], [1], [0, 0, 1, 1], [], []>} : vector<16x32xbf16>, vector<32x32xbf16>, vector<16x32xf32> -> vector<16x32xf32>
    %246 = tpu.concatenate %200, %215, %230, %245 in 1 : vector<16x32xf32>, vector<16x32xf32>, vector<16x32xf32>, vector<16x32xf32> -> vector<16x128xf32>
    %247 = arith.truncf %246 : vector<16x128xf32> to vector<16x128xbf16>
    %cst_86 = arith.constant dense<0.000000e+00> : vector<16x128xf32>
    %248 = tpu.matmul %247, %173, %cst_86 {dimension_numbers = #tpu.dot_dimension_numbers<[1], [0], [0], [1], [0, 0, 1, 1], [], []>} : vector<16x128xbf16>, vector<128x128xbf16>, vector<16x128xf32> -> vector<16x128xf32>
    %249 = vector.broadcast %19 : vector<1x128xf32> to vector<16x128xf32>
    %250 = arith.addf %248, %249 : vector<16x128xf32>
    %251 = arith.addf %142, %250 : vector<16x128xf32>
    %cst_87 = arith.constant dense<0.000000e+00> : vector<16xf32>
    %252 = vector.multi_reduction <add>, %251, %cst_87 [1] : vector<16x128xf32> to vector<16xf32>
    %253 = vector.shape_cast %252 : vector<16xf32> to vector<16x1xf32>
    %cst_88 = arith.constant 1.280000e+02 : f32
    %254 = vector.broadcast %cst_88 : f32 to vector<16x1xf32>
    %255 = arith.divf %253, %254 : vector<16x1xf32>
    %256 = vector.broadcast %255 : vector<16x1xf32> to vector<16x128xf32>
    %257 = arith.subf %251, %256 : vector<16x128xf32>
    %258 = arith.mulf %257, %257 : vector<16x128xf32>
    %cst_89 = arith.constant dense<0.000000e+00> : vector<16xf32>
    %259 = vector.multi_reduction <add>, %258, %cst_89 [1] : vector<16x128xf32> to vector<16xf32>
    %260 = vector.shape_cast %259 : vector<16xf32> to vector<16x1xf32>
    %cst_90 = arith.constant 1.280000e+02 : f32
    %261 = vector.broadcast %cst_90 : f32 to vector<16x1xf32>
    %262 = arith.divf %260, %261 : vector<16x1xf32>
    %263 = vector.broadcast %255 : vector<16x1xf32> to vector<16x128xf32>
    %264 = arith.subf %251, %263 : vector<16x128xf32>
    %cst_91 = arith.constant 9.99999974E-6 : f32
    %265 = vector.broadcast %cst_91 : f32 to vector<16x1xf32>
    %266 = arith.addf %262, %265 : vector<16x1xf32>
    %267 = math.rsqrt %266 : vector<16x1xf32>
    %268 = vector.broadcast %267 : vector<16x1xf32> to vector<16x128xf32>
    %269 = arith.mulf %264, %268 : vector<16x128xf32>
    %270 = vector.broadcast %20 : vector<1x128xf32> to vector<16x128xf32>
    %271 = arith.mulf %269, %270 : vector<16x128xf32>
    %272 = vector.broadcast %21 : vector<1x128xf32> to vector<16x128xf32>
    %273 = arith.addf %271, %272 : vector<16x128xf32>
    %274 = arith.truncf %273 : vector<16x128xf32> to vector<16x128xbf16>
    %c0_92 = arith.constant 0 : index
    %c0_93 = arith.constant 0 : index
    %c0_94 = arith.constant 0 : index
    %275 = vector.load %arg14[%c0_92, %c0_93, %c0_94] : memref<1x128x512xbf16, #tpu.memory_space<vmem>>, vector<1x128x512xbf16>
    %276 = vector.shape_cast %275 : vector<1x128x512xbf16> to vector<128x512xbf16>
    %cst_95 = arith.constant dense<0.000000e+00> : vector<16x512xf32>
    %277 = tpu.matmul %274, %276, %cst_95 {dimension_numbers = #tpu.dot_dimension_numbers<[1], [0], [0], [1], [0, 0, 1, 1], [], []>} : vector<16x128xbf16>, vector<128x512xbf16>, vector<16x512xf32> -> vector<16x512xf32>
    %c0_96 = arith.constant 0 : index
    %c0_97 = arith.constant 0 : index
    %c0_98 = arith.constant 0 : index
    %278 = vector.load %arg16[%c0_96, %c0_97, %c0_98] : memref<1x1x512xf32, #tpu.memory_space<vmem>>, vector<1x1x512xf32>
    %279 = vector.shape_cast %278 : vector<1x1x512xf32> to vector<1x512xf32>
    %280 = vector.broadcast %279 : vector<1x512xf32> to vector<16x512xf32>
    %281 = arith.addf %277, %280 : vector<16x512xf32>
    %282 = arith.mulf %281, %281 : vector<16x512xf32>
    %283 = arith.mulf %281, %282 : vector<16x512xf32>
    %cst_99 = arith.constant 4.471500e-02 : f32
    %284 = vector.broadcast %cst_99 : f32 to vector<16x512xf32>
    %285 = arith.mulf %284, %283 : vector<16x512xf32>
    %286 = arith.addf %281, %285 : vector<16x512xf32>
    %cst_100 = arith.constant 0.797884583 : f32
    %287 = vector.broadcast %cst_100 : f32 to vector<16x512xf32>
    %288 = arith.mulf %287, %286 : vector<16x512xf32>
    %289 = math.tanh %288 : vector<16x512xf32>
    %cst_101 = arith.constant 1.000000e+00 : f32
    %290 = vector.broadcast %cst_101 : f32 to vector<16x512xf32>
    %291 = arith.addf %290, %289 : vector<16x512xf32>
    %cst_102 = arith.constant 5.000000e-01 : f32
    %292 = vector.broadcast %cst_102 : f32 to vector<16x512xf32>
    %293 = arith.mulf %292, %291 : vector<16x512xf32>
    %294 = arith.mulf %281, %293 : vector<16x512xf32>
    %295 = arith.truncf %294 : vector<16x512xf32> to vector<16x512xbf16>
    %c0_103 = arith.constant 0 : index
    %c0_104 = arith.constant 0 : index
    %c0_105 = arith.constant 0 : index
    %296 = vector.load %arg15[%c0_103, %c0_104, %c0_105] : memref<1x512x128xbf16, #tpu.memory_space<vmem>>, vector<1x512x128xbf16>
    %297 = vector.shape_cast %296 : vector<1x512x128xbf16> to vector<512x128xbf16>
    %cst_106 = arith.constant dense<0.000000e+00> : vector<16x128xf32>
    %298 = tpu.matmul %295, %297, %cst_106 {dimension_numbers = #tpu.dot_dimension_numbers<[1], [0], [0], [1], [0, 0, 1, 1], [], []>} : vector<16x512xbf16>, vector<512x128xbf16>, vector<16x128xf32> -> vector<16x128xf32>
    %299 = arith.addf %251, %298 : vector<16x128xf32>
    %300 = vector.broadcast %22 : vector<1x128xf32> to vector<16x128xf32>
    %301 = arith.addf %299, %300 : vector<16x128xf32>
    %302 = arith.index_cast %arg2 : i32 to index
    %c0_107 = arith.constant 0 : index
    %c0_108 = arith.constant 0 : index
    %303 = vector.load %arg20[%302, %c0_107, %c0_108] : memref<1x16x128xf32, #tpu.memory_space<vmem>>, vector<1x16x128xf32>
    %304 = vector.shape_cast %303 : vector<1x16x128xf32> to vector<16x128xf32>
    %305 = vector.shape_cast %301 : vector<16x128xf32> to vector<1x16x128xf32>
    tpu.vector_store %arg20[%302, %c0_107, %c0_108], %305 {strides = array<i32>} : memref<1x16x128xf32, #tpu.memory_space<vmem>>, vector<1x16x128xf32>,
    %c1_i32 = arith.constant 1 : i32
    %306 = arith.cmpi eq, %arg1, %c1_i32 : i32
    %307 = arith.extui %306 : i1 to i32
    %c0_i32_109 = arith.constant 0 : i32
    %308 = arith.cmpi ne, %307, %c0_i32_109 : i32
    scf.if %308 {
      %c0_110 = arith.constant 0 : index
      %c0_111 = arith.constant 0 : index
      %309 = vector.load %arg17[%c0_110, %c0_111] : memref<1x128xf32, #tpu.memory_space<vmem>>, vector<1x128xf32>
      %c0_112 = arith.constant 0 : index
      %c0_113 = arith.constant 0 : index
      %310 = vector.load %arg18[%c0_112, %c0_113] : memref<1x128xf32, #tpu.memory_space<vmem>>, vector<1x128xf32>
      %cst_114 = arith.constant dense<0.000000e+00> : vector<16xf32>
      %311 = vector.multi_reduction <add>, %301, %cst_114 [1] : vector<16x128xf32> to vector<16xf32>
      %312 = vector.shape_cast %311 : vector<16xf32> to vector<16x1xf32>
      %cst_115 = arith.constant 1.280000e+02 : f32
      %313 = vector.broadcast %cst_115 : f32 to vector<16x1xf32>
      %314 = arith.divf %312, %313 : vector<16x1xf32>
      %315 = vector.broadcast %314 : vector<16x1xf32> to vector<16x128xf32>
      %316 = arith.subf %301, %315 : vector<16x128xf32>
      %317 = arith.mulf %316, %316 : vector<16x128xf32>
      %cst_116 = arith.constant dense<0.000000e+00> : vector<16xf32>
      %318 = vector.multi_reduction <add>, %317, %cst_116 [1] : vector<16x128xf32> to vector<16xf32>
      %319 = vector.shape_cast %318 : vector<16xf32> to vector<16x1xf32>
      %cst_117 = arith.constant 1.280000e+02 : f32
      %320 = vector.broadcast %cst_117 : f32 to vector<16x1xf32>
      %321 = arith.divf %319, %320 : vector<16x1xf32>
      %322 = vector.broadcast %314 : vector<16x1xf32> to vector<16x128xf32>
      %323 = arith.subf %301, %322 : vector<16x128xf32>
      %cst_118 = arith.constant 9.99999974E-6 : f32
      %324 = vector.broadcast %cst_118 : f32 to vector<16x1xf32>
      %325 = arith.addf %321, %324 : vector<16x1xf32>
      %326 = math.rsqrt %325 : vector<16x1xf32>
      %327 = vector.broadcast %326 : vector<16x1xf32> to vector<16x128xf32>
      %328 = arith.mulf %323, %327 : vector<16x128xf32>
      %329 = vector.broadcast %309 : vector<1x128xf32> to vector<16x128xf32>
      %330 = arith.mulf %328, %329 : vector<16x128xf32>
      %331 = vector.broadcast %310 : vector<1x128xf32> to vector<16x128xf32>
      %332 = arith.addf %330, %331 : vector<16x128xf32>
      %333 = arith.truncf %332 : vector<16x128xf32> to vector<16x128xbf16>
      %c0_119 = arith.constant 0 : index
      %c0_120 = arith.constant 0 : index
      %c0_121 = arith.constant 0 : index
      %334 = vector.load %arg19[%c0_119, %c0_120, %c0_121] : memref<1x16x128xbf16, #tpu.memory_space<vmem>>, vector<1x16x128xbf16>
      %335 = vector.shape_cast %334 : vector<1x16x128xbf16> to vector<16x128xbf16>
      %336 = vector.shape_cast %333 : vector<16x128xbf16> to vector<1x16x128xbf16>
      tpu.vector_store %arg19[%c0_119, %c0_120, %c0_121], %336 {strides = array<i32>} : memref<1x16x128xbf16, #tpu.memory_space<vmem>>, vector<1x16x128xbf16>,
    } else {
    }
    return
  }
  func.func @transform_0(%arg0: i32, %arg1: i32, %arg2: i32) -> (i32, i32, i32) {
    %c1_i32 = arith.constant 1 : i32
    %0 = arith.muli %arg0, %c1_i32 : i32
    %1 = arith.addi %0, %arg2 : i32
    %c0_i32 = arith.constant 0 : i32
    %c0_i32_0 = arith.constant 0 : i32
    %c0_i32_1 = arith.constant 0 : i32
    return %1, %c0_i32, %c0_i32_0 : i32, i32, i32
  }
  func.func @transform_1(%arg0: i32, %arg1: i32, %arg2: i32) -> (i32, i32, i32) {
    %c1_i32 = arith.constant 1 : i32
    %0 = arith.muli %arg0, %c1_i32 : i32
    %1 = arith.addi %0, %arg2 : i32
    %c0_i32 = arith.constant 0 : i32
    %c0_i32_0 = arith.constant 0 : i32
    %c0_i32_1 = arith.constant 0 : i32
    return %1, %c0_i32, %c0_i32_0 : i32, i32, i32
  }
  func.func @transform_2(%arg0: i32, %arg1: i32, %arg2: i32) -> (i32, i32, i32) {
    %c0_i32 = arith.constant 0 : i32
    %c0_i32_0 = arith.constant 0 : i32
    %c0_i32_1 = arith.constant 0 : i32
    return %arg1, %c0_i32, %c0_i32_0 : i32, i32, i32
  }
  func.func @transform_3(%arg0: i32, %arg1: i32, %arg2: i32) -> (i32, i32, i32) {
    %c0_i32 = arith.constant 0 : i32
    %c0_i32_0 = arith.constant 0 : i32
    %c0_i32_1 = arith.constant 0 : i32
    return %arg1, %c0_i32, %c0_i32_0 : i32, i32, i32
  }
  func.func @transform_4(%arg0: i32, %arg1: i32, %arg2: i32) -> (i32, i32, i32) {
    %c0_i32 = arith.constant 0 : i32
    %c0_i32_0 = arith.constant 0 : i32
    %c0_i32_1 = arith.constant 0 : i32
    return %arg1, %c0_i32, %c0_i32_0 : i32, i32, i32
  }
  func.func @transform_5(%arg0: i32, %arg1: i32, %arg2: i32) -> (i32, i32, i32) {
    %c0_i32 = arith.constant 0 : i32
    %c0_i32_0 = arith.constant 0 : i32
    %c0_i32_1 = arith.constant 0 : i32
    return %arg1, %c0_i32, %c0_i32_0 : i32, i32, i32
  }
  func.func @transform_6(%arg0: i32, %arg1: i32, %arg2: i32) -> (i32, i32, i32) {
    %c0_i32 = arith.constant 0 : i32
    %c0_i32_0 = arith.constant 0 : i32
    %c0_i32_1 = arith.constant 0 : i32
    return %arg1, %c0_i32, %c0_i32_0 : i32, i32, i32
  }
  func.func @transform_7(%arg0: i32, %arg1: i32, %arg2: i32) -> (i32, i32, i32) {
    %c0_i32 = arith.constant 0 : i32
    %c0_i32_0 = arith.constant 0 : i32
    %c0_i32_1 = arith.constant 0 : i32
    return %arg1, %c0_i32, %c0_i32_0 : i32, i32, i32
  }
  func.func @transform_8(%arg0: i32, %arg1: i32, %arg2: i32) -> (i32, i32, i32) {
    %c0_i32 = arith.constant 0 : i32
    %c0_i32_0 = arith.constant 0 : i32
    %c0_i32_1 = arith.constant 0 : i32
    return %arg1, %c0_i32, %c0_i32_0 : i32, i32, i32
  }
  func.func @transform_9(%arg0: i32, %arg1: i32, %arg2: i32) -> (i32, i32, i32) {
    %c0_i32 = arith.constant 0 : i32
    %c0_i32_0 = arith.constant 0 : i32
    %c0_i32_1 = arith.constant 0 : i32
    return %arg1, %c0_i32, %c0_i32_0 : i32, i32, i32
  }
  func.func @transform_10(%arg0: i32, %arg1: i32, %arg2: i32) -> (i32, i32, i32) {
    %c0_i32 = arith.constant 0 : i32
    %c0_i32_0 = arith.constant 0 : i32
    %c0_i32_1 = arith.constant 0 : i32
    return %arg1, %c0_i32, %c0_i32_0 : i32, i32, i32
  }
  func.func @transform_11(%arg0: i32, %arg1: i32, %arg2: i32) -> (i32, i32, i32) {
    %c0_i32 = arith.constant 0 : i32
    %c0_i32_0 = arith.constant 0 : i32
    %c0_i32_1 = arith.constant 0 : i32
    return %arg1, %c0_i32, %c0_i32_0 : i32, i32, i32
  }
  func.func @transform_12(%arg0: i32, %arg1: i32, %arg2: i32) -> (i32, i32, i32) {
    %c0_i32 = arith.constant 0 : i32
    %c0_i32_0 = arith.constant 0 : i32
    %c0_i32_1 = arith.constant 0 : i32
    return %arg1, %c0_i32, %c0_i32_0 : i32, i32, i32
  }
  func.func @transform_13(%arg0: i32, %arg1: i32, %arg2: i32) -> (i32, i32, i32) {
    %c0_i32 = arith.constant 0 : i32
    %c0_i32_0 = arith.constant 0 : i32
    %c0_i32_1 = arith.constant 0 : i32
    return %arg1, %c0_i32, %c0_i32_0 : i32, i32, i32
  }
  func.func @transform_14(%arg0: i32, %arg1: i32, %arg2: i32) -> (i32, i32) {
    %c0_i32 = arith.constant 0 : i32
    %c0_i32_0 = arith.constant 0 : i32
    %c0_i32_1 = arith.constant 0 : i32
    return %c0_i32, %c0_i32_0 : i32, i32
  }
  func.func @transform_15(%arg0: i32, %arg1: i32, %arg2: i32) -> (i32, i32) {
    %c0_i32 = arith.constant 0 : i32
    %c0_i32_0 = arith.constant 0 : i32
    %c0_i32_1 = arith.constant 0 : i32
    return %c0_i32, %c0_i32_0 : i32, i32
  }
  func.func @transform_16(%arg0: i32, %arg1: i32, %arg2: i32) -> (i32, i32, i32) {
    %c1_i32 = arith.constant 1 : i32
    %0 = arith.muli %arg0, %c1_i32 : i32
    %1 = arith.addi %0, %arg2 : i32
    %c0_i32 = arith.constant 0 : i32
    %c0_i32_0 = arith.constant 0 : i32
    %c0_i32_1 = arith.constant 0 : i32
    return %1, %c0_i32, %c0_i32_0 : i32, i32, i32
  }
}

</mosaic_0001>

<bundles_post_ra>
// kernel: tpu_custom_call.1
= control target key start
LH: loop header
LB: loop body
LE: loop exit
PB: predicated region body
PF: predicated region fallthrough
CT: control target
= control target key end

     0   :  { %s7708_s0 = inlined_call_operand.hbm [shape: f32[2,16,128], index: 0, kind: input, shape index: {}]   ;;  %s7709_s1 = inlined_call_operand.hbm [shape: bf16[2,32,128], index: 1, kind: input, shape index: {}]   ;;  %s7710_s2 = inlined_call_operand.hbm [shape: f32[2,13,128], index: 2, kind: input, shape index: {}]   ;;  %s7711_s3 = inlined_call_operand.hbm [shape: bf16[2,128,128], index: 3, kind: input, shape index: {}]   ;;  %s7712_s4 = inlined_call_operand.hbm [shape: bf16[2,128,128], index: 4, kind: input, shape index: {}]   ;;  %s7713_s5 = inlined_call_operand.hbm [shape: bf16[2,128,128], index: 5, kind: input, shape index: {}]   ;;  %s7714_s6 = inlined_call_operand.hbm [shape: bf16[2,128,128], index: 6, kind: input, shape index: {}]   ;;  %s7715_s7 = inlined_call_operand.hbm [shape: bf16[2,128,128], index: 7, kind: input, shape index: {}]   ;;  %s7716_s8 = inlined_call_operand.hbm [shape: bf16[2,128,128], index: 8, kind: input, shape index: {}]   ;;  %s7717_s9 = inlined_call_operand.hbm [shape: bf16[2,128,128], index: 9, kind: input, shape index: {}]   ;;  %s7718_s10 = inlined_call_operand.hbm [shape: bf16[2,128,128], index: 10, kind: input, shape index: {}]   ;;  %s7719_s11 = inlined_call_operand.hbm [shape: bf16[2,128,512], index: 11, kind: input, shape index: {}]   ;;  %s7720_s12 = inlined_call_operand.hbm [shape: bf16[2,512,128], index: 12, kind: input, shape index: {}]   ;;  %s7721_s13 = inlined_call_operand.hbm [shape: f32[2,1,512], index: 13, kind: input, shape index: {}]   ;;  %s7722_s14 = inlined_call_operand.hbm [shape: f32[1,128], index: 14, kind: input, shape index: {}]   ;;  %s7723_s15 = inlined_call_operand.hbm [shape: f32[1,128], index: 15, kind: input, shape index: {}]   ;;  %s7724_s16 = inlined_call_operand.hbm [shape: bf16[2,16,128], index: 16, kind: output, shape index: {}]  }
   0x1   :  { %7775 = sst [smem:[#allocation58_spill]] %s7708_s0 }
   0x2   :  { %7776 = sst [smem:[#allocation59_spill]] %s7709_s1 }
   0x3   :  { %7777 = sst [smem:[#allocation60_spill]] %s7710_s2 }
   0x4   :  { %7778 = sst [smem:[#allocation61_spill]] %s7711_s3 }
   0x5   :  { %7779 = sst [smem:[#allocation62_spill]] %s7712_s4 }
   0x6   :  { %7780 = sst [smem:[#allocation63_spill]] %s7713_s5 }
   0x7   :  { %7781 = sst [smem:[#allocation64_spill]] %s7714_s6 }
   0x8   :  { %7782 = sst [smem:[#allocation65_spill]] %s7715_s7 }
   0x9   :  { %7783 = sst [smem:[#allocation66_spill]] %s7716_s8 }
   0xa   :  { %7784 = sst [smem:[#allocation67_spill]] %s7717_s9 }
   0xb   :  { %7785 = sst [smem:[#allocation68_spill]] %s7718_s10 }
   0xc   :  { %7786 = sst [smem:[#allocation69_spill]] %s7719_s11 }
   0xd   :  { %7787 = sst [smem:[#allocation70_spill]] %s7721_s13 }
   0xe   :  { %7788 = sst [smem:[#allocation71_spill]] %s7722_s14 }
   0xf   :  { %7789 = sst [smem:[#allocation72_spill]] %s7723_s15 }
  0x10   :  { %7790 = sst [smem:[#allocation73_spill]] %s7724_s16 }
  0x11   :  { %21 = vsyncpa [#allocation4], 0 }
  0x12   :  { %23 = vsyncpa [#allocation4 + $0x1], 0 }
  0x13   :  { %24 = vsyncpa [#allocation7], 0 }
  0x14   :  { %26 = vsyncpa [#allocation7 + $0x1], 0 }
  0x15   :  { %27 = vsyncpa [#allocation10], 0 }
  0x16   :  { %29 = vsyncpa [#allocation10 + $0x1], 0 }
  0x17   :  { %30 = vsyncpa [#allocation13], 0 }
  0x18   :  { %32 = vsyncpa [#allocation13 + $0x1], 0 }
  0x19   :  { %33 = vsyncpa [#allocation16], 0 }
  0x1a   :  { %35 = vsyncpa [#allocation16 + $0x1], 0 }
  0x1b   :  { %36 = vsyncpa [#allocation19], 0 }
  0x1c   :  { %38 = vsyncpa [#allocation19 + $0x1], 0 }
  0x1d   :  { %39 = vsyncpa [#allocation22], 0 }
  0x1e   :  { %41 = vsyncpa [#allocation22 + $0x1], 0 }
  0x1f   :  { %42 = vsyncpa [#allocation25], 0 }
  0x20   :  { %44 = vsyncpa [#allocation25 + $0x1], 0 }
  0x21   :  { %45 = vsyncpa [#allocation28], 0 }
  0x22   :  { %46 = vsyncpa [#allocation5], 0 }
  0x23   :  { %48 = vsyncpa [#allocation5 + $0x1], 0  ;;  %s6221_s21 = smov 0   ;;  %s6223_s22 = smov 0  }
  0x24   :  { %s6225_s23 = smov 0   ;;  %s6227_s24 = smov 0  }
  0x25   :  { %s6229_s25 = smov 0   ;;  %s6231_s26 = smov 0  }
  0x26   :  { %s6233_s27 = smov 0   ;;  %s6235_s28 = smov 0  }
  0x27   :  { %s6237_s29 = smov 0   ;;  %s6239_s30 = smov 0  }
  0x28   :  { %s6241_s0 = smov 0  }
  0x29 LB: > { %7791 = sst [smem:[#allocation42_spill]] %s6068_s22  ;;  %s6277_s17 = sadd.s32 4294967295, %s6104_s0   ;;  %s6104_s0 = sphi %s6241_s0, %s54_s0   ;;  %s6100_s30 = sphi %s6239_s30, %s7880_s30   ;;  %s6096_s29 = sphi %s6237_s29, %s7879_s29   ;;  %s6092_s28 = sphi %s6235_s28, %s7878_s28   ;;  %s6088_s27 = sphi %s6233_s27, %s7877_s27   ;;  %s6084_s26 = sphi %s6231_s26, %s7876_s26   ;;  %s6080_s25 = sphi %s6229_s25, %s7875_s25   ;;  %s6076_s24 = sphi %s6227_s24, %s7871_s24   ;;  %s6072_s23 = sphi %s6225_s23, %s7870_s23   ;;  %s6068_s22 = sphi %s6223_s22, %s7869_s22   ;;  %s6064_s21 = sphi %s6221_s21, %s7868_s21  }
  0x2a   : > { %7792 = sst [smem:[#allocation43_spill]] %s6072_s23  ;;  %s4388_s18 = sadd.s32 4294967294, %s6104_s0  }
  0x2b   : > { %7793 = sst [smem:[#allocation44_spill]] %s6076_s24  ;;  %s69_s19 = sadd.s32 1, %s6096_s29 }
  0x2c   : > { %7794 = sst [smem:[#allocation45_spill]] %s6080_s25  ;;  %s73_s20 = sadd.s32 1, %s6100_s30 }
  0x2d   : > { %7795 = sst [smem:[#allocation46_spill]] %s6088_s27  ;;  %p71_p0 = scmp.ge.s32.totalorder %s69_s19, 2 }
  0x2e   : > { %7796 = sst [smem:[#allocation47_spill]] %s6092_s28  ;;  %s82_s16 = sadd.s32 1, %s6084_s26 }
  0x2f   : > { %7797 = sst [smem:[#allocation48_spill]] %s6104_s0  ;;  %p7735_p1 = scmp.ne.s32.totalorder %s6084_s26, %s6080_s25 }
  0x30   : > { %7798 = sst [smem:[#allocation49_spill]] %s6277_s17  ;;  %p90_p2 = scmp.eq.s32.totalorder %s6104_s0, 0 }
  0x31   : > { %s7882_s19 = smov (%p71_p0, %s69_s19), 0  ;;  %s7884_s20 = smov (!%p71_p0, %s73_s20), %s6100_s30 }
  0x32   : > { %7799 = sst [smem:[#allocation50_spill]] %s7882_s19  ;;  %p6294_p3 = por %p90_p2, %p7735_p1 }
  0x33   : > { %p7734_p4 = scmp.ne.s32.totalorder %s6080_s25, %s6076_s24  ;;  %p75_p5 = scmp.ge.s32.totalorder %s7884_s20, 2 }
  0x34   : > { %s7800_s28 = scalar_select %p6294_p3, 1, 0 }
  0x35   : > { %p7746_p6 = scmp.eq.s32.totalorder %s6277_s17, 0  ;;  %s133_s27 = ssub.s32 %s6096_s29, %s7882_s19 }
  0x36   : > { %s136_s13 = sadd.s32 1, %s6072_s23  ;;  %s7886_s20 = smov (%p75_p5, %s7884_s20), 0 }
  0x37   : > { %7801 = sst [smem:[#allocation51_spill]] %s7886_s20  ;;  %p6311_p7 = por %p7746_p6, %p7734_p4 }
  0x38   : > { %p134_p8 = scmp.eq.s32.totalorder %s133_s27, 0  ;;  %s79_s8 = ssub.s32 %s6100_s30, %s7886_s20 }
  0x39   : > { %s7802_s10 = scalar_select %p6311_p7, 1, 0 }
  0x3a   : > { %p143_p9 = scmp.ne.s32.totalorder %s6072_s23, %s6068_s22  ;;  %p80_p10 = scmp.eq.s32.totalorder %s79_s8, 0 }
  0x3b   : > { %7803 = sst [smem:[#allocation52_spill]] %s7802_s10  ;;  %p149_p11 = scmp.ne.s32.totalorder %s6068_s22, %s6064_s21 }
  0x3c   : > { %s6322_s19 = scalar_select %p134_p8, %s6072_s23, %s136_s13  }
  0x3d   : > { %s6325_s6 = scalar_select %p80_p10, %s6084_s26, %s82_s16  }
  0x3e   : > { %7804 = sst [smem:[#allocation53_spill]] %s6322_s19  ;;  %p6329_p12 = por %p143_p9, %p90_p2 }
  0x3f   : > { %7805 = sst [smem:[#allocation54_spill]] %s6325_s6  ;;  %p6335_p13 = por %p149_p11, %p7746_p6 }
  0x40   : > { %s7806_s4 = scalar_select %p6329_p12, 1, 0 }
  0x41   : > { %s7807_s2 = scalar_select %p6335_p13, 1, 0 }
  0x42   : > { %p503_p0 = scmp.eq.s32.totalorder %s6277_s17, 3  ;;  %p509_p5 = scmp.eq.s32.totalorder %s4388_s18, 3 }
  0x43   : > { %7808 = sst [smem:[#allocation55_spill]] %s7807_s2  ;;  %p4389_p4 = scmp.ge.s32.totalorder %s6104_s0, 1 }
  0x44   : > { %p516_p1 = scmp.lt.s32.totalorder %s6104_s0, 5  ;;  %p7809_p7 = scmp.ne.s32.totalorder %s6084_s26, %s6080_s25 }
  0x45   : > { %p7812_p10 = scmp.ne.s32.totalorder %s6080_s25, %s6076_s24  ;;  %s6106_s21 = smov [#allocation26]  }
  0x46   : > { %p6345_p8 = por %p503_p0, %p7809_p7  ;;  %p6356_p2 = pnand %p4389_p4, %p516_p1 }
  0x47   : > { %p6352_p3 = por %p509_p5, %p7812_p10  ;;  %s529_s27 = sshll.u32 %s6106_s21, 4  ;;  %s530_s27 = int_to_ptr.vmem [resolvable:$true] %s529_s27 }
  0x48   : > { %s7810_s8 = scalar_select %p6345_p8, 1, 0 }
  0x49   : > { %s7813_s13 = scalar_select %p6352_p3, 1, 0 }
  0x4a   : > { %7811 = sst [smem:[#allocation56_spill]] %s7810_s8  ;;  %p5100_p9 = pneg %p6356_p2 }
  0x4b   : > { %7814 = sst [smem:[#allocation57_spill]] %s7813_s13  ;;  %s6107_s18 = smov [#allocation27]  }
  0x4c   : > { %s7815_s16 = scalar_select %p6356_p2, 1, 0 }
  0x4d   : > { %s540_s20 = sshll.u32 %s6107_s18, 4  ;;  %p6364_p7 = pnand %p5100_p9, %p7746_p6  ;;  %s6368_s20 = int_to_ptr.vmem [resolvable:$true] %s540_s20 }
  0x4e   : > { %s7817_s14 = sld [smem:[#allocation71_spill]] }
  0x4f   : > { %p5496_p4 = pneg %p6364_p7 }
  0x54   : > { %s5494_s24 = scalar_lea.hbm %s7817_s14, 16 }
  0x55   : > { %p5495_p1 = scmp.ne.s32.totalorder %s7817_s14, %s5494_s24  ;;  %p5501_p5 = scmp.lt.u32.totalorder %s5494_s24, %s7817_s14 }
  0x57   : > { %p5497_p11 = pnand %p5496_p4, %p5495_p1 }
  0x59   : > { %p5498_p0 = pneg %p5497_p11 }
  0x5b   : > { %p5503_p10 = pnand %p5501_p5, %p5498_p0 }
  0x5d   : > { %5506 = shalt.err (!%p5503_p10)
}
  0x5e   : > { %s5507_s22 = scalar_lea.vmem %s530_s27, 16  ;;  %s5514_s2 = scalar_lea.vmem %s530_s27, 32 }
  0x5f   : > { %p5508_p9 = scmp.ne.s32.totalorder %s530_s27, %s5507_s22  ;;  %p5515_p8 = scmp.lt.s32.totalorder %s530_s27, %s530_s27 }
  0x60   : > { %p5516_p13 = scmp.lt.s32.totalorder %s5514_s2, %s5507_s22 }
  0x61   : > { %p5510_p6 = pnand %p5508_p9, %p5496_p4 }
  0x62   : > { %p5517_p2 = por %p5516_p13, %p5515_p8 }
  0x63   : > { %p5511_p3 = pneg %p5510_p6 }
  0x65   : > { %p5518_p12 = pnand %p5517_p2, %p5511_p3 }
  0x67   : > { %5521 = shalt.err (!%p5518_p12)
}
  0x68   : > { %5103 = dma.hbm_to_vmem [thread:$0]  (!%p6364_p7), %s7817_s14, 16, %s530_s27, [#allocation25]  }
  0x69   : > { %s7818_s15 = sld [smem:[#allocation72_spill]] }
  0x6f   : > { %s5522_s21 = scalar_lea.hbm %s7818_s15, 16 }
  0x70   : > { %p5523_p6 = scmp.ne.s32.totalorder %s7818_s15, %s5522_s21  ;;  %p5529_p12 = scmp.lt.u32.totalorder %s5522_s21, %s7818_s15 }
  0x72   : > { %p5525_p13 = pnand %p5523_p6, %p5496_p4 }
  0x74   : > { %p5526_p3 = pneg %p5525_p13 }
  0x76   : > { %p5531_p8 = pnand %p5529_p12, %p5526_p3 }
  0x78   : > { %5534 = shalt.err (!%p5531_p8)
}
  0x79   : > { %s5535_s27 = scalar_lea.vmem %s6368_s20, 16  ;;  %s5542_s17 = scalar_lea.vmem %s6368_s20, 32 }
  0x7a   : > { %p5536_p2 = scmp.ne.s32.totalorder %s6368_s20, %s5535_s27  ;;  %p5543_p0 = scmp.lt.s32.totalorder %s6368_s20, %s6368_s20 }
  0x7b   : > { %p5544_p5 = scmp.lt.s32.totalorder %s5542_s17, %s5535_s27 }
  0x7c   : > { %p5538_p1 = pnand %p5536_p2, %p5496_p4 }
  0x7d   : > { %p5545_p10 = por %p5544_p5, %p5543_p0 }
  0x7e   : > { %p5539_p11 = pneg %p5538_p1 }
  0x80   : > { %p5546_p9 = pnand %p5545_p10, %p5539_p11 }
  0x82   : > { %5549 = shalt.err (!%p5546_p9)
}
  0x83   : > { %5106 = dma.hbm_to_vmem [thread:$0]  (!%p6364_p7), %s7818_s15, 16, %s6368_s20, [#allocation28]  }
  0x84   : > { %p4392_p6 = scmp.ge.s32.totalorder %s6104_s0, 4 }
  0x85   : > { %s7753_s24 = sand.u32 (!%p4392_p6), 1, %s6084_s26   ;;  %s7754_s13 = sshll.u32 (!%p4392_p6), %s6100_s30, 8 }
  0x86   : > { %547 = sbr.rel (%p4392_p6) target bundleno = 527 (0x20f), region = 24  ;;  %s6423_s21 = sshll.u32 (!%p4392_p6), %s7753_s24, 4 }
  0x87   : > { %s6426_s6 = sand.u32 (!%p4392_p6), 1, %s6104_s0   ;;  %s7819_s1 = sld [smem:[#allocation59_spill]] (!%p4392_p6) }
  0x88   : > { %s577_s2 = scalar_lea.vmem (!%p4392_p6), [#allocation6], %s6423_s21  ;;  %s6439_s17 = sand.u32 (!%p4392_p6), 1, %s6072_s23  }
  0x89   : > { %s585_s27 = sshll.u32 (!%p4392_p6), %s577_s2, 4  ;;  %s7755_s19 = scalar_lea.sflag (!%p4392_p6), [#allocation7], %s6426_s6  ;;  %s6436_s27 = int_to_ptr.vmem [resolvable:$true] %s585_s27 }
  0x8a   : > { %p7820_p4 = scmp.ne.s32.totalorder (!%p4392_p6), %s7800_s28, 0 }
  0x8d   : > { %s6433_s22 = scalar_lea.hbm %s7819_s1, %s7754_s13  ;;  %s5554_s24 = scalar_lea.hbm %s7819_s1, 512 }
  0x8e   : > { %s5550_s8 = scalar_lea.hbm %s6433_s22, 256  ;;  %p5555_p12 = scmp.lt.u32.totalorder %s6433_s22, %s7819_s1 }
  0x8f   : > { %p5551_p7 = scmp.ne.s32.totalorder %s6433_s22, %s5550_s8  ;;  %p5556_p8 = scmp.lt.u32.totalorder %s5554_s24, %s5550_s8 }
  0x90   : > { %p5558_p1 = scmp.lt.u32.totalorder %s5550_s8, %s6433_s22 }
  0x91   : > { %p5552_p13 = pnand %p5551_p7, %p7820_p4  ;;  %p5557_p2 = por %p5556_p8, %p5555_p12 }
  0x93   : > { %p5553_p3 = pneg %p5552_p13  ;;  %p5559_p11 = por %p5558_p1, %p5557_p2 }
  0x95   : > { %p5560_p0 = pnand %p5559_p11, %p5553_p3 }
  0x97   : > { %5563 = shalt.err (!%p5560_p0)
}
  0x98   : > { %s5564_s2 = scalar_lea.vmem %s6436_s27, 256  ;;  %s6108_s20 = smov [#allocation6]  }
  0x99   : > { %p5565_p5 = scmp.ne.s32.totalorder %s6436_s27, %s5564_s2  ;;  %s5568_s18 = sshll.u32 %s6108_s20, 4  ;;  %s5569_s18 = int_to_ptr.vmem [resolvable:$false] %s5568_s18 }
  0x9a   : > { %s5570_s14 = scalar_lea.vmem %s5569_s18, 512  ;;  %p5571_p6 = scmp.lt.s32.totalorder %s6436_s27, %s5569_s18 }
  0x9b   : > { %p5566_p10 = pnand %p5565_p5, %p7820_p4  ;;  %p5572_p7 = scmp.lt.s32.totalorder %s5570_s14, %s5564_s2 }
  0x9d   : > { %p5567_p9 = pneg %p5566_p10  ;;  %p5573_p13 = por %p5572_p7, %p5571_p6 }
  0x9f   : > { %p5574_p12 = pnand %p5573_p13, %p5567_p9 }
  0xa1   : > { %5577 = shalt.err (!%p5574_p12)
}
  0xa2   : > { %s7756_s24 = smov 64   ;;  %s7758_s13 = smov 4  }
  0xa3   : > { %5067 = dma.hbm_to_vmem [thread:$0]  (%p7820_p4), %s6433_s22, 256, %s6436_s27, %s7755_s19, %s7756_s24, %s7756_s24, %s7758_s13  }
  0xa4   : > { %s6469_s8 = sshll.u32 %s6439_s17, 6  ;;  %s6472_s2 = sshll.u32 %s6096_s29, 10 }
  0xa5   : > { %s7821_s3 = sld [smem:[#allocation61_spill]]  ;;  %s620_s1 = scalar_lea.vmem [#allocation9], %s6469_s8 }
  0xa6   : > { %s627_s15 = sshll.u32 %s620_s1, 4  ;;  %s7761_s22 = scalar_lea.sflag [#allocation10], %s6426_s6  ;;  %s6481_s15 = int_to_ptr.vmem [resolvable:$true] %s627_s15 }
  0xa7   : > { %p7822_p8 = scmp.ne.s32.totalorder %s7806_s4, 0 }
  0xab   : > { %s6478_s14 = scalar_lea.hbm %s7821_s3, %s6472_s2  ;;  %s5582_s20 = scalar_lea.hbm %s7821_s3, 2048 }
  0xac   : > { %s5578_s27 = scalar_lea.hbm %s6478_s14, 1024  ;;  %p5583_p11 = scmp.lt.u32.totalorder %s6478_s14, %s7821_s3 }
  0xad   : > { %p5579_p3 = scmp.ne.s32.totalorder %s6478_s14, %s5578_s27  ;;  %p5584_p0 = scmp.lt.u32.totalorder %s5582_s20, %s5578_s27 }
  0xae   : > { %p5586_p10 = scmp.lt.u32.totalorder %s5578_s27, %s6478_s14 }
  0xaf   : > { %p5580_p2 = pnand %p5579_p3, %p7822_p8  ;;  %p5585_p5 = por %p5584_p0, %p5583_p11 }
  0xb1   : > { %p5581_p1 = pneg %p5580_p2  ;;  %p5587_p9 = por %p5586_p10, %p5585_p5 }
  0xb3   : > { %p5588_p6 = pnand %p5587_p9, %p5581_p1 }
  0xb5   : > { %5591 = shalt.err (!%p5588_p6)
}
  0xb6   : > { %s5592_s1 = scalar_lea.vmem %s6481_s15, 1024  ;;  %s6111_s19 = smov [#allocation9]  }
  0xb7   : > { %p5593_p7 = scmp.ne.s32.totalorder %s6481_s15, %s5592_s1  ;;  %s5596_s24 = sshll.u32 %s6111_s19, 4  ;;  %s5597_s24 = int_to_ptr.vmem [resolvable:$false] %s5596_s24 }
  0xb8   : > { %s5598_s13 = scalar_lea.vmem %s5597_s24, 2048  ;;  %p5599_p3 = scmp.lt.s32.totalorder %s6481_s15, %s5597_s24 }
  0xb9   : > { %p5594_p13 = pnand %p5593_p7, %p7822_p8  ;;  %p5600_p2 = scmp.lt.s32.totalorder %s5598_s13, %s5592_s1 }
  0xbb   : > { %p5595_p12 = pneg %p5594_p13  ;;  %p5601_p11 = por %p5600_p2, %p5599_p3 }
  0xbd   : > { %p5602_p0 = pnand %p5601_p11, %p5595_p12 }
  0xbf   : > { %5605 = shalt.err (!%p5602_p0)
}
  0xc0   : > { %s7823_s27 = smov 4   ;;  %s7824_s20 = smov 64  }
  0xc1   : > { %5069 = dma.hbm_to_vmem [thread:$0]  (%p7822_p8), %s6478_s14, 1024, %s6481_s15, %s7761_s22, %s7824_s20, %s7824_s20, %s7823_s27  }
  0xc2   : > { %s7825_s5 = sld [smem:[#allocation63_spill]]  ;;  %s662_s24 = scalar_lea.vmem [#allocation12], %s6469_s8 }
  0xc3   : > { %s669_s13 = sshll.u32 %s662_s24, 4  ;;  %s7762_s3 = scalar_lea.sflag [#allocation13], %s6426_s6  ;;  %s6517_s13 = int_to_ptr.vmem [resolvable:$true] %s669_s13 }
  0xc8   : > { %s6514_s1 = scalar_lea.hbm %s7825_s5, %s6472_s2  ;;  %s5610_s18 = scalar_lea.hbm %s7825_s5, 2048 }
  0xc9   : > { %s5606_s23 = scalar_lea.hbm %s6514_s1, 1024  ;;  %p5611_p9 = scmp.lt.u32.totalorder %s6514_s1, %s7825_s5 }
  0xca   : > { %p5607_p1 = scmp.ne.s32.totalorder %s6514_s1, %s5606_s23  ;;  %p5612_p6 = scmp.lt.u32.totalorder %s5610_s18, %s5606_s23 }
  0xcb   : > { %p5614_p13 = scmp.lt.u32.totalorder %s5606_s23, %s6514_s1 }
  0xcc   : > { %p5608_p5 = pnand %p5607_p1, %p7822_p8  ;;  %p5613_p7 = por %p5612_p6, %p5611_p9 }
  0xce   : > { %p5609_p10 = pneg %p5608_p5  ;;  %p5615_p12 = por %p5614_p13, %p5613_p7 }
  0xd0   : > { %p5616_p3 = pnand %p5615_p12, %p5609_p10 }
  0xd2   : > { %5619 = shalt.err (!%p5616_p3)
}
  0xd3   : > { %s5620_s24 = scalar_lea.vmem %s6517_s13, 1024  ;;  %s6112_s15 = smov [#allocation12]  }
  0xd4   : > { %p5621_p2 = scmp.ne.s32.totalorder %s6517_s13, %s5620_s24  ;;  %s5624_s14 = sshll.u32 %s6112_s15, 4  ;;  %s5625_s14 = int_to_ptr.vmem [resolvable:$false] %s5624_s14 }
  0xd5   : > { %s5626_s22 = scalar_lea.vmem %s5625_s14, 2048  ;;  %p5627_p1 = scmp.lt.s32.totalorder %s6517_s13, %s5625_s14 }
  0xd6   : > { %p5622_p11 = pnand %p5621_p2, %p7822_p8  ;;  %p5628_p5 = scmp.lt.s32.totalorder %s5626_s22, %s5620_s24 }
  0xd8   : > { %p5623_p0 = pneg %p5622_p11  ;;  %p5629_p9 = por %p5628_p5, %p5627_p1 }
  0xda   : > { %p5630_p6 = pnand %p5629_p9, %p5623_p0 }
  0xdc   : > { %5633 = shalt.err (!%p5630_p6)
}
  0xdd   : > { %5071 = dma.hbm_to_vmem [thread:$0]  (%p7822_p8), %s6514_s1, 1024, %s6517_s13, %s7762_s3, %s7824_s20, %s7824_s20, %s7823_s27  }
  0xde   : > { %s7826_s7 = sld [smem:[#allocation65_spill]]  ;;  %s704_s24 = scalar_lea.vmem [#allocation15], %s6469_s8 }
  0xdf   : > { %s711_s15 = sshll.u32 %s704_s24, 4  ;;  %s7763_s14 = scalar_lea.sflag [#allocation16], %s6426_s6  ;;  %s6553_s15 = int_to_ptr.vmem [resolvable:$true] %s711_s15 }
  0xe4   : > { %s6550_s19 = scalar_lea.hbm %s7826_s7, %s6472_s2  ;;  %s5638_s23 = scalar_lea.hbm %s7826_s7, 2048 }
  0xe5   : > { %s5634_s22 = scalar_lea.hbm %s6550_s19, 1024  ;;  %p5639_p12 = scmp.lt.u32.totalorder %s6550_s19, %s7826_s7 }
  0xe6   : > { %p5635_p10 = scmp.ne.s32.totalorder %s6550_s19, %s5634_s22  ;;  %p5640_p3 = scmp.lt.u32.totalorder %s5638_s23, %s5634_s22 }
  0xe7   : > { %p5642_p11 = scmp.lt.u32.totalorder %s5634_s22, %s6550_s19 }
  0xe8   : > { %p5636_p7 = pnand %p5635_p10, %p7822_p8  ;;  %p5641_p2 = por %p5640_p3, %p5639_p12 }
  0xea   : > { %p5637_p13 = pneg %p5636_p7  ;;  %p5643_p0 = por %p5642_p11, %p5641_p2 }
  0xec   : > { %p5644_p1 = pnand %p5643_p0, %p5637_p13 }
  0xee   : > { %5647 = shalt.err (!%p5644_p1)
}
  0xef   : > { %s5648_s24 = scalar_lea.vmem %s6553_s15, 1024  ;;  %s6113_s1 = smov [#allocation15]  }
  0xf0   : > { %p5649_p5 = scmp.ne.s32.totalorder %s6553_s15, %s5648_s24  ;;  %s5652_s13 = sshll.u32 %s6113_s1, 4  ;;  %s5653_s13 = int_to_ptr.vmem [resolvable:$false] %s5652_s13 }
  0xf1   : > { %s5654_s3 = scalar_lea.vmem %s5653_s13, 2048  ;;  %p5655_p10 = scmp.lt.s32.totalorder %s6553_s15, %s5653_s13 }
  0xf2   : > { %p5650_p9 = pnand %p5649_p5, %p7822_p8  ;;  %p5656_p7 = scmp.lt.s32.totalorder %s5654_s3, %s5648_s24 }
  0xf4   : > { %p5651_p6 = pneg %p5650_p9  ;;  %p5657_p12 = por %p5656_p7, %p5655_p10 }
  0xf6   : > { %p5658_p3 = pnand %p5657_p12, %p5651_p6 }
  0xf8   : > { %5661 = shalt.err (!%p5658_p3)
}
  0xf9   : > { %5073 = dma.hbm_to_vmem [thread:$0]  (%p7822_p8), %s6550_s19, 1024, %s6553_s15, %s7763_s14, %s7824_s20, %s7824_s20, %s7823_s27  }
  0xfa   : > { %s7827_s9 = sld [smem:[#allocation67_spill]]  ;;  %s746_s24 = scalar_lea.vmem [#allocation18], %s6469_s8 }
  0xfb   : > { %s753_s1 = sshll.u32 %s746_s24, 4  ;;  %s4426_s13 = sshll.u32 %s6439_s17, 8  ;;  %s6589_s1 = int_to_ptr.vmem [resolvable:$true] %s753_s1 }
  0xfc   : > { %s7764_s3 = scalar_lea.sflag [#allocation19], %s6426_s6 }
 0x100   : > { %s6586_s18 = scalar_lea.hbm %s7827_s9, %s6472_s2  ;;  %s5666_s22 = scalar_lea.hbm %s7827_s9, 2048 }
 0x101   : > { %s5662_s5 = scalar_lea.hbm %s6586_s18, 1024  ;;  %p5667_p0 = scmp.lt.u32.totalorder %s6586_s18, %s7827_s9 }
 0x102   : > { %p5663_p13 = scmp.ne.s32.totalorder %s6586_s18, %s5662_s5  ;;  %p5668_p1 = scmp.lt.u32.totalorder %s5666_s22, %s5662_s5 }
 0x103   : > { %p5670_p9 = scmp.lt.u32.totalorder %s5662_s5, %s6586_s18 }
 0x104   : > { %p5664_p2 = pnand %p5663_p13, %p7822_p8  ;;  %p5669_p5 = por %p5668_p1, %p5667_p0 }
 0x106   : > { %p5665_p11 = pneg %p5664_p2  ;;  %p5671_p6 = por %p5670_p9, %p5669_p5 }
 0x108   : > { %p5672_p10 = pnand %p5671_p6, %p5665_p11 }
 0x10a   : > { %5675 = shalt.err (!%p5672_p10)
}
 0x10b   : > { %s5676_s24 = scalar_lea.vmem %s6589_s1, 1024  ;;  %s6114_s19 = smov [#allocation18]  }
 0x10c   : > { %p5677_p7 = scmp.ne.s32.totalorder %s6589_s1, %s5676_s24  ;;  %s5680_s15 = sshll.u32 %s6114_s19, 4  ;;  %s5681_s15 = int_to_ptr.vmem [resolvable:$false] %s5680_s15 }
 0x10d   : > { %s5682_s14 = scalar_lea.vmem %s5681_s15, 2048  ;;  %p5683_p13 = scmp.lt.s32.totalorder %s6589_s1, %s5681_s15 }
 0x10e   : > { %p5678_p12 = pnand %p5677_p7, %p7822_p8  ;;  %p5684_p2 = scmp.lt.s32.totalorder %s5682_s14, %s5676_s24 }
 0x110   : > { %p5679_p3 = pneg %p5678_p12  ;;  %p5685_p0 = por %p5684_p2, %p5683_p13 }
 0x112   : > { %p5686_p1 = pnand %p5685_p0, %p5679_p3 }
 0x114   : > { %5689 = shalt.err (!%p5686_p1)
}
 0x115   : > { %5075 = dma.hbm_to_vmem [thread:$0]  (%p7822_p8), %s6586_s18, 1024, %s6589_s1, %s7764_s3, %s7824_s20, %s7824_s20, %s7823_s27  }
 0x116   : > { %s4621_s5 = sshll.u32 %s6096_s29, 12  ;;  %s7828_s11 = sld [smem:[#allocation69_spill]] }
 0x117   : > { %s788_s19 = scalar_lea.vmem [#allocation21], %s4426_s13  ;;  %s7770_s14 = scalar_lea.sflag [#allocation22], %s6426_s6 }
 0x118   : > { %s795_s15 = sshll.u32 %s788_s19, 4  ;;  %s6629_s15 = int_to_ptr.vmem [resolvable:$true] %s795_s15 }
 0x11c   : > { %s6625_s24 = scalar_lea.hbm %s7828_s11, %s4621_s5  ;;  %s5694_s22 = scalar_lea.hbm %s7828_s11, 8192 }
 0x11d   : > { %s5690_s7 = scalar_lea.hbm %s6625_s24, 4096  ;;  %p5695_p6 = scmp.lt.u32.totalorder %s6625_s24, %s7828_s11 }
 0x11e   : > { %p5691_p11 = scmp.ne.s32.totalorder %s6625_s24, %s5690_s7  ;;  %p5696_p10 = scmp.lt.u32.totalorder %s5694_s22, %s5690_s7 }
 0x11f   : > { %p5698_p12 = scmp.lt.u32.totalorder %s5690_s7, %s6625_s24 }
 0x120   : > { %p5692_p5 = pnand %p5691_p11, %p7822_p8  ;;  %p5697_p7 = por %p5696_p10, %p5695_p6 }
 0x122   : > { %p5693_p9 = pneg %p5692_p5  ;;  %p5699_p3 = por %p5698_p12, %p5697_p7 }
 0x124   : > { %p5700_p13 = pnand %p5699_p3, %p5693_p9 }
 0x126   : > { %5703 = shalt.err (!%p5700_p13)
}
 0x127   : > { %s5704_s19 = scalar_lea.vmem %s6629_s15, 4096  ;;  %s6115_s18 = smov [#allocation21]  }
 0x128   : > { %p5705_p2 = scmp.ne.s32.totalorder %s6629_s15, %s5704_s19  ;;  %s5708_s1 = sshll.u32 %s6115_s18, 4  ;;  %s5709_s1 = int_to_ptr.vmem [resolvable:$false] %s5708_s1 }
 0x129   : > { %s5710_s3 = scalar_lea.vmem %s5709_s1, 8192  ;;  %p5711_p11 = scmp.lt.s32.totalorder %s6629_s15, %s5709_s1 }
 0x12a   : > { %p5706_p0 = pnand %p5705_p2, %p7822_p8  ;;  %p5712_p5 = scmp.lt.s32.totalorder %s5710_s3, %s5704_s19 }
 0x12c   : > { %p5707_p1 = pneg %p5706_p0  ;;  %p5713_p6 = por %p5712_p5, %p5711_p11 }
 0x12e   : > { %p5714_p10 = pnand %p5713_p6, %p5707_p1 }
 0x130   : > { %5717 = shalt.err (!%p5714_p10)
}
 0x131   : > { %s6116_s7 = smov 256   ;;  %s6117_s22 = smov 16  }
 0x132   : > { %5077 = dma.hbm_to_vmem [thread:$0]  (%p7822_p8), %s6625_s24, 4096, %s6629_s15, %s7770_s14, %s6116_s7, %s6116_s7, %s6117_s22  }
 0x133   : > { %s6660_s18 = scalar_lea.hbm %s7720_s12, %s4621_s5  ;;  %s6664_s1 = scalar_lea.vmem [#allocation23], %s4426_s13 }
 0x134   : > { %s816_s3 = sshll.u32 %s6664_s1, 4  ;;  %s7829_s9 = sshll.u32 %s6100_s30, 8  ;;  %s6859_s3 = int_to_ptr.vmem [resolvable:$true] %s816_s3 }
 0x135   : > { %s7830_s10 = sld [smem:[#allocation58_spill]]  ;;  %s555_s24 = scalar_lea.vmem [#allocation3], %s6423_s21 }
 0x136   : > { %s563_s15 = sshll.u32 %s555_s24, 4  ;;  %s4399_s5 = sshll.u32 %s6439_s17, 4  ;;  %s6675_s15 = int_to_ptr.vmem [resolvable:$true] %s563_s15 }
 0x137   : > { %s7831_s7 = sand.u32 1, %s6084_s26  }
 0x138   : > { %s6680_s13 = scalar_lea.sflag [#allocation4], %s7831_s7 }
 0x13b   : > { %s6672_s25 = scalar_lea.hbm %s7830_s10, %s7829_s9  ;;  %s5722_s0 = scalar_lea.hbm %s7830_s10, 512 }
 0x13c   : > { %s5718_s22 = scalar_lea.hbm %s6672_s25, 256  ;;  %p5723_p3 = scmp.lt.u32.totalorder %s6672_s25, %s7830_s10 }
 0x13d   : > { %p5719_p9 = scmp.ne.s32.totalorder %s6672_s25, %s5718_s22  ;;  %p5724_p13 = scmp.lt.u32.totalorder %s5722_s0, %s5718_s22 }
 0x13e   : > { %p5726_p0 = scmp.lt.u32.totalorder %s5718_s22, %s6672_s25 }
 0x13f   : > { %p5720_p7 = pnand %p5719_p9, %p7820_p4  ;;  %p5725_p2 = por %p5724_p13, %p5723_p3 }
 0x141   : > { %p5721_p12 = pneg %p5720_p7  ;;  %p5727_p1 = por %p5726_p0, %p5725_p2 }
 0x143   : > { %p5728_p11 = pnand %p5727_p1, %p5721_p12 }
 0x145   : > { %5731 = shalt.err (!%p5728_p11)
}
 0x146   : > { %s5732_s21 = scalar_lea.vmem %s6675_s15, 256  ;;  %s6118_s24 = smov [#allocation3]  }
 0x147   : > { %p5733_p5 = scmp.ne.s32.totalorder %s6675_s15, %s5732_s21  ;;  %s5736_s7 = sshll.u32 %s6118_s24, 4  ;;  %s5737_s7 = int_to_ptr.vmem [resolvable:$false] %s5736_s7 }
 0x148   : > { %s5738_s11 = scalar_lea.vmem %s5737_s7, 512  ;;  %p5739_p9 = scmp.lt.s32.totalorder %s6675_s15, %s5737_s7 }
 0x149   : > { %p5734_p6 = pnand %p5733_p5, %p7820_p4  ;;  %p5740_p7 = scmp.lt.s32.totalorder %s5738_s11, %s5732_s21 }
 0x14b   : > { %p5735_p10 = pneg %p5734_p6  ;;  %p5741_p3 = por %p5740_p7, %p5739_p9 }
 0x14d   : > { %p5742_p13 = pnand %p5741_p3, %p5735_p10 }
 0x14f   : > { %5745 = shalt.err (!%p5742_p13)
}
 0x150   : > { %s6119_s22 = smov 128   ;;  %s6120_s9 = smov 8  }
 0x151   : > { %5066 = dma.hbm_to_vmem [thread:$0]  (%p7820_p4), %s6672_s25, 256, %s6675_s15, %s6680_s13, %s6119_s22, %s6119_s22, %s6120_s9  }
 0x152   : > { %s4612_s0 = sshll.u32 %s6096_s29, 8  ;;  %s7832_s21 = sld [smem:[#allocation60_spill]] }
 0x153   : > { %s599_s11 = scalar_lea.vmem [#allocation8], %s4399_s5 }
 0x154   : > { %s606_s14 = sshll.u32 %s599_s11, 4  ;;  %s6715_s14 = int_to_ptr.vmem [resolvable:$true] %s606_s14 }
 0x158   : > { %s7833_s7 = smov %s7832_s21  ;;  %s6711_s24 = scalar_lea.hbm %s7832_s21, %s4612_s0 }
 0x159   : > { %s5746_s28 = scalar_lea.hbm %s6711_s24, 256  ;;  %s5750_s13 = scalar_lea.hbm %s7833_s7, 512 }
 0x15a   : > { %p5747_p12 = scmp.ne.s32.totalorder %s6711_s24, %s5746_s28  ;;  %p5751_p0 = scmp.lt.u32.totalorder %s6711_s24, %s7833_s7 }
 0x15b   : > { %p5752_p1 = scmp.lt.u32.totalorder %s5750_s13, %s5746_s28  ;;  %p5754_p5 = scmp.lt.u32.totalorder %s5746_s28, %s6711_s24 }
 0x15c   : > { %p5748_p2 = pnand %p5747_p12, %p7822_p8 }
 0x15d   : > { %p5753_p11 = por %p5752_p1, %p5751_p0 }
 0x15e   : > { %p5749_p4 = pneg %p5748_p2 }
 0x15f   : > { %p5755_p6 = por %p5754_p5, %p5753_p11 }
 0x161   : > { %p5756_p10 = pnand %p5755_p6, %p5749_p4 }
 0x163   : > { %5759 = shalt.err (!%p5756_p10)
}
 0x164   : > { %s5760_s5 = scalar_lea.vmem %s6715_s14, 256  ;;  %s6121_s19 = smov [#allocation8]  }
 0x165   : > { %p5761_p9 = scmp.ne.s32.totalorder %s6715_s14, %s5760_s5  ;;  %s5764_s21 = sshll.u32 %s6121_s19, 4  ;;  %s5765_s21 = int_to_ptr.vmem [resolvable:$false] %s5764_s21 }
 0x166   : > { %s5766_s11 = scalar_lea.vmem %s5765_s21, 512  ;;  %p5767_p13 = scmp.lt.s32.totalorder %s6715_s14, %s5765_s21 }
 0x167   : > { %p5762_p7 = pnand %p5761_p9, %p7822_p8  ;;  %p5768_p12 = scmp.lt.s32.totalorder %s5766_s11, %s5760_s5 }
 0x169   : > { %p5763_p3 = pneg %p5762_p7  ;;  %p5769_p2 = por %p5768_p12, %p5767_p13 }
 0x16b   : > { %p5770_p0 = pnand %p5769_p2, %p5763_p3 }
 0x16d   : > { %5773 = shalt.err (!%p5770_p0)
}
 0x16e   : > { %s7834_s28 = scalar_lea.sflag [#allocation7], %s6426_s6  ;;  %s7835_s13 = sld [smem:[#allocation62_spill]] }
 0x16f   : > { %5068 = dma.hbm_to_vmem [thread:$0]  (%p7822_p8), %s6711_s24, 256, %s6715_s14, %s7834_s28, %s6119_s22, %s6119_s22, %s6120_s9  }
 0x170   : > { %s641_s23 = scalar_lea.vmem [#allocation11], %s6469_s8 }
 0x171   : > { %s648_s5 = sshll.u32 %s641_s23, 4  ;;  %s6750_s5 = int_to_ptr.vmem [resolvable:$true] %s648_s5 }
 0x174   : > { %s6747_s0 = scalar_lea.hbm %s7835_s13, %s6472_s2  ;;  %s5778_s22 = scalar_lea.hbm %s7835_s13, 2048 }
 0x175   : > { %s5774_s19 = scalar_lea.hbm %s6747_s0, 1024  ;;  %p5779_p5 = scmp.lt.u32.totalorder %s6747_s0, %s7835_s13 }
 0x176   : > { %p5775_p4 = scmp.ne.s32.totalorder %s6747_s0, %s5774_s19  ;;  %p5780_p6 = scmp.lt.u32.totalorder %s5778_s22, %s5774_s19 }
 0x177   : > { %p5782_p9 = scmp.lt.u32.totalorder %s5774_s19, %s6747_s0 }
 0x178   : > { %p5776_p1 = pnand %p5775_p4, %p7822_p8  ;;  %p5781_p10 = por %p5780_p6, %p5779_p5 }
 0x17a   : > { %p5777_p11 = pneg %p5776_p1  ;;  %p5783_p7 = por %p5782_p9, %p5781_p10 }
 0x17c   : > { %p5784_p3 = pnand %p5783_p7, %p5777_p11 }
 0x17e   : > { %5787 = shalt.err (!%p5784_p3)
}
 0x17f   : > { %s5788_s11 = scalar_lea.vmem %s6750_s5, 1024  ;;  %s6122_s28 = smov [#allocation11]  }
 0x180   : > { %p5789_p13 = scmp.ne.s32.totalorder %s6750_s5, %s5788_s11  ;;  %s5792_s25 = sshll.u32 %s6122_s28, 4  ;;  %s5793_s25 = int_to_ptr.vmem [resolvable:$false] %s5792_s25 }
 0x181   : > { %s5794_s15 = scalar_lea.vmem %s5793_s25, 2048  ;;  %p5795_p0 = scmp.lt.s32.totalorder %s6750_s5, %s5793_s25 }
 0x182   : > { %p5790_p12 = pnand %p5789_p13, %p7822_p8  ;;  %p5796_p4 = scmp.lt.s32.totalorder %s5794_s15, %s5788_s11 }
 0x184   : > { %p5791_p2 = pneg %p5790_p12  ;;  %p5797_p1 = por %p5796_p4, %p5795_p0 }
 0x186   : > { %p5798_p5 = pnand %p5797_p1, %p5791_p2 }
 0x188   : > { %5801 = shalt.err (!%p5798_p5)
}
 0x189   : > { %s7836_s23 = scalar_lea.sflag [#allocation10], %s6426_s6  ;;  %s7837_s14 = sld [smem:[#allocation64_spill]] }
 0x18a   : > { %5070 = dma.hbm_to_vmem [thread:$0]  (%p7822_p8), %s6747_s0, 1024, %s6750_s5, %s7836_s23, %s7824_s20, %s7824_s20, %s7823_s27  }
 0x18b   : > { %s683_s9 = scalar_lea.vmem [#allocation14], %s6469_s8 }
 0x18c   : > { %s690_s24 = sshll.u32 %s683_s9, 4  ;;  %s6785_s24 = int_to_ptr.vmem [resolvable:$true] %s690_s24 }
 0x18f   : > { %s6782_s22 = scalar_lea.hbm %s7837_s14, %s6472_s2  ;;  %s5806_s5 = scalar_lea.hbm %s7837_s14, 2048 }
 0x190   : > { %s5802_s11 = scalar_lea.hbm %s6782_s22, 1024  ;;  %p5807_p9 = scmp.lt.u32.totalorder %s6782_s22, %s7837_s14 }
 0x191   : > { %p5803_p11 = scmp.ne.s32.totalorder %s6782_s22, %s5802_s11  ;;  %p5808_p7 = scmp.lt.u32.totalorder %s5806_s5, %s5802_s11 }
 0x192   : > { %p5810_p13 = scmp.lt.u32.totalorder %s5802_s11, %s6782_s22 }
 0x193   : > { %p5804_p6 = pnand %p5803_p11, %p7822_p8  ;;  %p5809_p3 = por %p5808_p7, %p5807_p9 }
 0x195   : > { %p5805_p10 = pneg %p5804_p6  ;;  %p5811_p12 = por %p5810_p13, %p5809_p3 }
 0x197   : > { %p5812_p2 = pnand %p5811_p12, %p5805_p10 }
 0x199   : > { %5815 = shalt.err (!%p5812_p2)
}
 0x19a   : > { %s5816_s23 = scalar_lea.vmem %s6785_s24, 1024  ;;  %s6123_s19 = smov [#allocation14]  }
 0x19b   : > { %p5817_p0 = scmp.ne.s32.totalorder %s6785_s24, %s5816_s23  ;;  %s5820_s21 = sshll.u32 %s6123_s19, 4  ;;  %s5821_s21 = int_to_ptr.vmem [resolvable:$false] %s5820_s21 }
 0x19c   : > { %s5822_s9 = scalar_lea.vmem %s5821_s21, 2048  ;;  %p5823_p5 = scmp.lt.s32.totalorder %s6785_s24, %s5821_s21 }
 0x19d   : > { %p5818_p4 = pnand %p5817_p0, %p7822_p8  ;;  %p5824_p11 = scmp.lt.s32.totalorder %s5822_s9, %s5816_s23 }
 0x19f   : > { %p5819_p1 = pneg %p5818_p4  ;;  %p5825_p6 = por %p5824_p11, %p5823_p5 }
 0x1a1   : > { %p5826_p9 = pnand %p5825_p6, %p5819_p1 }
 0x1a3   : > { %5829 = shalt.err (!%p5826_p9)
}
 0x1a4   : > { %s7838_s11 = scalar_lea.sflag [#allocation13], %s6426_s6  ;;  %s7839_s5 = sld [smem:[#allocation66_spill]] }
 0x1a5   : > { %5072 = dma.hbm_to_vmem [thread:$0]  (%p7822_p8), %s6782_s22, 1024, %s6785_s24, %s7838_s11, %s7824_s20, %s7824_s20, %s7823_s27  }
 0x1a6   : > { %s725_s15 = scalar_lea.vmem [#allocation17], %s6469_s8 }
 0x1a7   : > { %s732_s23 = sshll.u32 %s725_s15, 4  ;;  %s6820_s23 = int_to_ptr.vmem [resolvable:$true] %s732_s23 }
 0x1aa   : > { %s6817_s25 = scalar_lea.hbm %s7839_s5, %s6472_s2  ;;  %s5834_s24 = scalar_lea.hbm %s7839_s5, 2048 }
 0x1ab   : > { %s5830_s19 = scalar_lea.hbm %s6817_s25, 1024  ;;  %p5835_p13 = scmp.lt.u32.totalorder %s6817_s25, %s7839_s5 }
 0x1ac   : > { %p5831_p10 = scmp.ne.s32.totalorder %s6817_s25, %s5830_s19  ;;  %p5836_p12 = scmp.lt.u32.totalorder %s5834_s24, %s5830_s19 }
 0x1ad   : > { %p5838_p0 = scmp.lt.u32.totalorder %s5830_s19, %s6817_s25 }
 0x1ae   : > { %p5832_p7 = pnand %p5831_p10, %p7822_p8  ;;  %p5837_p2 = por %p5836_p12, %p5835_p13 }
 0x1b0   : > { %p5833_p3 = pneg %p5832_p7  ;;  %p5839_p4 = por %p5838_p0, %p5837_p2 }
 0x1b2   : > { %p5840_p1 = pnand %p5839_p4, %p5833_p3 }
 0x1b4   : > { %5843 = shalt.err (!%p5840_p1)
}
 0x1b5   : > { %s5844_s28 = scalar_lea.vmem %s6820_s23, 1024  ;;  %s6124_s0 = smov [#allocation17]  }
 0x1b6   : > { %p5845_p5 = scmp.ne.s32.totalorder %s6820_s23, %s5844_s28  ;;  %s5848_s15 = sshll.u32 %s6124_s0, 4  ;;  %s5849_s15 = int_to_ptr.vmem [resolvable:$false] %s5848_s15 }
 0x1b7   : > { %s5850_s21 = scalar_lea.vmem %s5849_s15, 2048  ;;  %p5851_p9 = scmp.lt.s32.totalorder %s6820_s23, %s5849_s15 }
 0x1b8   : > { %p5846_p11 = pnand %p5845_p5, %p7822_p8  ;;  %p5852_p10 = scmp.lt.s32.totalorder %s5850_s21, %s5844_s28 }
 0x1ba   : > { %p5847_p6 = pneg %p5846_p11  ;;  %p5853_p7 = por %p5852_p10, %p5851_p9 }
 0x1bc   : > { %p5854_p13 = pnand %p5853_p7, %p5847_p6 }
 0x1be   : > { %5857 = shalt.err (!%p5854_p13)
}
 0x1bf   : > { %s7840_s19 = scalar_lea.sflag [#allocation16], %s6426_s6  ;;  %s7841_s9 = sld [smem:[#allocation68_spill]] }
 0x1c0   : > { %5074 = dma.hbm_to_vmem [thread:$0]  (%p7822_p8), %s6817_s25, 1024, %s6820_s23, %s7840_s19, %s7824_s20, %s7824_s20, %s7823_s27  }
 0x1c1   : > { %s767_s28 = scalar_lea.vmem [#allocation20], %s6469_s8 }
 0x1c2   : > { %s774_s0 = sshll.u32 %s767_s28, 4  ;;  %s6855_s0 = int_to_ptr.vmem [resolvable:$true] %s774_s0 }
 0x1c5   : > { %s6852_s11 = scalar_lea.hbm %s7841_s9, %s6472_s2  ;;  %s5862_s2 = scalar_lea.hbm %s7841_s9, 2048 }
 0x1c6   : > { %s5858_s15 = scalar_lea.hbm %s6852_s11, 1024  ;;  %p5863_p0 = scmp.lt.u32.totalorder %s6852_s11, %s7841_s9 }
 0x1c7   : > { %p5859_p3 = scmp.ne.s32.totalorder %s6852_s11, %s5858_s15  ;;  %p5864_p4 = scmp.lt.u32.totalorder %s5862_s2, %s5858_s15 }
 0x1c8   : > { %p5866_p5 = scmp.lt.u32.totalorder %s5858_s15, %s6852_s11 }
 0x1c9   : > { %p5860_p12 = pnand %p5859_p3, %p7822_p8  ;;  %p5865_p1 = por %p5864_p4, %p5863_p0 }
 0x1cb   : > { %p5861_p2 = pneg %p5860_p12  ;;  %p5867_p11 = por %p5866_p5, %p5865_p1 }
 0x1cd   : > { %p5868_p6 = pnand %p5867_p11, %p5861_p2 }
 0x1cf   : > { %5871 = shalt.err (!%p5868_p6)
}
 0x1d0   : > { %s5872_s8 = scalar_lea.vmem %s6855_s0, 1024  ;;  %s6125_s1 = smov [#allocation20]  }
 0x1d1   : > { %p5873_p9 = scmp.ne.s32.totalorder %s6855_s0, %s5872_s8  ;;  %s5876_s22 = sshll.u32 %s6125_s1, 4  ;;  %s5877_s22 = int_to_ptr.vmem [resolvable:$false] %s5876_s22 }
 0x1d2   : > { %s5878_s24 = scalar_lea.vmem %s5877_s22, 2048  ;;  %p5879_p13 = scmp.lt.s32.totalorder %s6855_s0, %s5877_s22 }
 0x1d3   : > { %p5874_p10 = pnand %p5873_p9, %p7822_p8  ;;  %p5880_p3 = scmp.lt.s32.totalorder %s5878_s24, %s5872_s8 }
 0x1d5   : > { %p5875_p7 = pneg %p5874_p10  ;;  %p5881_p12 = por %p5880_p3, %p5879_p13 }
 0x1d7   : > { %p5882_p0 = pnand %p5881_p12, %p5875_p7 }
 0x1d9   : > { %5885 = shalt.err (!%p5882_p0)
}
 0x1da   : > { %s7842_s28 = scalar_lea.sflag [#allocation19], %s6426_s6  ;;  %s5886_s15 = scalar_lea.hbm %s6660_s18, 4096 }
 0x1db   : > { %5076 = dma.hbm_to_vmem [thread:$0]  (%p7822_p8), %s6852_s11, 1024, %s6855_s0, %s7842_s28, %s7824_s20, %s7824_s20, %s7823_s27  }
 0x1dc   : > { %p5887_p2 = scmp.ne.s32.totalorder %s6660_s18, %s5886_s15  ;;  %s5890_s2 = scalar_lea.hbm %s7720_s12, 8192 }
 0x1dd   : > { %p5891_p5 = scmp.lt.u32.totalorder %s6660_s18, %s7720_s12  ;;  %p5892_p11 = scmp.lt.u32.totalorder %s5890_s2, %s5886_s15 }
 0x1de   : > { %p5888_p4 = pnand %p5887_p2, %p7822_p8  ;;  %p5894_p9 = scmp.lt.u32.totalorder %s5886_s15, %s6660_s18 }
 0x1df   : > { %p5893_p6 = por %p5892_p11, %p5891_p5 }
 0x1e0   : > { %p5889_p1 = pneg %p5888_p4 }
 0x1e1   : > { %p5895_p10 = por %p5894_p9, %p5893_p6 }
 0x1e3   : > { %p5896_p7 = pnand %p5895_p10, %p5889_p1 }
 0x1e5   : > { %5899 = shalt.err (!%p5896_p7)
}
 0x1e6   : > { %s5900_s11 = scalar_lea.vmem %s6859_s3, 4096  ;;  %s6126_s0 = smov [#allocation23]  }
 0x1e7   : > { %p5901_p13 = scmp.ne.s32.totalorder %s6859_s3, %s5900_s11  ;;  %s5904_s8 = sshll.u32 %s6126_s0, 4  ;;  %s5905_s8 = int_to_ptr.vmem [resolvable:$false] %s5904_s8 }
 0x1e8   : > { %s5906_s1 = scalar_lea.vmem %s5905_s8, 8192  ;;  %p5907_p0 = scmp.lt.s32.totalorder %s6859_s3, %s5905_s8 }
 0x1e9   : > { %p5902_p3 = pnand %p5901_p13, %p7822_p8  ;;  %p5908_p2 = scmp.lt.s32.totalorder %s5906_s1, %s5900_s11 }
 0x1eb   : > { %p5903_p12 = pneg %p5902_p3  ;;  %p5909_p4 = por %p5908_p2, %p5907_p0 }
 0x1ed   : > { %p5910_p5 = pnand %p5909_p4, %p5903_p12 }
 0x1ef   : > { %5913 = shalt.err (!%p5910_p5)
}
 0x1f0   : > { %s7843_s22 = scalar_lea.sflag [#allocation22], %s6426_s6  ;;  %s4432_s24 = sshll.u32 %s6439_s17, 2 }
 0x1f1   : > { %5078 = dma.hbm_to_vmem [thread:$0]  (%p7822_p8), %s6660_s18, 4096, %s6859_s3, %s7843_s22, %s7824_s20, %s7824_s20, %s7823_s27  }
 0x1f2   : > { %s4623_s28 = sshll.u32 %s6096_s29, 6  ;;  %s7844_s23 = sld [smem:[#allocation70_spill]] }
 0x1f3   : > { %s830_s19 = scalar_lea.vmem [#allocation24], %s4432_s24  ;;  %s827_s0 = scalar_lea.sflag [#allocation25], %s6426_s6 }
 0x1f4   : > { %s838_s11 = sshll.u32 %s830_s19, 4  ;;  %s839_s11 = int_to_ptr.vmem [resolvable:$true] %s838_s11 }
 0x1f8   : > { %s7845_s2 = smov %s7844_s23  ;;  %s6918_s21 = scalar_lea.hbm %s7844_s23, %s4623_s28 }
 0x1f9   : > { %s5914_s8 = scalar_lea.hbm %s6918_s21, 64  ;;  %s5918_s20 = scalar_lea.hbm %s7845_s2, 128 }
 0x1fa   : > { %p5915_p1 = scmp.ne.s32.totalorder %s6918_s21, %s5914_s8  ;;  %p5919_p9 = scmp.lt.u32.totalorder %s6918_s21, %s7845_s2 }
 0x1fb   : > { %p5920_p10 = scmp.lt.u32.totalorder %s5918_s20, %s5914_s8  ;;  %p5922_p13 = scmp.lt.u32.totalorder %s5914_s8, %s6918_s21 }
 0x1fc   : > { %p5916_p11 = pnand %p5915_p1, %p7822_p8 }
 0x1fd   : > { %p5921_p7 = por %p5920_p10, %p5919_p9 }
 0x1fe   : > { %p5917_p6 = pneg %p5916_p11 }
 0x1ff   : > { %p5923_p3 = por %p5922_p13, %p5921_p7 }
 0x201   : > { %p5924_p12 = pnand %p5923_p3, %p5917_p6 }
 0x203   : > { %5927 = shalt.err (!%p5924_p12)
}
 0x204   : > { %s5928_s6 = scalar_lea.vmem %s839_s11, 64  ;;  %s6127_s1 = smov [#allocation24]  }
 0x205   : > { %p5929_p0 = scmp.ne.s32.totalorder %s839_s11, %s5928_s6  ;;  %s5932_s22 = sshll.u32 %s6127_s1, 4  ;;  %s5933_s22 = int_to_ptr.vmem [resolvable:$false] %s5932_s22 }
 0x206   : > { %s5934_s24 = scalar_lea.vmem %s5933_s22, 128  ;;  %p5935_p5 = scmp.lt.s32.totalorder %s839_s11, %s5933_s22 }
 0x207   : > { %p5930_p2 = pnand %p5929_p0, %p7822_p8  ;;  %p5936_p1 = scmp.lt.s32.totalorder %s5934_s24, %s5928_s6 }
 0x209   : > { %p5931_p4 = pneg %p5930_p2  ;;  %p5937_p11 = por %p5936_p1, %p5935_p5 }
 0x20b   : > { %p5938_p9 = pnand %p5937_p11, %p5931_p4 }
 0x20d   : > { %5941 = shalt.err (!%p5938_p9)
}
 0x20e   : > { %5079 = dma.hbm_to_vmem [thread:$0]  (%p7822_p8), %s6918_s21, 64, %s839_s11, %s827_s0  }
 0x20f PF: > { %p7846_p6 = scmp.ne.s32.totalorder %s7815_s16, 0 }
 0x210   : > { %s7847_s28 = sld [smem:[#allocation45_spill]] (!%p7846_p6)  ;;  %s7848_s15 = sld [smem:[#allocation52_spill]] (!%p7846_p6) }
 0x211   : > { %847 = sbr.rel (%p7846_p6) target bundleno = 7190 (0x1c16), region = 84 }
 0x216   : > { %s6941_s25 = sand.u32 (!%p7846_p6), 1, %s7847_s28   ;;  %p7849_p10 = scmp.ne.s32.totalorder (!%p7846_p6), %s7848_s15, 0 }
 0x217   : > { %s4436_s23 = sshll.u32 (!%p7846_p6), %s6941_s25, 4  ;;  %s850_s19 = scalar_lea.sflag (!%p7846_p6), [#allocation4], %s6941_s25 }
 0x218   : > { %s6945_s8 = scalar_lea.vmem [#allocation3], %s4436_s23 }
 0x219   : > { %6015 = dma.done.wait (%p7849_p10), %s850_s19, 256  }
 0x21a   : > { %6017 = vsyncadd (%p7849_p10), %s850_s19, 4294967040  ;;  %s7850_s4 = sld [smem:[#allocation49_spill]]  ;;  %s6955_s11 = scalar_lea.vmem [#allocation6], %s4436_s23 }
 0x220   : > { %s6952_s21 = sand.u32 1, %s7850_s4  }
 0x221   : > { %s859_s16 = scalar_lea.sflag [#allocation7], %s6952_s21 }
 0x222   : > { %6019 = dma.done.wait (%p7849_p10), %s859_s16, 256  }
 0x223   : > { %6021 = vsyncadd (%p7849_p10), %s859_s16, 4294967040  ;;  %s7851_s0 = sld [smem:[#allocation42_spill]]  ;;  %s7852_s17 = sld [smem:[#allocation55_spill]] }
 0x229   : > { %s6962_s27 = sand.u32 1, %s7851_s0   ;;  %p7853_p8 = scmp.ne.s32.totalorder %s7852_s17, 0 }
 0x22a   : > { %s4438_s20 = sshll.u32 %s6962_s27, 4 }
 0x22b   : > { %s6965_s18 = scalar_lea.vmem [#allocation8], %s4438_s20 }
 0x22c   : > { %6023 = dma.done.wait (%p7853_p8), %s859_s16, 256  }
 0x22d   : > { %6025 = vsyncadd (%p7853_p8), %s859_s16, 4294967040  ;;  %s4439_s3 = sshll.u32 %s6962_s27, 6  ;;  %s877_s6 = scalar_lea.sflag [#allocation10], %s6952_s21 }
 0x22e   : > { %s6973_s1 = scalar_lea.vmem [#allocation9], %s4439_s3 }
 0x22f   : > { %6027 = dma.done.wait (%p7853_p8), %s877_s6, 2048  }
 0x230   : > { %6029 = vsyncadd (%p7853_p8), %s877_s6, 4294965248  ;;  %s6979_s22 = scalar_lea.vmem [#allocation11], %s4439_s3  ;;  %s895_s24 = scalar_lea.sflag [#allocation13], %s6952_s21 }
 0x231   : > { %s6982_s28 = scalar_lea.vmem [#allocation12], %s4439_s3 }
 0x232   : > { %6031 = dma.done.wait (%p7853_p8), %s895_s24, 2048  }
 0x233   : > { %6033 = vsyncadd (%p7853_p8), %s895_s24, 4294965248  ;;  %s6988_s15 = scalar_lea.vmem [#allocation14], %s4439_s3  ;;  %s913_s23 = scalar_lea.sflag [#allocation16], %s6952_s21 }
 0x234   : > { %s6991_s19 = scalar_lea.vmem [#allocation15], %s4439_s3 }
 0x235   : > { %6035 = dma.done.wait (%p7853_p8), %s913_s23, 2048  }
 0x236   : > { %6037 = vsyncadd (%p7853_p8), %s913_s23, 4294965248  ;;  %s6997_s16 = scalar_lea.vmem [#allocation17], %s4439_s3  ;;  %s931_s0 = scalar_lea.sflag [#allocation19], %s6952_s21 }
 0x237   : > { %s7000_s20 = scalar_lea.vmem [#allocation18], %s4439_s3 }
 0x238   : > { %6039 = dma.done.wait (%p7853_p8), %s931_s0, 2048  }
 0x239   : > { %6041 = vsyncadd (%p7853_p8), %s931_s0, 4294965248  ;;  %s4447_s6 = sshll.u32 %s6962_s27, 8  ;;  %s7007_s24 = scalar_lea.vmem [#allocation20], %s4439_s3 }
 0x23a   : > { %s949_s2 = scalar_lea.sflag [#allocation22], %s6952_s21  ;;  %s7010_s23 = scalar_lea.vmem [#allocation21], %s4447_s6 }
 0x23b   : > { %6043 = dma.done.wait (%p7853_p8), %s949_s2, 8192  }
 0x23c   : > { %6045 = vsyncadd (%p7853_p8), %s949_s2, 4294959104  ;;  %s4449_s5 = sshll.u32 %s6962_s27, 2  ;;  %s7017_s7 = scalar_lea.vmem [#allocation23], %s4447_s6 }
 0x23d   : > { %s967_s0 = scalar_lea.sflag [#allocation25], %s6952_s21  ;;  %s7020_s9 = scalar_lea.vmem [#allocation24], %s4449_s5 }
 0x23e   : > { %6047 = dma.done.wait (%p7853_p8), %s967_s0, 64  }
 0x23f   : > { %6049 = vsyncadd (%p7853_p8), %s967_s0, 4294967232  ;;  %p7854_p7 = scmp.eq.s32.totalorder %s7850_s4, 0 }
 0x241   : > { %6051 = dma.done.wait (%p7854_p7), [#allocation25], 16   ;;  %p7855_p13 = pmov %p7854_p7 }
 0x242   : > { %p7856_p3 = pmov %p7854_p7 }
 0x243   : > { %6053 = vsyncadd (%p7855_p13), [#allocation25], 4294967280 }
 0x244   : > { %6055 = dma.done.wait (%p7856_p3), [#allocation28], 16   ;;  %p7857_p12 = pmov %p7856_p3 }
 0x245   : > { %s4452_s5 = sshll.u32 %s6941_s25, 3  ;;  %s7858_s21 = sld [smem:[#allocation46_spill]] }
 0x246   : > { %6057 = vsyncadd (%p7857_p12), [#allocation28], 4294967280  ;;  %s7035_s2 = scalar_lea.vmem [#allocation29], %s4452_s5 }
 0x24b   : > { %p4453_p0 = scmp.ne.s32.totalorder %s7858_s21, 0 }
 0x24c   : > { %v1100_v0 = vld [vmem:[%s6945_s8] sm:$0xff] (!%p4453_p0)  ;;  %v1101_v1 = vld [vmem:[%s6945_s8 + $0x8] sm:$0xff] (!%p4453_p0) }
 0x24d   : > { %1099 = sbr.rel (%p4453_p0) target bundleno = 596 (0x254), region = 152  ;;  %1104 = vst [vmem:[#allocation2] sm:$0xff] (!%p4453_p0), %v1100_v0  ;;  %1105 = vst [vmem:[#allocation2 + $0x8] sm:$0xff] (!%p4453_p0), %v1101_v1 }
 0x254 PF: > { %v1108_v2 = vld [vmem:[#allocation2] sm:$0xff]  ;;  %v1109_v3 = vld [vmem:[#allocation2 + $0x8] sm:$0xff]  ;;  %v5249_v4 = vld [vmem:[%s6973_s1] sm:$0xff]   ;;  %v6128_v7 = vmov 0.0   ;;  %vm6129_vm0 = vmmov 0   ;;  %v1139_v33 = vlaneseq  ;;  %vm1503_vm1 = vcmask 261120  }
 0x255   : > { %1116 = vadd.xlane.f32.xlu0 %v1108_v2  ;;  %v5250_v5 = vld [vmem:[%s6979_s22] sm:$0xff]   ;;  %v5251_v6 = vld [vmem:[%s6973_s1 + $0x8] sm:$0xff]   ;;  %4790 = vmatprep.subr.bf16.mxu0 %v6128_v7  ;;  %v5253_v17 = vld [vmem:[%s6973_s1 + $0x10] sm:$0xff]   ;;  %vm1553_vm3 = vcmask 130048   ;;  %s6130_s8 = smov 96   ;;  %s6131_s4 = smov 64  }
 0x256   : > { %4810 = vmatprep.subr.bf16.mxu1 %v6128_v7  ;;  %4791 = vmatpush3.bf16.msra.mxu0 %v5249_v4  ;;  %v5252_v16 = vld [vmem:[%s6979_s22 + $0x8] sm:$0xff]   ;;  %v5254_v18 = vld [vmem:[%s6979_s22 + $0x10] sm:$0xff]   ;;  %v5255_v19 = vld [vmem:[%s6973_s1 + $0x18] sm:$0xff]   ;;  %v7087_v36 = vshrl.u32 %v1139_v33, 7  ;;  %s6132_s17 = smov 32   ;;  %vm2019_vm5 = vcmask 523264  }
 0x257   : > { %4811 = vmatpush3.bf16.msra.mxu1 %v5250_v5  ;;  %4792 = vmatprep.subr.bf16.mxu0 %v6128_v7  ;;  %v5256_v20 = vld [vmem:[%s6979_s22 + $0x18] sm:$0xff]   ;;  %v5257_v21 = vld [vmem:[%s6973_s1 + $0x20] sm:$0xff]   ;;  %v5259_v23 = vld [vmem:[%s6973_s1 + $0x28] sm:$0xff]   ;;  %vm2022_vm6 = vcmask 785408  }
 0x258   : > { %4812 = vmatprep.subr.bf16.mxu1 %v6128_v7  ;;  %v5258_v22 = vld [vmem:[%s6979_s22 + $0x20] sm:$0xff]   ;;  %4806 = vmatprep.mubr.msk.bf16.mxu0 %vm6129_vm0, %v6128_v7  ;;  %v5260_v24 = vld [vmem:[%s6979_s22 + $0x28] sm:$0xff]   ;;  %v5261_v25 = vld [vmem:[%s6973_s1 + $0x30] sm:$0xff]   ;;  %v7090_v37 = vsub.s32 0, %v7087_v36  ;;  %v7099_v42 = vsub.s32 1, %v7087_v36  ;;  %v7127_v59 = vsub.s32 2, %v7087_v36 }
 0x259   : > { %1118 = vadd.xlane.f32.xlu0 %v1109_v3  ;;  %4826 = vmatprep.mubr.msk.bf16.mxu1 %vm6129_vm0, %v6128_v7  ;;  %v5262_v26 = vld [vmem:[%s6979_s22 + $0x30] sm:$0xff]   ;;  %v5263_v27 = vld [vmem:[%s6973_s1 + $0x38] sm:$0xff]   ;;  %v5265_v50 = vld [vmem:[%s6982_s28] sm:$0xff]  }
 0x25a   : > { %4793 = vmatpush3.bf16.msra.mxu0 %v5251_v6  ;;  %v5264_v28 = vld [vmem:[%s6979_s22 + $0x38] sm:$0xff]   ;;  %v7093_v38 = vld [vmem:[%s6965_s18] sm:$0xff]  ;;  %v5266_v52 = vld [vmem:[%s6982_s28 + $0x8] sm:$0xff]  }
 0x25b   : > { %4794 = vmatprep.subr.bf16.mxu0 %v6128_v7  ;;  %4813 = vmatpush3.bf16.msra.mxu1 %v5252_v16  ;;  %v1142_v41 = vrot.slane %v7093_v38, %v7090_v37  ;;  %v1148_v46 = vrot.slane %v7093_v38, %v7099_v42  ;;  %v5267_v53 = vld [vmem:[%s6982_s28 + $0x10] sm:$0xff]   ;;  %v5268_v54 = vld [vmem:[%s6982_s28 + $0x18] sm:$0xff]   ;;  %v5269_v55 = vld [vmem:[%s6982_s28 + $0x20] sm:$0xff]   ;;  %v1219_v60 = vrot.slane %v7093_v38, %v7127_v59 }
 0x25c   : > { %4814 = vmatprep.subr.bf16.mxu1 %v6128_v7  ;;  %v5270_v56 = vld [vmem:[%s6982_s28 + $0x28] sm:$0xff]   ;;  %v5271_v57 = vld [vmem:[%s6982_s28 + $0x30] sm:$0xff]   ;;  %v5272_v58 = vld [vmem:[%s6982_s28 + $0x38] sm:$0xff]  }
 0x25e   : > { %4795 = vmatpush3.bf16.msra.mxu0 %v5253_v17 }
 0x25f   : > { %4815 = vmatpush3.bf16.msra.mxu1 %v5254_v18  ;;  %4796 = vmatprep.subr.bf16.mxu0 %v6128_v7 }
 0x260   : > { %4816 = vmatprep.subr.bf16.mxu1 %v6128_v7 }
 0x262   : > { %4797 = vmatpush3.bf16.msra.mxu0 %v5255_v19 }
 0x263   : > { %4817 = vmatpush3.bf16.msra.mxu1 %v5256_v20  ;;  %4798 = vmatprep.subr.bf16.mxu0 %v6128_v7 }
 0x264   : > { %4818 = vmatprep.subr.bf16.mxu1 %v6128_v7 }
 0x266   : > { %4799 = vmatpush3.bf16.msra.mxu0 %v5257_v21 }
 0x267   : > { %4819 = vmatpush3.bf16.msra.mxu1 %v5258_v22  ;;  %4800 = vmatprep.subr.bf16.mxu0 %v6128_v7  ;;  %v7146_v22 = vand.u32 127, %v1139_v33 }
 0x268   : > { %4820 = vmatprep.subr.bf16.mxu1 %v6128_v7 }
 0x269   : > { %vm1501_vm2 = vcmp.le.s32.totalorder %v7146_v22, %v7087_v36 }
 0x26a   : > { %4801 = vmatpush3.bf16.msra.mxu0 %v5259_v23  ;;  %v7149_v23 = vadd.s32 8, %v7087_v36 }
 0x26b   : > { %4821 = vmatpush3.bf16.msra.mxu1 %v5260_v24  ;;  %4802 = vmatprep.subr.bf16.mxu0 %v6128_v7 }
 0x26c   : > { %4822 = vmatprep.subr.bf16.mxu1 %v6128_v7  ;;  %vm1502_vm4 = vcmp.le.s32.totalorder %v7146_v22, %v7149_v23 }
 0x26e   : > { %4803 = vmatpush3.bf16.msra.mxu0 %v5261_v25 }
 0x26f   : > { %4823 = vmatpush3.bf16.msra.mxu1 %v5262_v26  ;;  %4804 = vmatprep.subr.bf16.mxu0 %v6128_v7 }
 0x270   : > { %4824 = vmatprep.subr.bf16.mxu1 %v6128_v7 }
 0x272   : > { %4805 = vmatpush3.bf16.msra.mxu0 %v5263_v27 }
 0x273   : > { %4825 = vmatpush3.bf16.msra.mxu1 %v5264_v28  ;;  %4830 = vmatprep.subr.bf16.mxu0 %v6128_v7 }
 0x274   : > { %4850 = vmatprep.subr.bf16.mxu1 %v6128_v7 }
 0x2e2   : > { %v1117_v8 = vpop.xlane.xlu0 %1116 }
 0x2e3   : > { %v1121_v9 = vmul.f32 0.0078125, %v1117_v8 }
 0x2e5   : > { %v7048_v10 = vsub.f32 %v1108_v2, %v1121_v9 }
 0x2e6   : > { %v1119_v11 = vpop.xlane.xlu0 %1118 }
 0x2e7   : > { %v1122_v12 = vmul.f32 0.0078125, %v1119_v11  ;;  %v1125_v13 = vmul.f32 %v7048_v10, %v7048_v10 }
 0x2e9   : > { %v7052_v14 = vsub.f32 %v1109_v3, %v1122_v12  ;;  %1127 = vadd.xlane.f32.xlu1 %v1125_v13  ;;  %v7137_v13 = vsub.s32 3, %v7087_v36 }
 0x2eb   : > { %v1126_v15 = vmul.f32 %v7052_v14, %v7052_v14 }
 0x2ed   : > { %1129 = vadd.xlane.f32.xlu1 %v1126_v15 }
 0x376   : > { %v1128_v29 = vpop.xlane.xlu1 %1127 }
 0x377   : > { %v1131_v30 = vmul.f32 0.0078125, %v1128_v29 }
 0x379   : > { %v1133_v31 = vadd.f32 1e-05, %v1131_v30 }
 0x37a   : > { %v1130_v32 = vpop.xlane.xlu1 %1129 }
 0x37b   : > { %5395 = vrsqrt.f32 %v1133_v31  ;;  %v1132_v34 = vmul.f32 0.0078125, %v1130_v32 }
 0x37d   : > { %v1134_v35 = vadd.f32 1e-05, %v1132_v34 }
 0x37f   : > { %5397 = vrsqrt.f32 %v1134_v35 }
 0x385   : > { %v5396_v39 = vpop.eup %5395 }
 0x386   : > { %v1137_v40 = vmul.f32 %v5396_v39, %v7048_v10 }
 0x388   : > { %v1143_v45 = vmul.f32 %v1142_v41, %v1137_v40 }
 0x389   : > { %v5398_v43 = vpop.eup %5397 }
 0x38a   : > { %v1138_v44 = vmul.f32 %v5398_v43, %v7052_v14  ;;  %v1149_v48 = vadd.f32 %v1148_v46, %v1143_v45  ;;  %v1405_v14 = vrot.slane %v7093_v38, %v7137_v13 }
 0x38c   : > { %v1144_v47 = vmul.f32 %v1142_v41, %v1138_v44 }
 0x38e   : > { %v1150_v49 = vadd.f32 %v1148_v46, %v1144_v47 }
 0x390   : > { %v1151_v51 = vpack.c.bf16 %v1150_v49, %v1149_v48 }
 0x392   : > { %4807 = vmatmul.mubr.bf16.vlgmr.msra.gmra.mrb[0].mxu0 %v1151_v51  ;;  %4827 = vmatmul.mubr.bf16.vlgmr.msra.gmra.mrb[0].mxu1 %v1151_v51 }
 0x393   : > { %4831 = vmatpush3.bf16.msra.mxu0 %v5265_v50  ;;  %4846 = vmatprep.mubr.msk.bf16.mxu0 %vm6129_vm0, %v6128_v7 }
 0x394   : > { %4832 = vmatprep.subr.bf16.mxu0 %v6128_v7  ;;  %4852 = vmatprep.mubr.msk.bf16.mxu1 %vm6129_vm0, %v6128_v7 }
 0x397   : > { %4833 = vmatpush3.bf16.msra.mxu0 %v5266_v52 }
 0x398   : > { %4834 = vmatprep.subr.bf16.mxu0 %v6128_v7 }
 0x39b   : > { %4835 = vmatpush3.bf16.msra.mxu0 %v5267_v53 }
 0x39c   : > { %4836 = vmatprep.subr.bf16.mxu0 %v6128_v7 }
 0x39f   : > { %4837 = vmatpush3.bf16.msra.mxu0 %v5268_v54 }
 0x3a0   : > { %4838 = vmatprep.subr.bf16.mxu0 %v6128_v7 }
 0x3a3   : > { %4839 = vmatpush3.bf16.msra.mxu0 %v5269_v55 }
 0x3a4   : > { %4840 = vmatprep.subr.bf16.mxu0 %v6128_v7 }
 0x3a7   : > { %4841 = vmatpush3.bf16.msra.mxu0 %v5270_v56 }
 0x3a8   : > { %4842 = vmatprep.subr.bf16.mxu0 %v6128_v7 }
 0x3ab   : > { %4843 = vmatpush3.bf16.msra.mxu0 %v5271_v57 }
 0x3ac   : > { %4844 = vmatprep.subr.bf16.mxu0 %v6128_v7 }
 0x3af   : > { %4845 = vmatpush3.bf16.msra.mxu0 %v5272_v58 }
 0x3b0   : > { %4874 = vmatprep.subr.bf16.mxu0 %v6128_v7 }
 0x3b2   : > { %4847 = vmatmul.mubr.bf16.vlgmr.msra.gmra.mrb[4].mxu0 %v1151_v51 }
 0x3b3   : > { %4876 = vmatprep.mubr.msk.bf16.mxu0 %vm6129_vm0, %v6128_v7 }
 0x465   : > { %v1302_v61 = vpop.f32.mrb[0].mxu0  ;;  %v1394_v62 = vpop.f32.mrb[0].mxu1 }
 0x466   : > { %v1303_v63 = vadd.f32 %v1302_v61, %v1219_v60  ;;  %v4808_v0 = vpop.f32.mrb[1].mxu0  ;;  %v4828_v1 = vpop.f32.mrb[1].mxu1 }
 0x467   : > { %v1305_v2 = vpop.f32.mrb[2].mxu0  ;;  %v1397_v3 = vpop.f32.mrb[2].mxu1 }
 0x468   : > { %v1306_v4 = vadd.f32 %v1305_v2, %v1219_v60  ;;  %v1401_v5 = vpack.c.bf16 %v1397_v3, %v1394_v62  ;;  %v4809_v6 = vpop.f32.mrb[3].mxu0  ;;  %v4829_v8 = vpop.f32.mrb[3].mxu1  ;;  %v1309_v9 = vmul.f32 0.17677669, %v1303_v63 }
 0x46a   : > { %v1310_v10 = vmul.f32 0.17677669, %v1306_v4  ;;  %v1508_v11 = vsel %vm1503_vm1, %v1401_v5, 0 }
 0x46b   : > { %4851 = vmatpush3.bf16.xpose.msra.mxu1 %v1508_v11 }
 0x46c   : > { %v1311_v12 = vpack.c.bf16 %v1310_v10, %v1309_v9  ;;  %4856 = vmatprep.subr.bf16.mxu1 %v6128_v7 }
 0x472   : > { %4853 = vmatmul.mubr.msk.bf16.vlgmr.msra.gmra.mrb[4].mxu1 %vm1503_vm1, %v1311_v12 }
 0x473   : > { %4858 = vmatprep.mubr.msk.bf16.mxu1 %vm6129_vm0, %v6128_v7 }
 0x485   : > { %v1488_v15 = vpop.f32.mrb[4].mxu0 }
 0x486   : > { %v4848_v16 = vpop.f32.mrb[5].mxu0  ;;  %v1489_v18 = vadd.f32 %v1488_v15, %v1405_v14 }
 0x487   : > { %v1491_v17 = vpop.f32.mrb[6].mxu0 }
 0x488   : > { %v1492_v19 = vadd.f32 %v1491_v17, %v1405_v14  ;;  %v4849_v20 = vpop.f32.mrb[7].mxu0 }
 0x48a   : > { %v7141_v21 = vpack.c.bf16 %v1492_v19, %v1489_v18 }
 0x48c   : > { %4857 = vmatpush3.bf16.msra.mxu1 %v7141_v21 }
 0x48d   : > { %4862 = vmatprep.subr.bf16.mxu1 %v6128_v7 }
 0x545   : > { %v1544_v24 = vpop.f32.mrb[4].mxu1 }
 0x546   : > { %v1551_v25 = vsel %vm1501_vm2, %v1544_v24, -inf  ;;  %v4854_v26 = vpop.f32.mrb[5].mxu1 }
 0x547   : > { %v1547_v27 = vpop.f32.mrb[6].mxu1  ;;  %v1554_v28 = vsel %vm1553_vm3, %v1551_v25, -inf }
 0x548   : > { %v1552_v29 = vsel %vm1502_vm4, %v1547_v27, -inf  ;;  %1555 = vmax.xlane.f32.xlu0 %v1554_v28  ;;  %v4855_v30 = vpop.f32.mrb[7].mxu1 }
 0x549   : > { %v1557_v31 = vsel %vm1553_vm3, %v1552_v29, -inf }
 0x54a   : > { %1558 = vmax.xlane.f32.xlu1 %v1557_v31 }
 0x5d5   : > { %v1556_v32 = vpop.xlane.xlu0 %1555 }
 0x5d6   : > { %v1560_v33 = vsub.f32 %v1551_v25, %v1556_v32 }
 0x5d7   : > { %v1559_v34 = vpop.xlane.xlu1 %1558 }
 0x5d8   : > { %v1562_v35 = vmul.f32 1.442695, %v1560_v33  ;;  %v1561_v39 = vsub.f32 %v1552_v29, %v1559_v34 }
 0x5da   : > { %5399 = vpow2.f32 %v1562_v35  ;;  %v1564_v40 = vmul.f32 1.442695, %v1561_v39 }
 0x5dc   : > { %5401 = vpow2.f32 %v1564_v40 }
 0x5e4   : > { %v5400_v41 = vpop.eup %5399 }
 0x5e5   : > { %v1566_v43 = vsel %vm1553_vm3, %v5400_v41, 0.0 }
 0x5e6   : > { %v5402_v44 = vpop.eup %5401  ;;  %1567 = vadd.xlane.f32.xlu0 %v1566_v43 }
 0x5e7   : > { %v1569_v45 = vsel %vm1553_vm3, %v5402_v44, 0.0 }
 0x5e8   : > { %1570 = vadd.xlane.f32.xlu1 %v1569_v45 }
 0x5f9   : > { %1622 = vrot.lane.b32.xlu1 %v1311_v12, %s6130_s8 }
 0x5fc   : > { %1625 = vrot.lane.b32.xlu0 %v1401_v5, %s6130_s8 }
 0x5fd   : > { %1749 = vrot.lane.b32.xlu1 %v1401_v5, %s6131_s4 }
 0x600   : > { %1872 = vrot.lane.b32.xlu0 %v1401_v5, %s6132_s17 }
 0x601   : > { %1747 = vrot.lane.b32.xlu1 %v1311_v12, %s6131_s4 }
 0x605   : > { %1870 = vrot.lane.b32.xlu1 %v1311_v12, %s6132_s17 }
 0x673   : > { %v1568_v46 = vpop.xlane.xlu0 %1567 }
 0x674   : > { %5403 = vrcp.f32 %v1568_v46 }
 0x675   : > { %v1571_v47 = vpop.xlane.xlu1 %1570 }
 0x676   : > { %5405 = vrcp.f32 %v1571_v47 }
 0x677   : > { %v1626_v49 = vpop.permute.xlu0 %1625 }
 0x678   : > { %v1631_v58 = vsel %vm1503_vm1, %v1626_v49, 0 }
 0x679   : > { %v1623_v48 = vpop.permute.xlu1 %1622 }
 0x67b   : > { %v1873_v56 = vpop.permute.xlu0 %1872 }
 0x67c   : > { %v1878_v61 = vsel %vm1503_vm1, %v1873_v56, 0 }
 0x67d   : > { %v1750_v50 = vpop.permute.xlu1 %1749 }
 0x67e   : > { %v5404_v51 = vpop.eup %5403  ;;  %v1755_v52 = vsel %vm1503_vm1, %v1750_v50, 0 }
 0x67f   : > { %4875 = vmatpush3.bf16.xpose.msra.mxu0 %v1755_v52  ;;  %v1573_v54 = vmul.f32 %v5404_v51, %v5400_v41 }
 0x680   : > { %v5406_v53 = vpop.eup %5405  ;;  %4886 = vmatprep.subr.bf16.mxu0 %v6128_v7 }
 0x681   : > { %v1575_v55 = vmul.f32 %v5406_v53, %v5402_v44  ;;  %v1748_v60 = vpop.permute.xlu1 %1747 }
 0x683   : > { %v1576_v57 = vpack.c.bf16 %v1575_v55, %v1573_v54 }
 0x685   : > { %4859 = vmatmul.mubr.msk.bf16.vlgmr.msra.gmra.mrb[8].mxu1 %vm1553_vm3, %v1576_v57  ;;  %v1871_v62 = vpop.permute.xlu1 %1870 }
 0x686   : > { %4863 = vmatpush3.bf16.xpose.msra.mxu1 %v1631_v58  ;;  %4877 = vmatmul.mubr.msk.bf16.vlgmr.msra.gmra.mrb[8].mxu0 %vm1503_vm1, %v1748_v60 }
 0x687   : > { %4887 = vmatpush3.bf16.xpose.msra.mxu0 %v1878_v61  ;;  %4864 = vmatprep.mubr.msk.bf16.mxu1 %vm6129_vm0, %v6128_v7 }
 0x688   : > { %4888 = vmatprep.mubr.msk.bf16.mxu0 %vm6129_vm0, %v6128_v7  ;;  %4868 = vmatprep.subr.bf16.mxu1 %v6128_v7 }
 0x689   : > { %4898 = vmatprep.subr.bf16.mxu0 %v6128_v7 }
 0x68d   : > { %4865 = vmatmul.mubr.msk.bf16.vlgmr.msra.gmra.mrb[12].mxu1 %vm1503_vm1, %v1623_v48 }
 0x68e   : > { %4889 = vmatmul.mubr.msk.bf16.vlgmr.msra.gmra.mrb[12].mxu0 %vm1503_vm1, %v1871_v62  ;;  %4870 = vmatprep.mubr.msk.bf16.mxu1 %vm6129_vm0, %v6128_v7 }
 0x68f   : > { %4914 = vmatprep.mubr.msk.bf16.mxu0 %vm6129_vm0, %v6128_v7 }
 0x758   : > { %v7189_v63 = vpop.f32.mrb[8].mxu1 }
 0x759   : > { %v4860_v0 = vpop.f32.mrb[9].mxu1  ;;  %v1791_v1 = vpop.f32.mrb[8].mxu0 }
 0x75a   : > { %v7191_v2 = vpop.f32.mrb[10].mxu1  ;;  %v4878_v3 = vpop.f32.mrb[9].mxu0  ;;  %v1798_v16 = vsel %vm1501_vm2, %v1791_v1, -inf }
 0x75b   : > { %v4861_v4 = vpop.f32.mrb[11].mxu1  ;;  %v1794_v5 = vpop.f32.mrb[10].mxu0  ;;  %v1800_v26 = vsel %vm1553_vm3, %v1798_v16, -inf }
 0x75c   : > { %v4879_v6 = vpop.f32.mrb[11].mxu0  ;;  %v1799_v27 = vsel %vm1502_vm4, %v1794_v5, -inf }
 0x75d   : > { %v1803_v29 = vsel %vm1553_vm3, %v1799_v27, -inf }
 0x760   : > { %v1667_v8 = vpop.f32.mrb[12].mxu1 }
 0x761   : > { %v1674_v9 = vsel %vm1501_vm2, %v1667_v8, -inf  ;;  %v4866_v10 = vpop.f32.mrb[13].mxu1  ;;  %v1914_v11 = vpop.f32.mrb[12].mxu0 }
 0x762   : > { %v1670_v12 = vpop.f32.mrb[14].mxu1  ;;  %v4890_v14 = vpop.f32.mrb[13].mxu0  ;;  %v1676_v15 = vsel %vm1553_vm3, %v1674_v9, -inf  ;;  %v1921_v30 = vsel %vm1501_vm2, %v1914_v11, -inf }
 0x763   : > { %v1675_v17 = vsel %vm1502_vm4, %v1670_v12, -inf  ;;  %1677 = vmax.xlane.f32.xlu0 %v1676_v15  ;;  %v4867_v18 = vpop.f32.mrb[15].mxu1  ;;  %v1917_v19 = vpop.f32.mrb[14].mxu0  ;;  %v1923_v31 = vsel %vm1553_vm3, %v1921_v30, -inf }
 0x764   : > { %v4891_v20 = vpop.f32.mrb[15].mxu0  ;;  %v1679_v24 = vsel %vm1553_vm3, %v1675_v17, -inf  ;;  %v1922_v25 = vsel %vm1502_vm4, %v1917_v19, -inf }
 0x765   : > { %1680 = vmax.xlane.f32.xlu1 %v1679_v24  ;;  %v1926_v28 = vsel %vm1553_vm3, %v1922_v25, -inf }
 0x767   : > { %1801 = vmax.xlane.f32.xlu0 %v1800_v26 }
 0x769   : > { %1927 = vmax.xlane.f32.xlu1 %v1926_v28 }
 0x76b   : > { %1804 = vmax.xlane.f32.xlu0 %v1803_v29 }
 0x76f   : > { %1924 = vmax.xlane.f32.xlu0 %v1923_v31  ;;  %v5273_v31 = vld [vmem:[%s6988_s15] sm:$0xff]  }
 0x770   : > { %4899 = vmatpush3.bf16.msra.mxu0 %v5273_v31  ;;  %v5286_v31 = vld [vmem:[%s6997_s16 + $0x28] sm:$0xff]  }
 0x771   : > { %4900 = vmatprep.subr.bf16.mxu0 %v6128_v7 }
 0x7f0   : > { %v1678_v32 = vpop.xlane.xlu0 %1677 }
 0x7f1   : > { %v1682_v44 = vsub.f32 %v1674_v9, %v1678_v32  ;;  %v5274_v32 = vld [vmem:[%s6988_s15 + $0x8] sm:$0xff]  }
 0x7f2   : > { %v1681_v33 = vpop.xlane.xlu1 %1680  ;;  %4901 = vmatpush3.bf16.msra.mxu0 %v5274_v32  ;;  %v5288_v32 = vld [vmem:[%s6997_s16 + $0x30] sm:$0xff]  }
 0x7f3   : > { %v1683_v45 = vsub.f32 %v1675_v17, %v1681_v33  ;;  %v1684_v49 = vmul.f32 1.442695, %v1682_v44  ;;  %v5275_v33 = vld [vmem:[%s6988_s15 + $0x10] sm:$0xff]   ;;  %4902 = vmatprep.subr.bf16.mxu0 %v6128_v7 }
 0x7f4   : > { %v1802_v34 = vpop.xlane.xlu0 %1801 }
 0x7f5   : > { %v1806_v35 = vsub.f32 %v1798_v16, %v1802_v34  ;;  %v1686_v50 = vmul.f32 1.442695, %v1683_v45  ;;  %v5276_v34 = vld [vmem:[%s6988_s15 + $0x18] sm:$0xff]   ;;  %v5279_v45 = vld [vmem:[%s6988_s15 + $0x30] sm:$0xff]  }
 0x7f6   : > { %v1928_v23 = vpop.xlane.xlu1 %1927  ;;  %4903 = vmatpush3.bf16.msra.mxu0 %v5275_v33 }
 0x7f7   : > { %v1808_v39 = vmul.f32 1.442695, %v1806_v35  ;;  %v1930_v40 = vsub.f32 %v1922_v25, %v1928_v23  ;;  %4904 = vmatprep.subr.bf16.mxu0 %v6128_v7  ;;  %v5277_v35 = vld [vmem:[%s6988_s15 + $0x20] sm:$0xff]  }
 0x7f8   : > { %v1805_v41 = vpop.xlane.xlu0 %1804 }
 0x7f9   : > { %5407 = vpow2.f32 %v1808_v39  ;;  %v1807_v43 = vsub.f32 %v1799_v27, %v1805_v41  ;;  %v1933_v46 = vmul.f32 1.442695, %v1930_v40  ;;  %v5278_v40 = vld [vmem:[%s6988_s15 + $0x28] sm:$0xff]  }
 0x7fa   : > { %4905 = vmatpush3.bf16.msra.mxu0 %v5276_v34 }
 0x7fb   : > { %v1810_v47 = vmul.f32 1.442695, %v1807_v43  ;;  %4906 = vmatprep.subr.bf16.mxu0 %v6128_v7 }
 0x7fc   : > { %v1925_v22 = vpop.xlane.xlu0 %1924 }
 0x7fd   : > { %5409 = vpow2.f32 %v1810_v47  ;;  %v1929_v48 = vsub.f32 %v1921_v30, %v1925_v22  ;;  %v5280_v22 = vld [vmem:[%s6988_s15 + $0x38] sm:$0xff]  }
 0x7fe   : > { %5411 = vpow2.f32 %v1933_v46  ;;  %4907 = vmatpush3.bf16.msra.mxu0 %v5277_v35 }
 0x7ff   : > { %v1931_v51 = vmul.f32 1.442695, %v1929_v48  ;;  %4908 = vmatprep.subr.bf16.mxu0 %v6128_v7 }
 0x801   : > { %5413 = vpow2.f32 %v1931_v51 }
 0x802   : > { %5415 = vpow2.f32 %v1684_v49  ;;  %4909 = vmatpush3.bf16.msra.mxu0 %v5278_v40 }
 0x803   : > { %v5408_v52 = vpop.eup %5407  ;;  %5417 = vpow2.f32 %v1686_v50  ;;  %4910 = vmatprep.subr.bf16.mxu0 %v6128_v7 }
 0x804   : > { %v1812_v53 = vsel %vm1553_vm3, %v5408_v52, 0.0 }
 0x805   : > { %1813 = vadd.xlane.f32.xlu0 %v1812_v53 }
 0x806   : > { %4911 = vmatpush3.bf16.msra.mxu0 %v5279_v45  ;;  %v5289_v45 = vld [vmem:[%s6991_s19 + $0x8] sm:$0xff]  }
 0x807   : > { %v5410_v54 = vpop.eup %5409  ;;  %4912 = vmatprep.subr.bf16.mxu0 %v6128_v7 }
 0x808   : > { %v1815_v55 = vsel %vm1553_vm3, %v5410_v54, 0.0  ;;  %v5412_v56 = vpop.eup %5411 }
 0x809   : > { %1816 = vadd.xlane.f32.xlu1 %v1815_v55  ;;  %v1938_v61 = vsel %vm1553_vm3, %v5412_v56, 0.0 }
 0x80a   : > { %4913 = vmatpush3.bf16.msra.mxu0 %v5280_v22  ;;  %v5292_v22 = vld [vmem:[%s6991_s19 + $0x10] sm:$0xff]  }
 0x80b   : > { %v5414_v57 = vpop.eup %5413 }
 0x80c   : > { %v5416_v58 = vpop.eup %5415  ;;  %v1935_v60 = vsel %vm1553_vm3, %v5414_v57, 0.0 }
 0x80d   : > { %v5418_v62 = vpop.eup %5417  ;;  %1936 = vadd.xlane.f32.xlu0 %v1935_v60  ;;  %1939 = vadd.xlane.f32.xlu1 %v1938_v61  ;;  %v1688_v0 = vsel %vm1553_vm3, %v5416_v58, 0.0 }
 0x80e   : > { %v1691_v1 = vsel %vm1553_vm3, %v5418_v62, 0.0 }
 0x811   : > { %1689 = vadd.xlane.f32.xlu0 %v1688_v0  ;;  %1692 = vadd.xlane.f32.xlu1 %v1691_v1 }
 0x822   : > { %1823 = vrot.lane.b32.xlu1 %v7141_v21, %s6131_s4 }
 0x826   : > { %1946 = vrot.lane.b32.xlu1 %v7141_v21, %s6132_s17 }
 0x827   : > { %1700 = vrot.lane.b32.xlu0 %v7141_v21, %s6130_s8 }
 0x892   : > { %v1814_v3 = vpop.xlane.xlu0 %1813 }
 0x896   : > { %v1817_v4 = vpop.xlane.xlu1 %1816 }
 0x89a   : > { %v1937_v5 = vpop.xlane.xlu0 %1936  ;;  %v1940_v6 = vpop.xlane.xlu1 %1939 }
 0x89e   : > { %v1690_v8 = vpop.xlane.xlu0 %1689  ;;  %v1693_v9 = vpop.xlane.xlu1 %1692 }
 0x89f   : > { %5419 = vrcp.f32 %v1690_v8 }
 0x8a0   : > { %5421 = vrcp.f32 %v1693_v9 }
 0x8a1   : > { %5423 = vrcp.f32 %v1817_v4 }
 0x8a2   : > { %v1701_v10 = vpop.permute.xlu0 %1700  ;;  %5425 = vrcp.f32 %v1814_v3  ;;  %v1824_v17 = vpop.permute.xlu1 %1823 }
 0x8a3   : > { %4869 = vmatpush3.bf16.msra.mxu1 %v1701_v10  ;;  %5427 = vrcp.f32 %v1937_v5 }
 0x8a4   : > { %4880 = vmatprep.subr.bf16.mxu1 %v6128_v7  ;;  %5429 = vrcp.f32 %v1940_v6 }
 0x8a6   : > { %v1947_v27 = vpop.permute.xlu1 %1946 }
 0x8a9   : > { %v5420_v11 = vpop.eup %5419 }
 0x8aa   : > { %v5422_v12 = vpop.eup %5421  ;;  %v1695_v14 = vmul.f32 %v5420_v11, %v5416_v58 }
 0x8ab   : > { %v1697_v15 = vmul.f32 %v5422_v12, %v5418_v62  ;;  %v5424_v16 = vpop.eup %5423  ;;  %v2028_v12 = vsub.s32 4, %v7087_v36 }
 0x8ac   : > { %v5426_v18 = vpop.eup %5425  ;;  %v1821_v19 = vmul.f32 %v5424_v16, %v5410_v54  ;;  %v5487_v16 = vld [vmem:[#allocation2] sm:$0xff] }
 0x8ad   : > { %v1698_v21 = vpack.c.bf16 %v1697_v15, %v1695_v14  ;;  %v1819_v20 = vmul.f32 %v5426_v18, %v5408_v52  ;;  %v5428_v24 = vpop.eup %5427 }
 0x8ae   : > { %v5430_v26 = vpop.eup %5429  ;;  %v1942_v28 = vmul.f32 %v5428_v24, %v5414_v57 }
 0x8af   : > { %4871 = vmatmul.mubr.msk.bf16.vlgmr.msra.gmra.mrb[16].mxu1 %vm1553_vm3, %v1698_v21  ;;  %v1822_v25 = vpack.c.bf16 %v1821_v19, %v1819_v20  ;;  %v1944_v29 = vmul.f32 %v5430_v26, %v5412_v56  ;;  %v5488_v20 = vld [vmem:[#allocation2 + $0x8] sm:$0xff]  ;;  %v5282_v26 = vld [vmem:[%s6997_s16 + $0x8] sm:$0xff]  }
 0x8b0   : > { %4881 = vmatpush3.bf16.msra.mxu1 %v1824_v17  ;;  %4882 = vmatprep.mubr.msk.bf16.mxu1 %vm6129_vm0, %v6128_v7 }
 0x8b1   : > { %4892 = vmatprep.subr.bf16.mxu1 %v6128_v7  ;;  %v1945_v30 = vpack.c.bf16 %v1944_v29, %v1942_v28  ;;  %v5283_v28 = vld [vmem:[%s6997_s16 + $0x10] sm:$0xff]   ;;  %v5284_v29 = vld [vmem:[%s6997_s16 + $0x18] sm:$0xff]  }
 0x8b7   : > { %4883 = vmatmul.mubr.msk.bf16.vlgmr.msra.gmra.mrb[20].mxu1 %vm1553_vm3, %v1822_v25  ;;  %v5281_v25 = vld [vmem:[%s6997_s16] sm:$0xff]  }
 0x8b8   : > { %4893 = vmatpush3.bf16.msra.mxu1 %v1947_v27  ;;  %4894 = vmatprep.mubr.msk.bf16.mxu1 %vm6129_vm0, %v6128_v7  ;;  %v5287_v27 = vld [vmem:[%s6991_s19] sm:$0xff]  }
 0x8b9   : > { %4918 = vmatprep.subr.bf16.mxu1 %v6128_v7  ;;  %4938 = vmatprep.subr.bf16.mxu0 %v5281_v25 }
 0x8bf   : > { %4895 = vmatmul.mubr.msk.bf16.vlgmr.msra.gmra.mrb[24].mxu1 %vm1553_vm3, %v1945_v30  ;;  %v5285_v30 = vld [vmem:[%s6997_s16 + $0x20] sm:$0xff]  }
 0x8c0   : > { %4934 = vmatprep.mubr.msk.bf16.mxu1 %vm6129_vm0, %v6128_v7  ;;  %4919 = vmatpush3.bf16.msra.mxu1 %v5287_v27 }
 0x8c1   : > { %4920 = vmatprep.subr.bf16.mxu1 %v6128_v7 }
 0x8c4   : > { %4921 = vmatpush3.bf16.msra.mxu1 %v5289_v45 }
 0x8c5   : > { %4922 = vmatprep.subr.bf16.mxu1 %v6128_v7 }
 0x8c8   : > { %4923 = vmatpush3.bf16.msra.mxu1 %v5292_v22 }
 0x8c9   : > { %4924 = vmatprep.subr.bf16.mxu1 %v6128_v7 }
 0x982   : > { %v1740_v23 = vpop.f32.mrb[16].mxu1 }
 0x983   : > { %v4872_v39 = vpop.f32.mrb[17].mxu1 }
 0x984   : > { %v1743_v41 = vpop.f32.mrb[18].mxu1 }
 0x985   : > { %v5219_v43 = vpack.i.bf16 %v1743_v41, %v1740_v23  ;;  %v4873_v44 = vpop.f32.mrb[19].mxu1 }
 0x986   : > { %v5290_v44 = vld [vmem:[%s6997_s16 + $0x38] sm:$0xff]  }
 0x987   : > { %5220 = vrot.lane.b32.xlu1 %v5219_v43, %s6132_s17 }
 0x98a   : > { %v1863_v46 = vpop.f32.mrb[20].mxu1 }
 0x98b   : > { %v4884_v47 = vpop.f32.mrb[21].mxu1 }
 0x98c   : > { %v1866_v48 = vpop.f32.mrb[22].mxu1  ;;  %v7293_v47 = vld [vmem:[%s6955_s11 + $0x8] sm:$0xff]  }
 0x98d   : > { %v5224_v49 = vpack.i.bf16 %v1866_v48, %v1863_v46  ;;  %v4885_v50 = vpop.f32.mrb[23].mxu1  ;;  %v5291_v46 = vld [vmem:[%s6955_s11] sm:$0xff]   ;;  %v5294_v48 = vld [vmem:[%s6991_s19 + $0x18] sm:$0xff]  }
 0x98e   : > { %4925 = vmatpush3.bf16.msra.mxu1 %v5294_v48  ;;  %v5296_v50 = vld [vmem:[%s6991_s19 + $0x28] sm:$0xff]  }
 0x98f   : > { %5225 = vrot.lane.b32.xlu0 %v5224_v49, %s6131_s4  ;;  %4926 = vmatprep.subr.bf16.mxu1 %v6128_v7  ;;  %v5295_v49 = vld [vmem:[%s6991_s19 + $0x20] sm:$0xff]  }
 0x992   : > { %v1986_v51 = vpop.f32.mrb[24].mxu1  ;;  %4927 = vmatpush3.bf16.msra.mxu1 %v5295_v49 }
 0x993   : > { %v4896_v52 = vpop.f32.mrb[25].mxu1  ;;  %4928 = vmatprep.subr.bf16.mxu1 %v6128_v7 }
 0x994   : > { %v1989_v53 = vpop.f32.mrb[26].mxu1  ;;  %v5298_v52 = vld [vmem:[%s6991_s19 + $0x38] sm:$0xff]  }
 0x995   : > { %v5229_v54 = vpack.i.bf16 %v1989_v53, %v1986_v51  ;;  %v4897_v55 = vpop.f32.mrb[27].mxu1  ;;  %v5297_v51 = vld [vmem:[%s6991_s19 + $0x30] sm:$0xff]   ;;  %v5299_v53 = vld [vmem:[%s7000_s20] sm:$0xff]  }
 0x996   : > { %4929 = vmatpush3.bf16.msra.mxu1 %v5296_v50 }
 0x997   : > { %5230 = vrot.lane.b32.xlu1 %v5229_v54, %s6130_s8  ;;  %4930 = vmatprep.subr.bf16.mxu1 %v6128_v7 }
 0x99a   : > { %4931 = vmatpush3.bf16.msra.mxu1 %v5297_v51 }
 0x99b   : > { %4932 = vmatprep.subr.bf16.mxu1 %v6128_v7 }
 0x99e   : > { %4933 = vmatpush3.bf16.msra.mxu1 %v5298_v52 }
 0x99f   : > { %4958 = vmatprep.subr.bf16.mxu1 %v5299_v53 }
 0x9f9   : > { %v5221_v56 = vpop.permute.xlu1 %5220 }
 0x9fa   : > { %v5223_v58 = vunpack.i.h.bf16 %v5221_v56  ;;  %v5222_v60 = vunpack.i.l.bf16 %v5221_v56 }
 0x9fc   : > { %v2018_v1 = vsel %vm1503_vm1, %v7191_v2, %v5223_v58  ;;  %v2017_v3 = vsel %vm1503_vm1, %v7189_v63, %v5222_v60  ;;  %v2029_v63 = vrot.slane %v7093_v38, %v2028_v12 }
 0xa01   : > { %v5226_v57 = vpop.permute.xlu0 %5225 }
 0xa02   : > { %v5228_v61 = vunpack.i.h.bf16 %v5226_v57  ;;  %v5227_v62 = vunpack.i.l.bf16 %v5226_v57 }
 0xa04   : > { %v2020_v6 = vsel %vm2019_vm5, %v2017_v3, %v5227_v62  ;;  %v2021_v8 = vsel %vm2019_vm5, %v2018_v1, %v5228_v61  ;;  %v2145_v61 = vsub.s32 5, %v7087_v36  ;;  %v2151_v3 = vsub.s32 6, %v7087_v36 }
 0xa06   : > { %v2146_v1 = vrot.slane %v7093_v38, %v2145_v61 }
 0xa09   : > { %v5231_v0 = vpop.permute.xlu1 %5230 }
 0xa0a   : > { %v5233_v4 = vunpack.i.h.bf16 %v5231_v0  ;;  %v5232_v5 = vunpack.i.l.bf16 %v5231_v0 }
 0xa0c   : > { %v2023_v9 = vsel %vm2022_vm6, %v2020_v6, %v5232_v5  ;;  %v2024_v10 = vsel %vm2022_vm6, %v2021_v8, %v5233_v4  ;;  %v2152_v8 = vrot.slane %v7093_v38, %v2151_v3 }
 0xa0d   : > { %v2025_v11 = vpack.c.bf16 %v2024_v10, %v2023_v9 }
 0xa0f   : > { %4915 = vmatmul.mubr.bf16.vlgmr.msra.gmra.mrb[16].mxu0 %v2025_v11 }
 0xa10   : > { %4939 = vmatpush3.bf16.msra.mxu0 %v5281_v25  ;;  %4954 = vmatprep.mubr.bf16.mxu0 %v5291_v46 }
 0xa11   : > { %4940 = vmatprep.subr.bf16.mxu0 %v5282_v26 }
 0xa14   : > { %4941 = vmatpush3.bf16.msra.mxu0 %v5282_v26 }
 0xa15   : > { %4942 = vmatprep.subr.bf16.mxu0 %v5283_v28 }
 0xa18   : > { %4943 = vmatpush3.bf16.msra.mxu0 %v5283_v28 }
 0xa19   : > { %4944 = vmatprep.subr.bf16.mxu0 %v5284_v29 }
 0xa1c   : > { %4945 = vmatpush3.bf16.msra.mxu0 %v5284_v29 }
 0xa1d   : > { %4946 = vmatprep.subr.bf16.mxu0 %v5285_v30 }
 0xa20   : > { %4947 = vmatpush3.bf16.msra.mxu0 %v5285_v30 }
 0xa21   : > { %4948 = vmatprep.subr.bf16.mxu0 %v5286_v31 }
 0xa24   : > { %4949 = vmatpush3.bf16.msra.mxu0 %v5286_v31 }
 0xa25   : > { %4950 = vmatprep.subr.bf16.mxu0 %v5288_v32 }
 0xa28   : > { %4951 = vmatpush3.bf16.msra.mxu0 %v5288_v32  ;;  %v2222_v32 = vsub.s32 7, %v7087_v36 }
 0xa29   : > { %4952 = vmatprep.subr.bf16.mxu0 %v5290_v44 }
 0xa2c   : > { %4953 = vmatpush3.bf16.msra.mxu0 %v5290_v44 }
 0xa2d   : > { %5002 = vmatprep.subr.bf16.mxu0 %v6128_v7 }
 0xa2f   : > { %4955 = vmatmul.mubr.bf16.vlgmr.msra.gmra.mrb[20].mxu0 %v7293_v47 }
 0xa30   : > { %5006 = vmatprep.mubr.msk.bf16.mxu0 %vm6129_vm0, %v6128_v7 }
 0xae2   : > { %v2112_v2 = vpop.f32.mrb[16].mxu0 }
 0xae3   : > { %v2113_v14 = vadd.f32 %v2112_v2, %v2029_v63  ;;  %v4916_v15 = vpop.f32.mrb[17].mxu0  ;;  %v5300_v2 = vld [vmem:[%s7000_s20 + $0x8] sm:$0xff]  }
 0xae4   : > { %v2115_v21 = vpop.f32.mrb[18].mxu0  ;;  %v5302_v15 = vld [vmem:[%s7000_s20 + $0x18] sm:$0xff]  }
 0xae5   : > { %v7271_v17 = vadd.f32 %v5487_v16, %v2113_v14  ;;  %v2116_v18 = vadd.f32 %v2115_v21, %v2029_v63  ;;  %v4917_v19 = vpop.f32.mrb[19].mxu0  ;;  %v5301_v14 = vld [vmem:[%s7000_s20 + $0x10] sm:$0xff]   ;;  %v5303_v21 = vld [vmem:[%s7000_s20 + $0x20] sm:$0xff]   ;;  %v5304_v16 = vld [vmem:[%s7000_s20 + $0x28] sm:$0xff]  }
 0xae6   : > { %v5306_v19 = vld [vmem:[%s7000_s20 + $0x38] sm:$0xff]  }
 0xae7   : > { %v7273_v24 = vadd.f32 %v5488_v20, %v2116_v18  ;;  %2121 = vadd.xlane.f32.xlu0 %v7271_v17  ;;  %v5305_v18 = vld [vmem:[%s7000_s20 + $0x30] sm:$0xff]  }
 0xae9   : > { %2123 = vadd.xlane.f32.xlu1 %v7273_v24 }
 0xb02   : > { %v4956_v20 = vpop.f32.mrb[20].mxu0 }
 0xb03   : > { %v2410_v25 = vpop.f32.mrb[21].mxu0 }
 0xb04   : > { %v4957_v26 = vpop.f32.mrb[22].mxu0 }
 0xb05   : > { %v7326_v27 = vpack.c.bf16 %v4957_v26, %v4956_v20  ;;  %v2413_v28 = vpop.f32.mrb[23].mxu0 }
 0xb06   : > { %v7328_v29 = vpack.c.bf16 %v2413_v28, %v2410_v25 }
 0xb07   : > { %v2537_v31 = vsel %vm1503_vm1, %v7326_v27, 0 }
 0xb08   : > { %v2534_v30 = vsel %vm1503_vm1, %v7328_v29, 0 }
 0xb74   : > { %v2122_v33 = vpop.xlane.xlu0 %2121 }
 0xb75   : > { %v2125_v34 = vmul.f32 0.0078125, %v2122_v33  ;;  %v2223_v33 = vrot.slane %v7093_v38, %v2222_v32 }
 0xb76   : > { %v2124_v35 = vpop.xlane.xlu1 %2123 }
 0xb77   : > { %v2127_v23 = vsub.f32 %v7271_v17, %v2125_v34  ;;  %v2126_v39 = vmul.f32 0.0078125, %v2124_v35 }
 0xb79   : > { %v2128_v40 = vsub.f32 %v7273_v24, %v2126_v39  ;;  %v2129_v41 = vmul.f32 %v2127_v23, %v2127_v23 }
 0xb7b   : > { %2131 = vadd.xlane.f32.xlu0 %v2129_v41  ;;  %v2130_v43 = vmul.f32 %v2128_v40, %v2128_v40 }
 0xb7f   : > { %2133 = vadd.xlane.f32.xlu0 %v2130_v43 }
 0xc08   : > { %v2132_v54 = vpop.xlane.xlu0 %2131 }
 0xc09   : > { %v2135_v55 = vmul.f32 0.0078125, %v2132_v54 }
 0xc0b   : > { %v2137_v56 = vadd.f32 1e-05, %v2135_v55 }
 0xc0c   : > { %v2134_v57 = vpop.xlane.xlu0 %2133 }
 0xc0d   : > { %5431 = vrsqrt.f32 %v2137_v56  ;;  %v2136_v58 = vmul.f32 0.0078125, %v2134_v57 }
 0xc0f   : > { %v2138_v60 = vadd.f32 1e-05, %v2136_v58 }
 0xc11   : > { %5433 = vrsqrt.f32 %v2138_v60 }
 0xc17   : > { %v5432_v62 = vpop.eup %5431 }
 0xc18   : > { %v2141_v0 = vmul.f32 %v5432_v62, %v2127_v23 }
 0xc1a   : > { %v2147_v6 = vmul.f32 %v2146_v1, %v2141_v0 }
 0xc1b   : > { %v5434_v4 = vpop.eup %5433 }
 0xc1c   : > { %v2142_v5 = vmul.f32 %v5434_v4, %v2128_v40  ;;  %v2153_v10 = vadd.f32 %v2152_v8, %v2147_v6 }
 0xc1e   : > { %v2148_v9 = vmul.f32 %v2146_v1, %v2142_v5 }
 0xc20   : > { %v2154_v11 = vadd.f32 %v2152_v8, %v2148_v9 }
 0xc22   : > { %v2155_v63 = vpack.c.bf16 %v2154_v11, %v2153_v10 }
 0xc24   : > { %4935 = vmatmul.mubr.bf16.vlgmr.msra.gmra.mrb[28].mxu1 %v2155_v63 }
 0xc25   : > { %4959 = vmatpush3.bf16.msra.mxu1 %v5299_v53  ;;  %4974 = vmatprep.mubr.bf16.mxu1 %v5291_v46  ;;  %v7345_v46 = vld [vmem:[%s6965_s18 + $0x8] sm:$0x1f] }
 0xc26   : > { %4960 = vmatprep.subr.bf16.mxu1 %v5300_v2  ;;  %v2430_v38 = vrot.slane %v7345_v46, %v7090_v37 }
 0xc29   : > { %4961 = vmatpush3.bf16.msra.mxu1 %v5300_v2 }
 0xc2a   : > { %4962 = vmatprep.subr.bf16.mxu1 %v5301_v14 }
 0xc2d   : > { %4963 = vmatpush3.bf16.msra.mxu1 %v5301_v14 }
 0xc2e   : > { %4964 = vmatprep.subr.bf16.mxu1 %v5302_v15 }
 0xc31   : > { %4965 = vmatpush3.bf16.msra.mxu1 %v5302_v15 }
 0xc32   : > { %4966 = vmatprep.subr.bf16.mxu1 %v5303_v21 }
 0xc35   : > { %4967 = vmatpush3.bf16.msra.mxu1 %v5303_v21 }
 0xc36   : > { %4968 = vmatprep.subr.bf16.mxu1 %v5304_v16 }
 0xc39   : > { %4969 = vmatpush3.bf16.msra.mxu1 %v5304_v16 }
 0xc3a   : > { %4970 = vmatprep.subr.bf16.mxu1 %v5305_v18 }
 0xc3d   : > { %4971 = vmatpush3.bf16.msra.mxu1 %v5305_v18 }
 0xc3e   : > { %4972 = vmatprep.subr.bf16.mxu1 %v5306_v19 }
 0xc41   : > { %4973 = vmatpush3.bf16.msra.mxu1 %v5306_v19 }
 0xc42   : > { %4978 = vmatprep.subr.bf16.mxu1 %v6128_v7 }
 0xc44   : > { %4975 = vmatmul.mubr.bf16.vlgmr.msra.gmra.mrb[32].mxu1 %v7293_v47 }
 0xc45   : > { %4982 = vmatprep.mubr.msk.bf16.mxu1 %vm6129_vm0, %v6128_v7 }
 0xc4a   : > { %4979 = vmatpush3.bf16.xpose.msra.mxu1 %v2534_v30 }
 0xc4b   : > { %4980 = vmatprep.subr.bf16.mxu1 %v6128_v7 }
 0xc52   : > { %4981 = vmatpush3.bf16.xpose.msra.mxu1 %v2537_v31 }
 0xc53   : > { %4986 = vmatprep.subr.bf16.mxu1 %v6128_v7 }
 0xcf7   : > { %v2306_v34 = vpop.f32.mrb[28].mxu1 }
 0xcf8   : > { %v2307_v35 = vadd.f32 %v2306_v34, %v2223_v33  ;;  %v4936_v23 = vpop.f32.mrb[29].mxu1 }
 0xcf9   : > { %v2309_v39 = vpop.f32.mrb[30].mxu1 }
 0xcfa   : > { %v2310_v40 = vadd.f32 %v2309_v39, %v2223_v33  ;;  %v4937_v41 = vpop.f32.mrb[31].mxu1  ;;  %v2313_v43 = vmul.f32 0.17677669, %v2307_v35 }
 0xcfc   : > { %v2314_v44 = vmul.f32 0.17677669, %v2310_v40 }
 0xcfe   : > { %v7338_v45 = vpack.c.bf16 %v2314_v44, %v2313_v43 }
 0xd00   : > { %4983 = vmatmul.mubr.msk.bf16.vlgmr.msra.gmra.mrb[36].mxu1 %vm1503_vm1, %v7338_v45 }
 0xd01   : > { %4990 = vmatprep.mubr.msk.bf16.mxu1 %vm6129_vm0, %v6128_v7 }
 0xd17   : > { %v4976_v47 = vpop.f32.mrb[32].mxu1 }
 0xd18   : > { %v2522_v22 = vadd.f32 %v4976_v47, %v2430_v38  ;;  %v2513_v48 = vpop.f32.mrb[33].mxu1 }
 0xd19   : > { %v2514_v49 = vadd.f32 %v2513_v48, %v2430_v38  ;;  %v4977_v50 = vpop.f32.mrb[34].mxu1 }
 0xd1a   : > { %v2525_v51 = vadd.f32 %v4977_v50, %v2430_v38  ;;  %v2516_v52 = vpop.f32.mrb[35].mxu1 }
 0xd1b   : > { %v2517_v53 = vadd.f32 %v2516_v52, %v2430_v38 }
 0xd1c   : > { %v7349_v54 = vpack.c.bf16 %v2525_v51, %v2522_v22 }
 0xd1d   : > { %v7351_v55 = vpack.c.bf16 %v2517_v53, %v2514_v49 }
 0xd1f   : > { %4987 = vmatpush3.bf16.msra.mxu1 %v7351_v55 }
 0xd20   : > { %4988 = vmatprep.subr.bf16.mxu1 %v6128_v7 }
 0xd23   : > { %4989 = vmatpush3.bf16.msra.mxu1 %v7349_v54 }
 0xd24   : > { %4994 = vmatprep.subr.bf16.mxu1 %v6128_v7 }
 0xdd3   : > { %v2573_v56 = vpop.f32.mrb[36].mxu1 }
 0xdd4   : > { %v4984_v57 = vpop.f32.mrb[37].mxu1  ;;  %v2580_v58 = vsel %vm1503_vm1, %v2573_v56, -inf }
 0xdd5   : > { %2581 = vmax.xlane.f32.xlu0 %v2580_v58  ;;  %v2576_v60 = vpop.f32.mrb[38].mxu1 }
 0xdd6   : > { %v4985_v61 = vpop.f32.mrb[39].mxu1  ;;  %v2583_v62 = vsel %vm1503_vm1, %v2576_v60, -inf }
 0xdd7   : > { %2584 = vmax.xlane.f32.xlu1 %v2583_v62 }
 0xe62   : > { %v2582_v0 = vpop.xlane.xlu0 %2581 }
 0xe63   : > { %v2586_v1 = vsub.f32 %v2573_v56, %v2582_v0 }
 0xe64   : > { %v2585_v3 = vpop.xlane.xlu1 %2584 }
 0xe65   : > { %v2588_v4 = vmul.f32 1.442695, %v2586_v1  ;;  %v2587_v5 = vsub.f32 %v2576_v60, %v2585_v3 }
 0xe67   : > { %5435 = vpow2.f32 %v2588_v4  ;;  %v2590_v6 = vmul.f32 1.442695, %v2587_v5 }
 0xe69   : > { %5437 = vpow2.f32 %v2590_v6 }
 0xe71   : > { %v5436_v8 = vpop.eup %5435 }
 0xe72   : > { %v2592_v9 = vsel %vm1503_vm1, %v5436_v8, 0.0 }
 0xe73   : > { %v5438_v10 = vpop.eup %5437  ;;  %2593 = vadd.xlane.f32.xlu0 %v2592_v9 }
 0xe74   : > { %v2595_v11 = vsel %vm1503_vm1, %v5438_v10, 0.0 }
 0xe75   : > { %2596 = vadd.xlane.f32.xlu1 %v2595_v11 }
 0xe86   : > { %2654 = vrot.lane.b32.xlu1 %v7326_v27, %s6130_s8 }
 0xe89   : > { %2652 = vrot.lane.b32.xlu0 %v7328_v29, %s6130_s8 }
 0xe8a   : > { %2648 = vrot.lane.b32.xlu1 %v7338_v45, %s6130_s8 }
 0xf00   : > { %v2594_v63 = vpop.xlane.xlu0 %2593 }
 0xf01   : > { %5439 = vrcp.f32 %v2594_v63 }
 0xf02   : > { %v2597_v2 = vpop.xlane.xlu1 %2596 }
 0xf03   : > { %5441 = vrcp.f32 %v2597_v2 }
 0xf04   : > { %v2653_v18 = vpop.permute.xlu0 %2652 }
 0xf05   : > { %v2660_v20 = vsel %vm1503_vm1, %v2653_v18, 0 }
 0xf06   : > { %v2655_v25 = vpop.permute.xlu1 %2654 }
 0xf07   : > { %v2663_v26 = vsel %vm1503_vm1, %v2655_v25, 0 }
 0xf0a   : > { %v2649_v28 = vpop.permute.xlu1 %2648 }
 0xf0b   : > { %v5440_v14 = vpop.eup %5439 }
 0xf0c   : > { %v2599_v21 = vmul.f32 %v5440_v14, %v5436_v8 }
 0xf0d   : > { %v5442_v15 = vpop.eup %5441 }
 0xf0e   : > { %v2601_v16 = vmul.f32 %v5442_v15, %v5438_v10 }
 0xf10   : > { %v2602_v19 = vpack.c.bf16 %v2601_v16, %v2599_v21 }
 0xf12   : > { %4991 = vmatmul.mubr.msk.bf16.vlgmr.msra.gmra.mrb[40].mxu1 %vm1503_vm1, %v2602_v19 }
 0xf13   : > { %4995 = vmatpush3.bf16.xpose.msra.mxu1 %v2660_v20  ;;  %4998 = vmatprep.mubr.msk.bf16.mxu1 %vm6129_vm0, %v6128_v7 }
 0xf14   : > { %4996 = vmatprep.subr.bf16.mxu1 %v6128_v7 }
 0xf1b   : > { %4997 = vmatpush3.bf16.xpose.msra.mxu1 %v2663_v26 }
 0xf1c   : > { %5018 = vmatprep.subr.bf16.mxu1 %v6128_v7 }
 0xf22   : > { %4999 = vmatmul.mubr.msk.bf16.vlgmr.msra.gmra.mrb[44].mxu1 %vm1503_vm1, %v2649_v28 }
 0xf23   : > { %5022 = vmatprep.mubr.msk.bf16.mxu1 %vm6129_vm0, %v6128_v7 }
 0xfe5   : > { %v7377_v30 = vpop.f32.mrb[40].mxu1 }
 0xfe6   : > { %v4992_v31 = vpop.f32.mrb[41].mxu1 }
 0xfe7   : > { %v7379_v32 = vpop.f32.mrb[42].mxu1 }
 0xfe8   : > { %v4993_v33 = vpop.f32.mrb[43].mxu1 }
 0xff5   : > { %v2699_v34 = vpop.f32.mrb[44].mxu1 }
 0xff6   : > { %v5000_v35 = vpop.f32.mrb[45].mxu1  ;;  %v2706_v23 = vsel %vm1503_vm1, %v2699_v34, -inf }
 0xff7   : > { %2707 = vmax.xlane.f32.xlu1 %v2706_v23  ;;  %v2702_v39 = vpop.f32.mrb[46].mxu1 }
 0xff8   : > { %v5001_v40 = vpop.f32.mrb[47].mxu1  ;;  %v2709_v41 = vsel %vm1503_vm1, %v2702_v39, -inf }
 0xff9   : > { %2710 = vmax.xlane.f32.xlu0 %v2709_v41 }
0x1008   : > { %2731 = vrot.lane.b32.xlu1 %v7351_v55, %s6130_s8 }
0x100c   : > { %2783 = vrot.lane.b32.xlu1 %v7328_v29, %s6131_s4 }
0x1010   : > { %2785 = vrot.lane.b32.xlu1 %v7326_v27, %s6131_s4 }
0x1014   : > { %2781 = vrot.lane.b32.xlu1 %v7338_v45, %s6131_s4 }
0x1084   : > { %v2708_v43 = vpop.xlane.xlu1 %2707 }
0x1085   : > { %v2712_v44 = vsub.f32 %v2699_v34, %v2708_v43 }
0x1086   : > { %v2711_v38 = vpop.xlane.xlu0 %2710 }
0x1087   : > { %v2714_v47 = vmul.f32 1.442695, %v2712_v44  ;;  %v2713_v22 = vsub.f32 %v2702_v39, %v2711_v38 }
0x1088   : > { %v2732_v48 = vpop.permute.xlu1 %2731 }
0x1089   : > { %5443 = vpow2.f32 %v2714_v47  ;;  %v2716_v49 = vmul.f32 1.442695, %v2713_v22  ;;  %5003 = vmatpush3.bf16.msra.mxu0 %v2732_v48 }
0x108a   : > { %5004 = vmatprep.subr.bf16.mxu0 %v6128_v7 }
0x108b   : > { %5445 = vpow2.f32 %v2716_v49 }
0x108c   : > { %v2784_v1 = vpop.permute.xlu1 %2783 }
0x108d   : > { %v2791_v4 = vsel %vm1503_vm1, %v2784_v1, 0 }
0x1090   : > { %v2786_v5 = vpop.permute.xlu1 %2785 }
0x1091   : > { %v2794_v6 = vsel %vm1503_vm1, %v2786_v5, 0 }
0x1093   : > { %v5444_v50 = vpop.eup %5443 }
0x1094   : > { %v2718_v51 = vsel %vm1503_vm1, %v5444_v50, 0.0  ;;  %v2782_v8 = vpop.permute.xlu1 %2781 }
0x1095   : > { %v5446_v52 = vpop.eup %5445  ;;  %2719 = vadd.xlane.f32.xlu0 %v2718_v51 }
0x1096   : > { %v2721_v53 = vsel %vm1503_vm1, %v5446_v52, 0.0 }
0x1099   : > { %2722 = vadd.xlane.f32.xlu0 %v2721_v53 }
0x10af   : > { %2733 = vrot.lane.b32.xlu0 %v7349_v54, %s6130_s8 }
0x1122   : > { %v2720_v56 = vpop.xlane.xlu0 %2719 }
0x1123   : > { %5447 = vrcp.f32 %v2720_v56 }
0x1126   : > { %v2723_v57 = vpop.xlane.xlu0 %2722 }
0x1127   : > { %5449 = vrcp.f32 %v2723_v57 }
0x112a   : > { %v2734_v58 = vpop.permute.xlu0 %2733 }
0x112b   : > { %5005 = vmatpush3.bf16.msra.mxu0 %v2734_v58 }
0x112c   : > { %5010 = vmatprep.subr.bf16.mxu0 %v6128_v7 }
0x112d   : > { %v5448_v60 = vpop.eup %5447 }
0x112e   : > { %v2725_v62 = vmul.f32 %v5448_v60, %v5444_v50 }
0x1131   : > { %v5450_v61 = vpop.eup %5449 }
0x1132   : > { %v2727_v0 = vmul.f32 %v5450_v61, %v5446_v52 }
0x1134   : > { %v2728_v3 = vpack.c.bf16 %v2727_v0, %v2725_v62 }
0x1136   : > { %5007 = vmatmul.mubr.msk.bf16.vlgmr.msra.gmra.mrb[24].mxu0 %vm1503_vm1, %v2728_v3 }
0x1137   : > { %5011 = vmatpush3.bf16.xpose.msra.mxu0 %v2791_v4  ;;  %5014 = vmatprep.mubr.msk.bf16.mxu0 %vm6129_vm0, %v6128_v7 }
0x1138   : > { %5012 = vmatprep.subr.bf16.mxu0 %v6128_v7 }
0x113f   : > { %5013 = vmatpush3.bf16.xpose.msra.mxu0 %v2794_v6 }
0x1140   : > { %5034 = vmatprep.subr.bf16.mxu0 %v6128_v7 }
0x1146   : > { %5015 = vmatmul.mubr.msk.bf16.vlgmr.msra.gmra.mrb[28].mxu0 %vm1503_vm1, %v2782_v8 }
0x1147   : > { %5038 = vmatprep.mubr.msk.bf16.mxu0 %vm6129_vm0, %v6128_v7 }
0x1209   : > { %v7407_v9 = vpop.f32.mrb[24].mxu0 }
0x120a   : > { %v5008_v10 = vpop.f32.mrb[25].mxu0 }
0x120b   : > { %v7409_v11 = vpop.f32.mrb[26].mxu0 }
0x120c   : > { %v5234_v63 = vpack.i.bf16 %v7409_v11, %v7407_v9  ;;  %v5009_v2 = vpop.f32.mrb[27].mxu0 }
0x1219   : > { %v2830_v14 = vpop.f32.mrb[28].mxu0 }
0x121a   : > { %v5016_v15 = vpop.f32.mrb[29].mxu0  ;;  %v2837_v21 = vsel %vm1503_vm1, %v2830_v14, -inf }
0x121b   : > { %2838 = vmax.xlane.f32.xlu0 %v2837_v21  ;;  %v2833_v16 = vpop.f32.mrb[30].mxu0 }
0x121c   : > { %v5017_v18 = vpop.f32.mrb[31].mxu0  ;;  %v2840_v19 = vsel %vm1503_vm1, %v2833_v16, -inf }
0x121d   : > { %2841 = vmax.xlane.f32.xlu1 %v2840_v19 }
0x122e   : > { %2862 = vrot.lane.b32.xlu1 %v7349_v54, %s6131_s4 }
0x1232   : > { %2912 = vrot.lane.b32.xlu1 %v7328_v29, %s6132_s17 }
0x1236   : > { %2914 = vrot.lane.b32.xlu1 %v7326_v27, %s6132_s17 }
0x12a8   : > { %v2839_v20 = vpop.xlane.xlu0 %2838 }
0x12a9   : > { %v2843_v25 = vsub.f32 %v2830_v14, %v2839_v20 }
0x12aa   : > { %v2842_v26 = vpop.xlane.xlu1 %2841 }
0x12ab   : > { %v2845_v28 = vmul.f32 1.442695, %v2843_v25  ;;  %v2844_v31 = vsub.f32 %v2833_v16, %v2842_v26 }
0x12ad   : > { %5451 = vpow2.f32 %v2845_v28  ;;  %v2847_v33 = vmul.f32 1.442695, %v2844_v31  ;;  %v5308_v28 = vld [vmem:[%s7007_s24 + $0x8] sm:$0xff]   ;;  %v5309_v31 = vld [vmem:[%s7007_s24 + $0x10] sm:$0xff]  }
0x12ae   : > { %v2863_v41 = vpop.permute.xlu1 %2862 }
0x12af   : > { %5453 = vpow2.f32 %v2847_v33  ;;  %v5310_v33 = vld [vmem:[%s7007_s24 + $0x18] sm:$0xff]  }
0x12b2   : > { %v2913_v22 = vpop.permute.xlu1 %2912 }
0x12b6   : > { %v2915_v49 = vpop.permute.xlu1 %2914 }
0x12b7   : > { %v5452_v34 = vpop.eup %5451  ;;  %v2923_v50 = vsel %vm1503_vm1, %v2915_v49, 0 }
0x12b8   : > { %v2849_v35 = vsel %vm1503_vm1, %v5452_v34, 0.0 }
0x12b9   : > { %v5454_v23 = vpop.eup %5453  ;;  %2850 = vadd.xlane.f32.xlu0 %v2849_v35  ;;  %v5312_v35 = vld [vmem:[%s7007_s24 + $0x28] sm:$0xff]  }
0x12ba   : > { %v2852_v39 = vsel %vm1503_vm1, %v5454_v23, 0.0 }
0x12bd   : > { %2853 = vadd.xlane.f32.xlu0 %v2852_v39  ;;  %v5314_v39 = vld [vmem:[%s7007_s24 + $0x38] sm:$0xff]  }
0x12d3   : > { %2860 = vrot.lane.b32.xlu0 %v7351_v55, %s6131_s4 }
0x12d7   : > { %2910 = vrot.lane.b32.xlu0 %v7338_v45, %s6132_s17  ;;  %v2920_v45 = vsel %vm1503_vm1, %v2913_v22, 0 }
0x1346   : > { %v2851_v27 = vpop.xlane.xlu0 %2850 }
0x1347   : > { %5455 = vrcp.f32 %v2851_v27 }
0x134a   : > { %v2854_v29 = vpop.xlane.xlu0 %2853 }
0x134b   : > { %5457 = vrcp.f32 %v2854_v29 }
0x134e   : > { %v2861_v40 = vpop.permute.xlu0 %2860 }
0x134f   : > { %5019 = vmatpush3.bf16.msra.mxu1 %v2861_v40 }
0x1350   : > { %5020 = vmatprep.subr.bf16.mxu1 %v6128_v7 }
0x1351   : > { %v5456_v43 = vpop.eup %5455 }
0x1352   : > { %v2856_v38 = vmul.f32 %v5456_v43, %v5452_v34  ;;  %v2911_v51 = vpop.permute.xlu0 %2910  ;;  %v5311_v34 = vld [vmem:[%s7007_s24 + $0x20] sm:$0xff]  }
0x1353   : > { %5021 = vmatpush3.bf16.msra.mxu1 %v2863_v41 }
0x1354   : > { %5026 = vmatprep.subr.bf16.mxu1 %v6128_v7 }
0x1355   : > { %v5458_v44 = vpop.eup %5457 }
0x1356   : > { %v2858_v47 = vmul.f32 %v5458_v44, %v5454_v23  ;;  %v5313_v23 = vld [vmem:[%s7007_s24 + $0x30] sm:$0xff]  }
0x1358   : > { %v2859_v48 = vpack.c.bf16 %v2858_v47, %v2856_v38 }
0x135a   : > { %5023 = vmatmul.mubr.msk.bf16.vlgmr.msra.gmra.mrb[48].mxu1 %vm1503_vm1, %v2859_v48 }
0x135b   : > { %5030 = vmatprep.mubr.msk.bf16.mxu1 %vm6129_vm0, %v6128_v7 }
0x135c   : > { %5027 = vmatpush3.bf16.xpose.msra.mxu1 %v2920_v45 }
0x135d   : > { %5028 = vmatprep.subr.bf16.mxu1 %v6128_v7 }
0x1364   : > { %5029 = vmatpush3.bf16.xpose.msra.mxu1 %v2923_v50 }
0x136b   : > { %5031 = vmatmul.mubr.msk.bf16.vlgmr.msra.gmra.mrb[52].mxu1 %vm1503_vm1, %v2911_v51 }
0x142d   : > { %v2903_v52 = vpop.f32.mrb[48].mxu1 }
0x142e   : > { %v5024_v53 = vpop.f32.mrb[49].mxu1 }
0x142f   : > { %v2906_v56 = vpop.f32.mrb[50].mxu1 }
0x1430   : > { %v5239_v57 = vpack.i.bf16 %v2906_v56, %v2903_v52  ;;  %v5025_v58 = vpop.f32.mrb[51].mxu1 }
0x143e   : > { %v2959_v60 = vpop.f32.mrb[52].mxu1 }
0x143f   : > { %v5032_v61 = vpop.f32.mrb[53].mxu1  ;;  %v2966_v62 = vsel %vm1503_vm1, %v2959_v60, -inf }
0x1440   : > { %2967 = vmax.xlane.f32.xlu1 %v2966_v62  ;;  %v2962_v0 = vpop.f32.mrb[54].mxu1 }
0x1441   : > { %v5033_v1 = vpop.f32.mrb[55].mxu1  ;;  %v2969_v3 = vsel %vm1503_vm1, %v2962_v0, -inf }
0x1442   : > { %2970 = vmax.xlane.f32.xlu0 %v2969_v3 }
0x1451   : > { %2989 = vrot.lane.b32.xlu1 %v7351_v55, %s6132_s17 }
0x1455   : > { %5235 = vrot.lane.b32.xlu1 %v5234_v63, %s6132_s17 }
0x1459   : > { %5240 = vrot.lane.b32.xlu1 %v5239_v57, %s6131_s4 }
0x14cd   : > { %v2968_v4 = vpop.xlane.xlu1 %2967 }
0x14ce   : > { %v2972_v5 = vsub.f32 %v2959_v60, %v2968_v4 }
0x14cf   : > { %v2971_v6 = vpop.xlane.xlu0 %2970 }
0x14d0   : > { %v2974_v8 = vmul.f32 1.442695, %v2972_v5  ;;  %v2973_v10 = vsub.f32 %v2962_v0, %v2971_v6  ;;  %v5315_v6 = vld [vmem:[%s7010_s23] ss:$16 sps:$4 sm:$0xff]  }
0x14d1   : > { %v2990_v2 = vpop.permute.xlu1 %2989 }
0x14d2   : > { %5459 = vpow2.f32 %v2974_v8  ;;  %v2976_v14 = vmul.f32 1.442695, %v2973_v10  ;;  %5035 = vmatpush3.bf16.msra.mxu0 %v2990_v2  ;;  %v5317_v8 = vld [vmem:[%s7010_s23 + $0x4] ss:$16 sps:$4 sm:$0xff]   ;;  %v5318_v10 = vld [vmem:[%s7010_s23 + $0x8] ss:$16 sps:$4 sm:$0xff]  }
0x14d3   : > { %5036 = vmatprep.subr.bf16.mxu0 %v6128_v7  ;;  %v5320_v2 = vld [vmem:[%s7010_s23 + $0xc] ss:$16 sps:$4 sm:$0xff]   ;;  %3414 = vmatprep.subr.bf16.mxu1 %v5317_v8 }
0x14d4   : > { %5461 = vpow2.f32 %v2976_v14  ;;  %v5323_v14 = vld [vmem:[%s7010_s23 + $0x24] ss:$16 sps:$4 sm:$0xff]   ;;  %3415 = vmatpush1.bf16.msra.mxu1 %v5315_v6 }
0x14d5   : > { %v5236_v44 = vpop.permute.xlu1 %5235  ;;  %3416 = vmatprep.subr.bf16.mxu1 %v5323_v14  ;;  %v5364_v14 = vld [vmem:[%s7017_s7 + $0xc0] sm:$0xff]  }
0x14d6   : > { %v5238_v47 = vunpack.i.h.bf16 %v5236_v44  ;;  %v5237_v22 = vunpack.i.l.bf16 %v5236_v44  ;;  %v5353_v44 = vld [vmem:[%s7010_s23 + $0xc4] ss:$16 sps:$4 sm:$0xff]  }
0x14d8   : > { %v3064_v50 = vsel %vm1503_vm1, %v7379_v32, %v5238_v47  ;;  %v5351_v47 = vld [vmem:[%s7010_s23 + $0xc0] ss:$16 sps:$4 sm:$0xff]  }
0x14d9   : > { %v5241_v38 = vpop.permute.xlu1 %5240 }
0x14da   : > { %v5243_v48 = vunpack.i.h.bf16 %v5241_v38  ;;  %v5242_v45 = vunpack.i.l.bf16 %v5241_v38  ;;  %v5356_v38 = vld [vmem:[%s7010_s23 + $0xcc] ss:$16 sps:$4 sm:$0xff]  }
0x14dc   : > { %v5460_v55 = vpop.eup %5459  ;;  %v3066_v56 = vsel %vm2019_vm5, %v3064_v50, %v5243_v48  ;;  %v5357_v48 = vld [vmem:[%s7010_s23 + $0xe0] ss:$16 sps:$4 sm:$0xff]   ;;  %v5362_v50 = vld [vmem:[%s7010_s23 + $0xec] ss:$16 sps:$4 sm:$0xff]  }
0x14dd   : > { %v2978_v15 = vsel %vm1503_vm1, %v5460_v55, 0.0 }
0x14de   : > { %v5462_v21 = vpop.eup %5461  ;;  %2979 = vadd.xlane.f32.xlu0 %v2978_v15 }
0x14df   : > { %v2981_v9 = vsel %vm1503_vm1, %v5462_v21, 0.0 }
0x14e2   : > { %2982 = vadd.xlane.f32.xlu0 %v2981_v9 }
0x14f8   : > { %2991 = vrot.lane.b32.xlu0 %v7349_v54, %s6132_s17  ;;  %v5307_v54 = vld [vmem:[%s7007_s24] sm:$0xff]  }
0x156b   : > { %v2980_v11 = vpop.xlane.xlu0 %2979 }
0x156c   : > { %5463 = vrcp.f32 %v2980_v11 }
0x156f   : > { %v2983_v63 = vpop.xlane.xlu0 %2982 }
0x1570   : > { %5465 = vrcp.f32 %v2983_v63 }
0x1573   : > { %v2992_v16 = vpop.permute.xlu0 %2991 }
0x1574   : > { %5037 = vmatpush3.bf16.msra.mxu0 %v2992_v16 }
0x1575   : > { %5042 = vmatprep.subr.bf16.mxu0 %v6128_v7 }
0x1576   : > { %v5464_v18 = vpop.eup %5463 }
0x1577   : > { %v2985_v20 = vmul.f32 %v5464_v18, %v5460_v55  ;;  %v5326_v55 = vld [vmem:[%s7010_s23 + $0x2c] ss:$16 sps:$4 sm:$0xff]  }
0x157a   : > { %v5466_v19 = vpop.eup %5465 }
0x157b   : > { %v2987_v25 = vmul.f32 %v5466_v19, %v5462_v21 }
0x157d   : > { %v2988_v26 = vpack.c.bf16 %v2987_v25, %v2985_v20  ;;  %v5329_v20 = vld [vmem:[%s7010_s23 + $0x44] ss:$16 sps:$4 sm:$0xff]   ;;  %v5332_v25 = vld [vmem:[%s7010_s23 + $0x4c] ss:$16 sps:$4 sm:$0xff]  }
0x157f   : > { %5039 = vmatmul.mubr.msk.bf16.vlgmr.msra.gmra.mrb[32].mxu0 %vm1503_vm1, %v2988_v26  ;;  %v5327_v26 = vld [vmem:[%s7010_s23 + $0x40] ss:$16 sps:$4 sm:$0xff]  }
0x1580   : > { %5058 = vmatprep.mubr.msk.bf16.mxu0 %vm6129_vm0, %v6128_v7  ;;  %5043 = vmatpush3.bf16.msra.mxu0 %v5307_v54  ;;  %v5330_v54 = vld [vmem:[%s7010_s23 + $0x48] ss:$16 sps:$4 sm:$0xff]  }
0x1581   : > { %5044 = vmatprep.subr.bf16.mxu0 %v6128_v7 }
0x1584   : > { %5045 = vmatpush3.bf16.msra.mxu0 %v5308_v28  ;;  %v5335_v28 = vld [vmem:[%s7010_s23 + $0x64] ss:$16 sps:$4 sm:$0xff]  }
0x1585   : > { %5046 = vmatprep.subr.bf16.mxu0 %v6128_v7 }
0x1588   : > { %5047 = vmatpush3.bf16.msra.mxu0 %v5309_v31  ;;  %v5338_v31 = vld [vmem:[%s7010_s23 + $0x6c] ss:$16 sps:$4 sm:$0xff]  }
0x1589   : > { %5048 = vmatprep.subr.bf16.mxu0 %v6128_v7 }
0x158c   : > { %5049 = vmatpush3.bf16.msra.mxu0 %v5310_v33  ;;  %v5333_v33 = vld [vmem:[%s7010_s23 + $0x60] ss:$16 sps:$4 sm:$0xff]  }
0x158d   : > { %5050 = vmatprep.subr.bf16.mxu0 %v6128_v7 }
0x1590   : > { %5051 = vmatpush3.bf16.msra.mxu0 %v5311_v34  ;;  %v5336_v34 = vld [vmem:[%s7010_s23 + $0x68] ss:$16 sps:$4 sm:$0xff]  }
0x1591   : > { %5052 = vmatprep.subr.bf16.mxu0 %v6128_v7 }
0x1594   : > { %5053 = vmatpush3.bf16.msra.mxu0 %v5312_v35  ;;  %v5341_v35 = vld [vmem:[%s7010_s23 + $0x84] ss:$16 sps:$4 sm:$0xff]  }
0x1595   : > { %5054 = vmatprep.subr.bf16.mxu0 %v6128_v7 }
0x1598   : > { %5055 = vmatpush3.bf16.msra.mxu0 %v5313_v23  ;;  %v5344_v23 = vld [vmem:[%s7010_s23 + $0x8c] ss:$16 sps:$4 sm:$0xff]  }
0x1599   : > { %5056 = vmatprep.subr.bf16.mxu0 %v6128_v7  ;;  %v3063_v7 = vsel %vm1503_vm1, %v7377_v30, %v5237_v22  ;;  %v3073_v30 = vrot.slane %v7345_v46, %v7099_v42  ;;  %v5354_v22 = vld [vmem:[%s7010_s23 + $0xc8] ss:$16 sps:$4 sm:$0xff]  }
0x159a   : > { %v3065_v53 = vsel %vm2019_vm5, %v3063_v7, %v5242_v45  ;;  %v5359_v45 = vld [vmem:[%s7010_s23 + $0xe4] ss:$16 sps:$4 sm:$0xff]   ;;  %v6133_v7 = vmov 0  }
0x159b   : > { %3446 = vmatprep.mubr.bf16.mxu1 %v6133_v7 }
0x159c   : > { %5057 = vmatpush3.bf16.msra.mxu0 %v5314_v39  ;;  %v5339_v39 = vld [vmem:[%s7010_s23 + $0x80] ss:$16 sps:$4 sm:$0xff]  }
0x159d   : > { %3457 = vmatprep.subr.bf16.mxu0 %v5320_v2  ;;  %v5363_v2 = vld [vmem:[%s7017_s7 + $0x40] sm:$0xff]  }
0x1652   : > { %v3032_v27 = vpop.f32.mrb[32].mxu0 }
0x1653   : > { %v5040_v29 = vpop.f32.mrb[33].mxu0 }
0x1654   : > { %v3035_v40 = vpop.f32.mrb[34].mxu0  ;;  %v5347_v29 = vld [vmem:[%s7010_s23 + $0xa4] ss:$16 sps:$4 sm:$0xff]  }
0x1655   : > { %v5244_v41 = vpack.i.bf16 %v3035_v40, %v3032_v27  ;;  %v5041_v43 = vpop.f32.mrb[35].mxu0  ;;  %v5342_v27 = vld [vmem:[%s7010_s23 + $0x88] ss:$16 sps:$4 sm:$0xff]   ;;  %v5350_v40 = vld [vmem:[%s7010_s23 + $0xac] ss:$16 sps:$4 sm:$0xff]  }
0x1656   : > { %v5348_v43 = vld [vmem:[%s7010_s23 + $0xa8] ss:$16 sps:$4 sm:$0xff]  }
0x1657   : > { %5245 = vrot.lane.b32.xlu1 %v5244_v41, %s6130_s8  ;;  %v5345_v41 = vld [vmem:[%s7010_s23 + $0xa0] ss:$16 sps:$4 sm:$0xff]  }
0x16c9   : > { %v5246_v49 = vpop.permute.xlu1 %5245 }
0x16ca   : > { %v5248_v51 = vunpack.i.h.bf16 %v5246_v49  ;;  %v5247_v52 = vunpack.i.l.bf16 %v5246_v49  ;;  %v5360_v49 = vld [vmem:[%s7010_s23 + $0xe8] ss:$16 sps:$4 sm:$0xff]  }
0x16cc   : > { %v3068_v57 = vsel %vm2022_vm6, %v3066_v56, %v5248_v51  ;;  %v3067_v58 = vsel %vm2022_vm6, %v3065_v53, %v5247_v52 }
0x16cd   : > { %v3069_v60 = vpack.c.bf16 %v3068_v57, %v3067_v58 }
0x16cf   : > { %5059 = vmatmul.mubr.bf16.vlgmr.msra.gmra.mrb[36].mxu0 %v3069_v60 }
0x16d0   : > { %3458 = vmatpush1.bf16.msra.mxu0 %v5318_v10  ;;  %3489 = vmatprep.mubr.bf16.mxu0 %v6133_v7 }
0x16d1   : > { %3459 = vmatprep.subr.bf16.mxu0 %v5326_v55  ;;  %v5365_v55 = vld [vmem:[%s7017_s7] sm:$0xff]  }
0x17a2   : > { %v3156_v32 = vpop.f32.mrb[36].mxu0 }
0x17a3   : > { %v3157_v61 = vadd.f32 %v3156_v32, %v3073_v30  ;;  %v5060_v62 = vpop.f32.mrb[37].mxu0 }
0x17a4   : > { %v3159_v0 = vpop.f32.mrb[38].mxu0 }
0x17a5   : > { %v7481_v1 = vadd.f32 %v3157_v61, %v7271_v17  ;;  %v3160_v3 = vadd.f32 %v3159_v0, %v3073_v30  ;;  %v5061_v4 = vpop.f32.mrb[39].mxu0  ;;  %v5321_v17 = vld [vmem:[%s7010_s23 + $0x20] ss:$16 sps:$4 sm:$0xff]   ;;  %v3190_v30 = vrot.slane %v7345_v46, %v7127_v59 }
0x17a6   : > { %3417 = vmatpush1.bf16.msra.mxu1 %v5321_v17  ;;  %v5366_v17 = vld [vmem:[%s7017_s7 + $0x80] sm:$0xff]  }
0x17a7   : > { %v7484_v5 = vadd.f32 %v3160_v3, %v7273_v24  ;;  %3165 = vadd.xlane.f32.xlu0 %v7481_v1  ;;  %v5324_v24 = vld [vmem:[%s7010_s23 + $0x28] ss:$16 sps:$4 sm:$0xff]   ;;  %3418 = vmatprep.subr.bf16.mxu1 %v5329_v20  ;;  %v3196_v3 = vrot.slane %v7345_v46, %v7137_v13 }
0x17a8   : > { %3460 = vmatpush1.bf16.msra.mxu0 %v5324_v24  ;;  %v5367_v46 = vld [vmem:[%s7017_s7 + $0x48] sm:$0xff]   ;;  %v5377_v20 = vld [vmem:[%s7017_s7 + $0x18] sm:$0xff]  }
0x17a9   : > { %3167 = vadd.xlane.f32.xlu1 %v7484_v5  ;;  %3461 = vmatprep.subr.bf16.mxu0 %v5332_v25  ;;  %v5368_v24 = vld [vmem:[%s7017_s7 + $0xc8] sm:$0xff]   ;;  %v5378_v25 = vld [vmem:[%s7017_s7 + $0x98] sm:$0xff]  }
0x17aa   : > { %3419 = vmatpush1.bf16.msra.mxu1 %v5327_v26  ;;  %v5379_v26 = vld [vmem:[%s7017_s7 + $0x60] sm:$0xff]  }
0x17ab   : > { %3420 = vmatprep.subr.bf16.mxu1 %v5335_v28  ;;  %v5381_v28 = vld [vmem:[%s7017_s7 + $0x20] sm:$0xff]  }
0x17ac   : > { %3462 = vmatpush1.bf16.msra.mxu0 %v5330_v54  ;;  %v5380_v54 = vld [vmem:[%s7017_s7 + $0xe0] sm:$0xff]  }
0x17ad   : > { %3463 = vmatprep.subr.bf16.mxu0 %v5338_v31  ;;  %v5382_v31 = vld [vmem:[%s7017_s7 + $0xa0] sm:$0xff]  }
0x17ae   : > { %3421 = vmatpush1.bf16.msra.mxu1 %v5333_v33  ;;  %v5383_v33 = vld [vmem:[%s7017_s7 + $0x68] sm:$0xff]  }
0x17af   : > { %3422 = vmatprep.subr.bf16.mxu1 %v5341_v35  ;;  %v5385_v35 = vld [vmem:[%s7017_s7 + $0x28] sm:$0xff]  }
0x17b0   : > { %3464 = vmatpush1.bf16.msra.mxu0 %v5336_v34  ;;  %v5384_v34 = vld [vmem:[%s7017_s7 + $0xe8] sm:$0xff]  }
0x17b1   : > { %3465 = vmatprep.subr.bf16.mxu0 %v5344_v23  ;;  %v5386_v23 = vld [vmem:[%s7017_s7 + $0xa8] sm:$0xff]  }
0x17b2   : > { %3423 = vmatpush1.bf16.msra.mxu1 %v5339_v39  ;;  %v5387_v39 = vld [vmem:[%s7017_s7 + $0x70] sm:$0xff]  }
0x17b3   : > { %3424 = vmatprep.subr.bf16.mxu1 %v5347_v29  ;;  %v5389_v29 = vld [vmem:[%s7017_s7 + $0x30] sm:$0xff]  }
0x17b4   : > { %3466 = vmatpush1.bf16.msra.mxu0 %v5342_v27  ;;  %v5388_v27 = vld [vmem:[%s7017_s7 + $0xf0] sm:$0xff]  }
0x17b5   : > { %3467 = vmatprep.subr.bf16.mxu0 %v5350_v40  ;;  %v5390_v40 = vld [vmem:[%s7017_s7 + $0xb0] sm:$0xff]  }
0x17b6   : > { %3425 = vmatpush1.bf16.msra.mxu1 %v5345_v41  ;;  %v5391_v41 = vld [vmem:[%s7017_s7 + $0x78] sm:$0xff]  }
0x17b7   : > { %3426 = vmatprep.subr.bf16.mxu1 %v5353_v44  ;;  %v5393_v44 = vld [vmem:[%s7017_s7 + $0x38] sm:$0xff]  }
0x17b8   : > { %3468 = vmatpush1.bf16.msra.mxu0 %v5348_v43  ;;  %v5392_v43 = vld [vmem:[%s7017_s7 + $0xf8] sm:$0xff]  }
0x17b9   : > { %3469 = vmatprep.subr.bf16.mxu0 %v5356_v38  ;;  %v5394_v38 = vld [vmem:[%s7017_s7 + $0xb8] sm:$0xff]  }
0x17ba   : > { %3427 = vmatpush1.bf16.msra.mxu1 %v5351_v47  ;;  %v3232_v47 = vld [vmem:[%s7020_s9] sm:$0xf] }
0x17bb   : > { %3428 = vmatprep.subr.bf16.mxu1 %v5359_v45  ;;  %v3241_v45 = vrot.slane %v3232_v47, %v7099_v42 }
0x17bc   : > { %3470 = vmatpush1.bf16.msra.mxu0 %v5354_v22  ;;  %v3237_v22 = vrot.slane %v3232_v47, %v7090_v37 }
0x17bd   : > { %3471 = vmatprep.subr.bf16.mxu0 %v5362_v50 }
0x17be   : > { %3429 = vmatpush1.bf16.msra.mxu1 %v5357_v48  ;;  %v3245_v48 = vrot.slane %v3232_v47, %v7127_v59 }
0x17bf   : > { %4746 = vmatprep.subr.bf16.mxu1 %v5363_v2 }
0x17c0   : > { %3472 = vmatpush1.bf16.msra.mxu0 %v5360_v49  ;;  %v3249_v49 = vrot.slane %v3232_v47, %v7137_v13 }
0x17c1   : > { %4768 = vmatprep.subr.bf16.mxu0 %v5364_v14 }
0x1834   : > { %v3166_v15 = vpop.xlane.xlu0 %3165 }
0x1835   : > { %v3169_v21 = vmul.f32 0.0078125, %v3166_v15  ;;  %v5369_v15 = vld [vmem:[%s7017_s7 + $0x8] sm:$0xff]  }
0x1836   : > { %v3168_v9 = vpop.xlane.xlu1 %3167 }
0x1837   : > { %v7497_v11 = vsub.f32 %v7481_v1, %v3169_v21  ;;  %v3170_v63 = vmul.f32 0.0078125, %v3168_v9  ;;  %v5370_v21 = vld [vmem:[%s7017_s7 + $0x88] sm:$0xff]   ;;  %v5371_v9 = vld [vmem:[%s7017_s7 + $0x50] sm:$0xff]  }
0x1839   : > { %v7500_v16 = vsub.f32 %v7484_v5, %v3170_v63  ;;  %v3173_v18 = vmul.f32 %v7497_v11, %v7497_v11  ;;  %v5373_v63 = vld [vmem:[%s7017_s7 + $0x10] sm:$0xff]  }
0x183b   : > { %3175 = vadd.xlane.f32.xlu0 %v3173_v18  ;;  %v3174_v19 = vmul.f32 %v7500_v16, %v7500_v16  ;;  %v5375_v18 = vld [vmem:[%s7017_s7 + $0x58] sm:$0xff]  }
0x183f   : > { %3177 = vadd.xlane.f32.xlu0 %v3174_v19  ;;  %v5376_v19 = vld [vmem:[%s7017_s7 + $0xd8] sm:$0xff]  }
0x18c8   : > { %v3176_v51 = vpop.xlane.xlu0 %3175 }
0x18c9   : > { %v3179_v52 = vmul.f32 0.0078125, %v3176_v51 }
0x18cb   : > { %v3181_v53 = vadd.f32 1e-05, %v3179_v52 }
0x18cc   : > { %v3178_v56 = vpop.xlane.xlu0 %3177 }
0x18cd   : > { %5467 = vrsqrt.f32 %v3181_v53  ;;  %v3180_v57 = vmul.f32 0.0078125, %v3178_v56 }
0x18cf   : > { %v3182_v58 = vadd.f32 1e-05, %v3180_v57 }
0x18d1   : > { %5469 = vrsqrt.f32 %v3182_v58 }
0x18d7   : > { %v5468_v60 = vpop.eup %5467 }
0x18d8   : > { %v3185_v32 = vmul.f32 %v5468_v60, %v7497_v11  ;;  %v5372_v11 = vld [vmem:[%s7017_s7 + $0xd0] sm:$0xff]  }
0x18da   : > { %v3191_v0 = vmul.f32 %v3190_v30, %v3185_v32 }
0x18db   : > { %v5470_v61 = vpop.eup %5469 }
0x18dc   : > { %v3186_v62 = vmul.f32 %v5470_v61, %v7500_v16  ;;  %v3197_v6 = vadd.f32 %v3196_v3, %v3191_v0  ;;  %v5374_v16 = vld [vmem:[%s7017_s7 + $0x90] sm:$0xff]   ;;  %s7859_s7 = sld [smem:[#allocation46_spill]] }
0x18de   : > { %v3192_v4 = vmul.f32 %v3190_v30, %v3186_v62 }
0x18e0   : > { %v3198_v8 = vadd.f32 %v3196_v3, %v3192_v4 }
0x18e2   : > { %v3199_v10 = vpack.c.bf16 %v3198_v8, %v3197_v6  ;;  %p4600_p2 = scmp.ne.s32.totalorder %s7859_s7, 1 }
0x18e4   : > { %3447 = vmatmul.mubr.bf16.vlgmr.msra.gmra.mrb[56].mxu1 %v3199_v10  ;;  %3490 = vmatmul.mubr.bf16.vlgmr.msra.gmra.mrb[40].mxu0 %v3199_v10 }
0x18e5   : > { %4747 = vmatpush3.bf16.msra.mxu1 %v5365_v55  ;;  %4769 = vmatpush3.bf16.msra.mxu0 %v5366_v17 }
0x18e6   : > { %4748 = vmatprep.subr.bf16.mxu1 %v5367_v46  ;;  %4770 = vmatprep.subr.bf16.mxu0 %v5368_v24 }
0x18e9   : > { %4749 = vmatpush3.bf16.msra.mxu1 %v5369_v15  ;;  %4771 = vmatpush3.bf16.msra.mxu0 %v5370_v21 }
0x18ea   : > { %4750 = vmatprep.subr.bf16.mxu1 %v5371_v9  ;;  %4772 = vmatprep.subr.bf16.mxu0 %v5372_v11 }
0x18ed   : > { %4751 = vmatpush3.bf16.msra.mxu1 %v5373_v63  ;;  %4773 = vmatpush3.bf16.msra.mxu0 %v5374_v16 }
0x18ee   : > { %4752 = vmatprep.subr.bf16.mxu1 %v5375_v18  ;;  %4774 = vmatprep.subr.bf16.mxu0 %v5376_v19 }
0x18f1   : > { %4753 = vmatpush3.bf16.msra.mxu1 %v5377_v20  ;;  %4775 = vmatpush3.bf16.msra.mxu0 %v5378_v25 }
0x18f2   : > { %4754 = vmatprep.subr.bf16.mxu1 %v5379_v26  ;;  %4776 = vmatprep.subr.bf16.mxu0 %v5380_v54 }
0x18f5   : > { %4755 = vmatpush3.bf16.msra.mxu1 %v5381_v28  ;;  %4777 = vmatpush3.bf16.msra.mxu0 %v5382_v31 }
0x18f6   : > { %4756 = vmatprep.subr.bf16.mxu1 %v5383_v33  ;;  %4778 = vmatprep.subr.bf16.mxu0 %v5384_v34 }
0x18f9   : > { %4757 = vmatpush3.bf16.msra.mxu1 %v5385_v35  ;;  %4779 = vmatpush3.bf16.msra.mxu0 %v5386_v23 }
0x18fa   : > { %4758 = vmatprep.subr.bf16.mxu1 %v5387_v39  ;;  %4780 = vmatprep.subr.bf16.mxu0 %v5388_v27 }
0x18fd   : > { %4759 = vmatpush3.bf16.msra.mxu1 %v5389_v29  ;;  %4781 = vmatpush3.bf16.msra.mxu0 %v5390_v40 }
0x18fe   : > { %4760 = vmatprep.subr.bf16.mxu1 %v5391_v41  ;;  %4782 = vmatprep.subr.bf16.mxu0 %v5392_v43 }
0x1901   : > { %4761 = vmatpush3.bf16.msra.mxu1 %v5393_v44  ;;  %4783 = vmatpush3.bf16.msra.mxu0 %v5394_v38 }
0x19b7   : > { %v3448_v50 = vpop.f32.mrb[56].mxu1  ;;  %v3491_v7 = vpop.f32.mrb[40].mxu0 }
0x19b8   : > { %v7573_v51 = vadd.f32 %v3448_v50, %v3237_v22  ;;  %v7575_v52 = vadd.f32 %v3491_v7, %v3245_v48  ;;  %v3450_v53 = vpop.f32.mrb[57].mxu1  ;;  %v3493_v56 = vpop.f32.mrb[41].mxu0 }
0x19b9   : > { %v7577_v57 = vadd.f32 %v3450_v53, %v3241_v45  ;;  %v7579_v58 = vadd.f32 %v3493_v56, %v3249_v49  ;;  %v3452_v60 = vpop.f32.mrb[58].mxu1  ;;  %v3495_v37 = vpop.f32.mrb[42].mxu0 }
0x19ba   : > { %v3500_v59 = vmul.f32 %v7573_v51, %v7573_v51  ;;  %v3502_v42 = vmul.f32 %v7575_v52, %v7575_v52  ;;  %v7585_v13 = vadd.f32 %v3452_v60, %v3237_v22  ;;  %v7587_v30 = vadd.f32 %v3495_v37, %v3245_v48  ;;  %v3454_v32 = vpop.f32.mrb[59].mxu1  ;;  %v3497_v61 = vpop.f32.mrb[43].mxu0 }
0x19bb   : > { %v3501_v62 = vmul.f32 %v7577_v57, %v7577_v57  ;;  %v3503_v0 = vmul.f32 %v7579_v58, %v7579_v58  ;;  %v7593_v3 = vadd.f32 %v3454_v32, %v3241_v45  ;;  %v7595_v4 = vadd.f32 %v3497_v61, %v3249_v49 }
0x19bc   : > { %v3508_v6 = vmul.f32 %v3500_v59, %v7573_v51  ;;  %v3510_v8 = vmul.f32 %v3502_v42, %v7575_v52  ;;  %v3504_v10 = vmul.f32 %v7585_v13, %v7585_v13  ;;  %v3506_v2 = vmul.f32 %v7587_v30, %v7587_v30 }
0x19bd   : > { %v3509_v14 = vmul.f32 %v3501_v62, %v7577_v57  ;;  %v3511_v55 = vmul.f32 %v3503_v0, %v7579_v58  ;;  %v3505_v17 = vmul.f32 %v7593_v3, %v7593_v3  ;;  %v3507_v46 = vmul.f32 %v7595_v4, %v7595_v4 }
0x19be   : > { %v3516_v24 = vmul.f32 0.044715, %v3508_v6  ;;  %v3518_v15 = vmul.f32 0.044715, %v3510_v8  ;;  %v3512_v21 = vmul.f32 %v3504_v10, %v7585_v13  ;;  %v3514_v9 = vmul.f32 %v3506_v2, %v7587_v30 }
0x19bf   : > { %v3517_v11 = vmul.f32 0.044715, %v3509_v14  ;;  %v3519_v63 = vmul.f32 0.044715, %v3511_v55  ;;  %v3513_v16 = vmul.f32 %v3505_v17, %v7593_v3  ;;  %v3515_v18 = vmul.f32 %v3507_v46, %v7595_v4 }
0x19c0   : > { %v3524_v19 = vadd.f32 %v3516_v24, %v7573_v51  ;;  %v3526_v20 = vadd.f32 %v3518_v15, %v7575_v52  ;;  %v3520_v25 = vmul.f32 0.044715, %v3512_v21  ;;  %v3522_v26 = vmul.f32 0.044715, %v3514_v9 }
0x19c1   : > { %v3525_v54 = vadd.f32 %v3517_v11, %v7577_v57  ;;  %v3527_v28 = vadd.f32 %v3519_v63, %v7579_v58  ;;  %v3521_v31 = vmul.f32 0.044715, %v3513_v16  ;;  %v3523_v33 = vmul.f32 0.044715, %v3515_v18 }
0x19c2   : > { %v3532_v34 = vmul.f32 0.7978846, %v3524_v19  ;;  %v3534_v35 = vmul.f32 0.7978846, %v3526_v20  ;;  %v3528_v23 = vadd.f32 %v3520_v25, %v7585_v13  ;;  %v3530_v39 = vadd.f32 %v3522_v26, %v7587_v30 }
0x19c3   : > { %v3533_v27 = vmul.f32 0.7978846, %v3525_v54  ;;  %v3535_v29 = vmul.f32 0.7978846, %v3527_v28  ;;  %v3529_v40 = vadd.f32 %v3521_v31, %v7593_v3  ;;  %v3531_v41 = vadd.f32 %v3523_v33, %v7595_v4 }
0x19c4   : > { %5471 = vtanh.f32 %v3532_v34  ;;  %v3536_v43 = vmul.f32 0.7978846, %v3528_v23  ;;  %v3538_v44 = vmul.f32 0.7978846, %v3530_v39 }
0x19c5   : > { %5473 = vtanh.f32 %v3534_v35  ;;  %v3537_v38 = vmul.f32 0.7978846, %v3529_v40  ;;  %v3539_v47 = vmul.f32 0.7978846, %v3531_v41 }
0x19c6   : > { %5475 = vtanh.f32 %v3533_v27 }
0x19c7   : > { %5477 = vtanh.f32 %v3535_v29 }
0x19c8   : > { %5479 = vtanh.f32 %v3536_v43 }
0x19c9   : > { %5481 = vtanh.f32 %v3538_v44 }
0x19ca   : > { %5483 = vtanh.f32 %v3537_v38 }
0x19cb   : > { %5485 = vtanh.f32 %v3539_v47 }
0x19ce   : > { %v5472_v22 = vpop.eup %5471 }
0x19cf   : > { %v5474_v48 = vpop.eup %5473  ;;  %v3548_v45 = vadd.f32 1.0, %v5472_v22 }
0x19d0   : > { %v5476_v49 = vpop.eup %5475  ;;  %v3550_v50 = vadd.f32 1.0, %v5474_v48 }
0x19d1   : > { %v5478_v7 = vpop.eup %5477  ;;  %v3549_v53 = vadd.f32 1.0, %v5476_v49  ;;  %v3556_v59 = vmul.f32 0.5, %v3548_v45 }
0x19d2   : > { %v5480_v56 = vpop.eup %5479  ;;  %v3551_v60 = vadd.f32 1.0, %v5478_v7  ;;  %v3558_v61 = vmul.f32 0.5, %v3550_v50 }
0x19d3   : > { %v5482_v37 = vpop.eup %5481  ;;  %v3552_v42 = vadd.f32 1.0, %v5480_v56  ;;  %v3557_v10 = vmul.f32 0.5, %v3549_v53  ;;  %v3564_v17 = vmul.f32 %v3556_v59, %v7573_v51 }
0x19d4   : > { %v5484_v32 = vpop.eup %5483  ;;  %v3554_v62 = vadd.f32 1.0, %v5482_v37  ;;  %v3559_v55 = vmul.f32 0.5, %v3551_v60  ;;  %v3566_v15 = vmul.f32 %v3558_v61, %v7575_v52  ;;  %v4601_v60 = vld [vmem:[#allocation26] ss:$0 sm:$0xff] (!%p4600_p2) }
0x19d5   : > { %v5486_v0 = vpop.eup %5485  ;;  %v3560_v6 = vmul.f32 0.5, %v3552_v42  ;;  %v3553_v8 = vadd.f32 1.0, %v5484_v32  ;;  %v3565_v11 = vmul.f32 %v3557_v10, %v7577_v57  ;;  %v4602_v32 = vld [vmem:[#allocation27] ss:$0 sm:$0xff] (!%p4600_p2) }
0x19d6   : > { %v3562_v2 = vmul.f32 0.5, %v3554_v62  ;;  %v3555_v14 = vadd.f32 1.0, %v5486_v0  ;;  %v3567_v18 = vmul.f32 %v3559_v55, %v7579_v58 }
0x19d7   : > { %v3568_v46 = vmul.f32 %v3560_v6, %v7585_v13  ;;  %v3561_v24 = vmul.f32 0.5, %v3553_v8 }
0x19d8   : > { %v3570_v21 = vmul.f32 %v3562_v2, %v7587_v30  ;;  %v3563_v9 = vmul.f32 0.5, %v3555_v14 }
0x19d9   : > { %v3569_v63 = vmul.f32 %v3561_v24, %v7593_v3  ;;  %v3572_v16 = vpack.c.bf16 %v3568_v46, %v3564_v17 }
0x19da   : > { %v3571_v19 = vmul.f32 %v3563_v9, %v7595_v4  ;;  %v3574_v20 = vpack.c.bf16 %v3570_v21, %v3566_v15  ;;  %v5489_v4 = vld [vmem:[%s6965_s18 + $0x8] sm:$0x1f] }
0x19db   : > { %v3573_v25 = vpack.c.bf16 %v3569_v63, %v3565_v11  ;;  %v3919_v34 = vrot.slane %v5489_v4, %v2028_v12 }
0x19dc   : > { %v3575_v51 = vpack.c.bf16 %v3571_v19, %v3567_v18 }
0x19dd   : > { %3864 = vmatprep.mubr.bf16.mxu1 %v3573_v25 }
0x19de   : > { %3905 = vmatprep.mubr.bf16.mxu0 %v3575_v51  ;;  %3865 = vmatmul.mubr.bf16.vlgmr.msra.gmra.mrb[60].mxu1 %v3572_v16 }
0x19df   : > { %3906 = vmatmul.mubr.bf16.vlgmr.msra.gmra.mrb[44].mxu0 %v3574_v20 }
0x1ab1   : > { %v4762_v52 = vpop.f32.mrb[60].mxu1 }
0x1ab2   : > { %v4784_v13 = vpop.f32.mrb[44].mxu0  ;;  %v4763_v30 = vpop.f32.mrb[61].mxu1 }
0x1ab3   : > { %v4764_v26 = vadd.f32 %v4763_v30, %v4762_v52  ;;  %v4785_v57 = vpop.f32.mrb[45].mxu0  ;;  %v4765_v54 = vpop.f32.mrb[62].mxu1 }
0x1ab4   : > { %v4786_v3 = vadd.f32 %v4785_v57, %v4784_v13  ;;  %v4787_v28 = vpop.f32.mrb[46].mxu0  ;;  %v4766_v31 = vpop.f32.mrb[63].mxu1 }
0x1ab5   : > { %v4767_v58 = vadd.f32 %v4766_v31, %v4765_v54  ;;  %v4788_v33 = vpop.f32.mrb[47].mxu0 }
0x1ab6   : > { %v3908_v35 = vadd.f32 %v4786_v3, %v4764_v26  ;;  %v4789_v23 = vadd.f32 %v4788_v33, %v4787_v28 }
0x1ab8   : > { %v3914_v39 = vadd.f32 %v3908_v35, %v7481_v1  ;;  %v3911_v27 = vadd.f32 %v4789_v23, %v4767_v58  ;;  %3927 = sbr.rel (%p4600_p2) target bundleno = 7162 (0x1bfa), region = 156 }
0x1aba   : > { %v3920_v29 = vadd.f32 %v3919_v34, %v3914_v39  ;;  %v3915_v40 = vadd.f32 %v3911_v27, %v7484_v5 }
0x1abc   : > { %3922 = vst [vmem:[#allocation2] sm:$0xff] %v3920_v29  ;;  %v3921_v41 = vadd.f32 %v3919_v34, %v3915_v40  ;;  %3930 = vadd.xlane.f32.xlu0 (!%p4600_p2), %v3920_v29 }
0x1abe   : > { %3923 = vst [vmem:[#allocation2 + $0x8] sm:$0xff] %v3921_v41 }
0x1ac0   : > { %3932 = vadd.xlane.f32.xlu0 %v3921_v41 }
0x1b49   : > { %v3931_v43 = vpop.xlane.xlu0 %3930 }
0x1b4a   : > { %v3934_v44 = vmul.f32 0.0078125, %v3931_v43 }
0x1b4c   : > { %v3936_v36 = vsub.f32 %v3920_v29, %v3934_v44 }
0x1b4d   : > { %v3933_v12 = vpop.xlane.xlu0 %3932 }
0x1b4e   : > { %v3935_v38 = vmul.f32 0.0078125, %v3933_v12  ;;  %v3938_v47 = vmul.f32 %v3936_v36, %v3936_v36 }
0x1b50   : > { %v3937_v22 = vsub.f32 %v3921_v41, %v3935_v38  ;;  %3940 = vadd.xlane.f32.xlu1 %v3938_v47 }
0x1b52   : > { %v3939_v1 = vmul.f32 %v3937_v22, %v3937_v22 }
0x1b54   : > { %3942 = vadd.xlane.f32.xlu1 %v3939_v1 }
0x1bdd   : > { %v3941_v48 = vpop.xlane.xlu1 %3940 }
0x1bde   : > { %v3944_v5 = vmul.f32 0.0078125, %v3941_v48 }
0x1be0   : > { %v3946_v45 = vadd.f32 1e-05, %v3944_v5 }
0x1be1   : > { %v3943_v49 = vpop.xlane.xlu1 %3942 }
0x1be2   : > { %5490 = vrsqrt.f32 %v3946_v45  ;;  %v3945_v50 = vmul.f32 0.0078125, %v3943_v49 }
0x1be4   : > { %v3947_v7 = vadd.f32 1e-05, %v3945_v50 }
0x1be6   : > { %5492 = vrsqrt.f32 %v3947_v7 }
0x1bec   : > { %v5491_v53 = vpop.eup %5490 }
0x1bed   : > { %v3950_v56 = vmul.f32 %v5491_v53, %v3936_v36 }
0x1bef   : > { %v3958_v59 = vmul.f32 %v4601_v60, %v3950_v56 }
0x1bf0   : > { %v5493_v37 = vpop.eup %5492 }
0x1bf1   : > { %v3951_v42 = vmul.f32 %v5493_v37, %v3937_v22  ;;  %v3966_v62 = vadd.f32 %v4602_v32, %v3958_v59 }
0x1bf3   : > { %v3959_v61 = vmul.f32 %v4601_v60, %v3951_v42 }
0x1bf5   : > { %v3967_v0 = vadd.f32 %v4602_v32, %v3959_v61 }
0x1bf7   : > { %v4630_v6 = vpack.c.bf16 %v3967_v0, %v3966_v62 }
0x1bf9   : > { %4631 = vst [vmem:[%s7035_s2] sm:$0xff] %v4630_v6  }
0x1bfa PF: > { %s7860_s9 = sld [smem:[#allocation47_spill]]  ;;  %s7861_s11 = sld [smem:[#allocation56_spill]] }
0x1bfb   : > { %s7862_s1 = sld [smem:[#allocation73_spill]]  ;;  %s3993_s28 = sshll.u32 %s7035_s2, 4  ;;  %s7643_s28 = int_to_ptr.vmem [resolvable:$true] %s3993_s28 }
0x1bfc   : > { %s3979_s15 = scalar_lea.sflag [#allocation5], %s6941_s25  ;;  %s5942_s19 = scalar_lea.vmem %s7643_s28, 128 }
0x1bfd   : > { %p5943_p4 = scmp.ne.s32.totalorder %s7643_s28, %s5942_s19  ;;  %s6134_s16 = smov [#allocation29]  }
0x1bfe   : > { %s5946_s20 = sshll.u32 %s6134_s16, 4  ;;  %s5947_s20 = int_to_ptr.vmem [resolvable:$false] %s5946_s20 }
0x1bff   : > { %s5948_s6 = scalar_lea.vmem %s5947_s20, 256  ;;  %p5949_p9 = scmp.lt.s32.totalorder %s7643_s28, %s5947_s20 }
0x1c00   : > { %s4626_s27 = sshll.u32 %s7860_s9, 7  ;;  %p7863_p5 = scmp.ne.s32.totalorder %s7861_s11, 0 }
0x1c01   : > { %s7640_s22 = scalar_lea.hbm %s7862_s1, %s4626_s27  ;;  %p5950_p6 = scmp.lt.s32.totalorder %s5948_s6, %s5942_s19 }
0x1c02   : > { %p5944_p1 = pnand %p5943_p4, %p7863_p5 }
0x1c03   : > { %p5951_p10 = por %p5950_p6, %p5949_p9 }
0x1c04   : > { %p5945_p11 = pneg %p5944_p1 }
0x1c06   : > { %p5952_p8 = pnand %p5951_p10, %p5945_p11 }
0x1c08   : > { %5955 = shalt.err (!%p5952_p8)
}
0x1c09   : > { %s5956_s24 = scalar_lea.hbm %s7640_s22, 128  ;;  %s5960_s5 = scalar_lea.hbm %s7862_s1, 256 }
0x1c0a   : > { %p5957_p7 = scmp.ne.s32.totalorder %s7640_s22, %s5956_s24  ;;  %p5961_p12 = scmp.lt.u32.totalorder %s7640_s22, %s7862_s1 }
0x1c0b   : > { %p5962_p0 = scmp.lt.u32.totalorder %s5960_s5, %s5956_s24  ;;  %p5964_p4 = scmp.lt.u32.totalorder %s5956_s24, %s7640_s22 }
0x1c0c   : > { %p5958_p13 = pnand %p5957_p7, %p7863_p5 }
0x1c0d   : > { %p5963_p2 = por %p5962_p0, %p5961_p12 }
0x1c0e   : > { %p5959_p3 = pneg %p5958_p13 }
0x1c0f   : > { %p5965_p1 = por %p5964_p4, %p5963_p2 }
0x1c11   : > { %p5966_p11 = pnand %p5965_p1, %p5959_p3 }
0x1c13   : > { %5969 = shalt.err (!%p5966_p11)
}
0x1c14   : > { %s6135_s8 = smov 4  }
0x1c15   : > { %5098 = dma.vmem_to_hbm [thread:$0]  (%p7863_p5), %s7643_s28, 128, %s7640_s22, %s3979_s15, %s6131_s4, %s6131_s4, %s6135_s8  }
0x1c16 PF: > { %s7864_s17 = sld [smem:[#allocation48_spill]]  ;;  %s7865_s7 = sld [smem:[#allocation44_spill]] }
0x1c17   : > { %s7866_s9 = sld [smem:[#allocation57_spill]] }
0x1c1c   : > { %p5115_p9 = scmp.ge.s32.totalorder %s7864_s17, 2  ;;  %s4008_s27 = sand.u32 1, %s7865_s7  }
0x1c1d   : > { %p7867_p6 = scmp.ne.s32.totalorder %s7866_s9, 0  ;;  %s4009_s18 = scalar_lea.sflag [#allocation5], %s4008_s27 }
0x1c1f   : > { %p5108_p10 = pnand %p5115_p9, %p7867_p6 }
0x1c21   : > { %6059 = dma.done.wait (!%p5108_p10), %s4009_s18, 128  }
0x1c22   : > { %6061 = vsyncadd (!%p5108_p10), %s4009_s18, 4294967168  ;;  %s54_s0 = sadd.s32 1, %s7864_s17   ;;  %s7868_s21 = sld [smem:[#allocation42_spill]] }
0x1c23   : > { %p51_p8 = scmp.ge.s32.totalorder %s54_s0, 6   ;;  %s7869_s22 = sld [smem:[#allocation43_spill]] }
0x1c24   : > { %s7870_s23 = sld [smem:[#allocation53_spill]]  ;;  %s7871_s24 = sld [smem:[#allocation45_spill]] }
0x1c25   : > { %s7872_s4 = sld [smem:[#allocation54_spill]]  ;;  %s7873_s11 = sld [smem:[#allocation50_spill]] }
0x1c26   : > { %s7874_s3 = sld [smem:[#allocation51_spill]]  ;;  %s7875_s25 = smov %s6084_s26 }
0x1c27   : > { %s7877_s27 = smov %s6096_s29  ;;  %s7878_s28 = smov %s6100_s30 }
0x1c28   :  { %53 = sbr.rel (!%p51_p8) target bundleno = 41 (0x29), region = 304 }
0x1c2b   : > { %s7876_s26 = smov %s7872_s4  ;;  %s7879_s29 = smov %s7873_s11 }
0x1c2c   : > { %s7880_s30 = smov %s7874_s3 }
0x1c2f   :  { %4014 = vsyncpa [#allocation4], 1 }
0x1c30   :  { %4016 = vsyncpa [#allocation4 + $0x1], 1 }
0x1c31   :  { %4017 = vsyncpa [#allocation7], 1 }
0x1c32   :  { %4019 = vsyncpa [#allocation7 + $0x1], 1 }
0x1c33   :  { %4020 = vsyncpa [#allocation10], 1 }
0x1c34   :  { %4022 = vsyncpa [#allocation10 + $0x1], 1 }
0x1c35   :  { %4023 = vsyncpa [#allocation13], 1 }
0x1c36   :  { %4025 = vsyncpa [#allocation13 + $0x1], 1 }
0x1c37   :  { %4026 = vsyncpa [#allocation16], 1 }
0x1c38   :  { %4028 = vsyncpa [#allocation16 + $0x1], 1 }
0x1c39   :  { %4029 = vsyncpa [#allocation19], 1 }
0x1c3a   :  { %4031 = vsyncpa [#allocation19 + $0x1], 1 }
0x1c3b   :  { %4032 = vsyncpa [#allocation22], 1 }
0x1c3c   :  { %4034 = vsyncpa [#allocation22 + $0x1], 1 }
0x1c3d   :  { %4035 = vsyncpa [#allocation25], 1 }
0x1c3e   :  { %4037 = vsyncpa [#allocation25 + $0x1], 1 }
0x1c3f   :  { %4038 = vsyncpa [#allocation28], 1 }
0x1c40   :  { %4039 = vsyncpa [#allocation5], 1 }
0x1c41   :  { %4041 = vsyncpa [#allocation5 + $0x1], 1 }

</bundles_post_ra>
